<compile_context>
chip_gen: v5e
topology: v5e:2x2
jax: 0.10.0
libtpu: 0.0.40
codegen_flags: <defaults>
</compile_context>

<pallas_src>
import functools

import jax
import jax.numpy as jnp
from jax.experimental import pallas as pl
from jax.experimental.pallas import tpu as pltpu

BN_EPS = 1e-5
HALO = 8          # sublane-aligned time halo (>= max conv kernel_size // 2)


# ----------------------------------------------------------------------------
# Fused Pallas kernel (one batch element per grid step)
# ----------------------------------------------------------------------------
def ecapa_kernel(x_ref, c1w_ref, c1b_ref, bn1s_ref, bn1h_ref,
                 rw_ref, rb_ref, sw1_ref, sb1_ref, sw2_ref, sb2_ref,
                 bns_ref, bnh_ref, ew_ref, eb_ref,
                 o_ref,
                 xpad_ref, gpad_ref, r_ref,
                 *, T, K1, K2, W, nums):
    P1 = K1 // 2
    P2 = K2 // 2
    Fm = x_ref.shape[2]
    C = nums * W
    bf16 = jnp.bfloat16
    f32 = jnp.float32

    # ---- conv1 + ReLU + folded BN1 ------------------------------------------
    # Time halo lives in a pre-zeroed bf16 VMEM scratch; the interior store is
    # the only f32->bf16 cast of the input (taps then read bf16 directly).
    xpad_ref[pl.ds(0, HALO), :] = jnp.zeros((HALO, Fm), bf16)
    xpad_ref[pl.ds(HALO + T, HALO), :] = jnp.zeros((HALO, Fm), bf16)
    xpad_ref[pl.ds(HALO, T), :] = x_ref[0].astype(bf16)

    # K1 accumulating per-tap MXU matmuls (no im2col concat), f32 accumulation.
    h = jnp.zeros((T, C), f32)
    for k in range(K1):
        h = h + jnp.dot(xpad_ref[pl.ds(HALO - P1 + k, T), :],
                        c1w_ref[pl.ds(k * Fm, Fm), :],
                        preferred_element_type=f32)
    h = jnp.maximum(h + c1b_ref[...], 0.0)
    h = h * bn1s_ref[...] + bn1h_ref[...]                      # (T, C) f32

    # Two-piece layer state: group-0 passthrough channels and the rest.
    h0 = h[:, 0:W]                                             # (T, W)
    hrest = h[:, W:]                                           # (T, C - W)

    # Zero the group-conv halo (tiny, re-done per grid step for megacore safety;
    # interior stores never touch the halo rows afterwards).
    gpad_ref[pl.ds(0, HALO), :] = jnp.zeros((HALO, W), bf16)
    gpad_ref[pl.ds(HALO + T, HALO), :] = jnp.zeros((HALO, W), bf16)

    pooled_parts = []
    for li in range(3):
        # ---- Res2Block: serial group chain, per-tap MXU matmuls --------------
        means = [jnp.mean(h0, axis=0, keepdims=True)]          # group-0 mean (1, W)
        sp = None
        for i in range(nums - 1):
            g = hrest[:, i * W:(i + 1) * W]
            sp = g if i == 0 else sp + g
            gpad_ref[pl.ds(HALO, T), :] = sp.astype(bf16)      # single cast per group
            acc = jnp.zeros((T, W), f32)
            for k in range(K2):
                acc = acc + jnp.dot(gpad_ref[pl.ds(HALO - P2 + k, T), :],
                                    rw_ref[li, i, pl.ds(k * W, W), :],
                                    preferred_element_type=f32)
            sp = acc + rb_ref[li, i]                           # (T, W) f32
            means.append(jnp.mean(sp, axis=0, keepdims=True))
            if li < 2:                                         # last layer never read back
                r_ref[:, pl.ds(i * W, W)] = sp
        s = jnp.concatenate(means, axis=1)                     # (1, C) SE input

        # ---- SEModule: bottleneck MLP + sigmoid gate --------------------------
        z = jnp.dot(s.astype(bf16), sw1_ref[li],
                    preferred_element_type=f32) + sb1_ref[li]
        z = jnp.maximum(z, 0.0)
        gate = jax.nn.sigmoid(
            jnp.dot(z.astype(bf16), sw2_ref[li],
                    preferred_element_type=f32) + sb2_ref[li])  # (1, C)

        # ---- gate folded with BN scale; pooled mean via the same (1, C) affine
        gsc = gate * bns_ref[li]                               # (1, C)
        shf = bnh_ref[li]                                      # (1, C)
        # mean_t(r * gate * bn_sc + bn_sh) == mean_t(r) * gsc + shf
        pooled_parts.append(s * gsc + shf)

        if li < 2:
            # Next-layer input, kept as two pieces (no (T, C) concat, no
            # group-0 store): affine applied once per channel slab.
            h0 = h0 * gsc[:, 0:W] + shf[:, 0:W]
            hrest = r_ref[...] * gsc[:, W:] + shf[:, W:]

    # ---- embedding (single matmul on the (1, 3C) pooled row) + L2 norm -------
    pooled = jnp.concatenate(pooled_parts, axis=1)             # (1, 3C)
    emb = jnp.dot(pooled.astype(bf16), ew_ref[...],
                  preferred_element_type=f32) + eb_ref[...]    # (1, E)
    norm = jnp.sqrt(jnp.sum(emb * emb))
    o_ref[0] = emb / jnp.maximum(norm, 1e-12)                  # F.normalize(p=2)


# ----------------------------------------------------------------------------
# Host-side parameter preparation (fold BN, reshape convs per-tap, cast bf16)
# ----------------------------------------------------------------------------
def prepare_params(p):
    bf16 = jnp.bfloat16
    C, Fm, K1 = p["conv1_w"].shape

    def fold_bn(g, b, m, v):
        sc = g / jnp.sqrt(v + BN_EPS)
        return sc[None, :], (b - m * sc)[None, :]

    kp = {}
    # conv1 (C, F, K1) -> (K1*F, C); per-tap weight = rows [k*F, (k+1)*F)
    kp["c1w"] = jnp.transpose(p["conv1_w"], (2, 1, 0)).reshape(K1 * Fm, C).astype(bf16)
    kp["c1b"] = p["conv1_b"][None, :]
    kp["bn1_sc"], kp["bn1_sh"] = fold_bn(*p["bn1"])

    rw = jnp.stack([p[f"l{li}_res_w"] for li in range(3)])      # (3, nm1, Wo, Wi, K2)
    L, nm1, W, _, K2 = rw.shape
    # per-tap weight = rows [k*W, (k+1)*W) of (K2*Wi, Wo)
    kp["rw"] = jnp.transpose(rw, (0, 1, 4, 3, 2)).reshape(L, nm1, K2 * W, W).astype(bf16)
    kp["rb"] = jnp.stack([p[f"l{li}_res_b"] for li in range(3)])[:, :, None, :]

    sw1 = jnp.stack([p[f"l{li}_se_w1"] for li in range(3)])     # (3, Bn, C)
    kp["sw1"] = jnp.transpose(sw1, (0, 2, 1)).astype(bf16)      # (3, C, Bn)
    kp["sb1"] = jnp.stack([p[f"l{li}_se_b1"] for li in range(3)])[:, None, :]
    sw2 = jnp.stack([p[f"l{li}_se_w2"] for li in range(3)])     # (3, C, Bn)
    kp["sw2"] = jnp.transpose(sw2, (0, 2, 1)).astype(bf16)      # (3, Bn, C)
    kp["sb2"] = jnp.stack([p[f"l{li}_se_b2"] for li in range(3)])[:, None, :]

    bn = [fold_bn(*p[f"l{li}_bn"]) for li in range(3)]
    kp["bn_sc"] = jnp.stack([s for s, _ in bn])                 # (3, 1, C)
    kp["bn_sh"] = jnp.stack([h for _, h in bn])

    kp["ew"] = jnp.transpose(p["emb_w"]).astype(bf16)           # (3C, E)
    kp["eb"] = p["emb_b"][None, :]
    return kp


# ----------------------------------------------------------------------------
# pallas_call wrapper
# ----------------------------------------------------------------------------
def ecapa_pallas(x, kp):
    """x: [B, n_mels, T] log-mel features (f32). Returns [B, E] embeddings."""
    B, Fm, T = x.shape
    xT = jnp.transpose(x, (0, 2, 1))                 # (B, T, F): channels on lanes
    K1F, C = kp["c1w"].shape
    K1 = K1F // Fm
    L, nm1, K2W, W = kp["rw"].shape
    K2 = K2W // W
    E = kp["ew"].shape[1]

    kern = functools.partial(ecapa_kernel, T=T, K1=K1, K2=K2, W=W, nums=nm1 + 1)
    # Grid-invariant weights: whole-array VMEM residents (single-buffered).
    wspec = pl.BlockSpec(memory_space=pltpu.MemorySpace.VMEM)

    out = pl.pallas_call(
        kern,
        out_shape=jax.ShapeDtypeStruct((B, 1, E), jnp.float32),
        grid=(B,),
        in_specs=[pl.BlockSpec((1, T, Fm), lambda i: (i, 0, 0))] + [wspec] * 14,
        out_specs=pl.BlockSpec((1, 1, E), lambda i: (i, 0, 0)),
        scratch_shapes=[
            pltpu.VMEM((T + 2 * HALO, Fm), jnp.bfloat16),   # conv1 time-padded input (bf16)
            pltpu.VMEM((T + 2 * HALO, W), jnp.bfloat16),    # res2 group time-padded buf (bf16)
            pltpu.VMEM((T, C - W), jnp.float32),            # res2 groups 1..nums-1
        ],
        compiler_params=pltpu.CompilerParams(
            dimension_semantics=("parallel",),              # batch across TCs (v7x)
            vmem_limit_bytes=32 * 1024 * 1024),
    )(xT, kp["c1w"], kp["c1b"], kp["bn1_sc"], kp["bn1_sh"],
      kp["rw"], kp["rb"], kp["sw1"], kp["sb1"], kp["sw2"], kp["sb2"],
      kp["bn_sc"], kp["bn_sh"], kp["ew"], kp["eb"])
    return out[:, 0, :]


# ----------------------------------------------------------------------------
# Pure-JAX reference (mirrors the kernel's bf16-at-matmul-inputs policy)
# ----------------------------------------------------------------------------
def ref_forward(x, p):
    bf16 = jnp.bfloat16

    def conv1d(x, w, b):                              # x (B,Cin,T), w (Cout,Cin,K)
        K = w.shape[-1]; P = K // 2; T = x.shape[-1]
        xp = jnp.pad(x, ((0, 0), (0, 0), (P, P))).astype(bf16)
        wb = w.astype(bf16)
        out = sum(jnp.einsum("oc,bct->bot", wb[:, :, k], xp[:, :, k:k + T],
                             preferred_element_type=jnp.float32)
                  for k in range(K))
        return out + b[None, :, None]

    def bn(x, g, b, m, v):
        return (g[None, :, None] * (x - m[None, :, None])
                / jnp.sqrt(v[None, :, None] + BN_EPS) + b[None, :, None])

    def res2(x, w, b):                                # w (nm1,W,W,K), b (nm1,W)
        W = w.shape[1]; nums = w.shape[0] + 1
        out = [x[:, 0:W, :]]
        sp = None
        for i in range(nums - 1):
            sp = x[:, (i + 1) * W:(i + 2) * W, :] if i == 0 else sp + x[:, (i + 1) * W:(i + 2) * W, :]
            sp = conv1d(sp, w[i], b[i])
            out.append(sp)
        return jnp.concatenate(out, axis=1)

    def se(x, w1, b1, w2, b2):
        s = jnp.mean(x, axis=-1, keepdims=True)
        z = jnp.einsum("oc,bcx->box", w1.astype(bf16), s.astype(bf16),
                       preferred_element_type=jnp.float32) + b1[None, :, None]
        z = jnp.maximum(z, 0.0)
        y = jnp.einsum("co,box->bcx", w2.astype(bf16), z.astype(bf16),
                       preferred_element_type=jnp.float32) + b2[None, :, None]
        return x * jax.nn.sigmoid(y)

    h = jnp.maximum(conv1d(x, p["conv1_w"], p["conv1_b"]), 0.0)
    h = bn(h, *p["bn1"])
    feats = []
    for li in range(3):
        h = res2(h, p[f"l{li}_res_w"], p[f"l{li}_res_b"])
        h = se(h, p[f"l{li}_se_w1"], p[f"l{li}_se_b1"],
               p[f"l{li}_se_w2"], p[f"l{li}_se_b2"])
        h = bn(h, *p[f"l{li}_bn"])
        feats.append(h)
    g = jnp.concatenate(feats, axis=1)
    pooled = jnp.mean(g, axis=-1)                     # (B, 3C)
    emb = jnp.einsum("bc,ec->be", pooled.astype(bf16), p["emb_w"].astype(bf16),
                     preferred_element_type=jnp.float32) + p["emb_b"][None, :]
    n = jnp.sqrt(jnp.sum(emb * emb, axis=1, keepdims=True))
    return emb / jnp.maximum(n, 1e-12)


# ----------------------------------------------------------------------------
# Deterministic parameter init + main
# ----------------------------------------------------------------------------
def init_params(key, Fm, C, E, Bn, scale, K1=5, K2=3):
    W = C // scale
    nm1 = scale - 1
    ks = iter(jax.random.split(key, 64))
    nrm = lambda shape, s=0.1: (s * jax.random.normal(next(ks), shape)).astype(jnp.float32)
    uni = lambda shape: jax.random.uniform(next(ks), shape, minval=0.5,
                                           maxval=1.5).astype(jnp.float32)
    p = {
        "conv1_w": nrm((C, Fm, K1)),                  # PyTorch Conv1d layout (O, I, K)
        "conv1_b": nrm((C,)),
        "bn1": (uni((C,)), nrm((C,)), nrm((C,)), uni((C,))),  # gamma, beta, mean, var
        "emb_w": nrm((E, 3 * C)),
        "emb_b": nrm((E,)),
    }
    for li in range(3):
        p[f"l{li}_res_w"] = nrm((nm1, W, W, K2))
        p[f"l{li}_res_b"] = nrm((nm1, W))
        p[f"l{li}_se_w1"] = nrm((Bn, C))
        p[f"l{li}_se_b1"] = nrm((Bn,))
        p[f"l{li}_se_w2"] = nrm((C, Bn))
        p[f"l{li}_se_b2"] = nrm((C,))
        p[f"l{li}_bn"] = (uni((C,)), nrm((C,)), nrm((C,)), uni((C,)))
    return p


if __name__ == "__main__":
    # Small, module-consistent shapes: batch=2, n_mels=16, T=16 frames,
    # channels=128 (scale=8 -> width=16; lane-dense), bottleneck=32, emb_dim=32.
    B, Fm, T = 2, 16, 16
    C, E, Bn, SCALE = 128, 32, 32, 8

    key = jax.random.PRNGKey(0)
    k_x, k_p = jax.random.split(key)
    x = jax.random.normal(k_x, (B, Fm, T), dtype=jnp.float32)  # log-mel [B, n_mels, T]
    params = init_params(k_p, Fm, C, E, Bn, SCALE)
    kparams = prepare_params(params)

    out = jax.block_until_ready(ecapa_pallas(x, kparams))
    assert out.shape == (B, E)

    ref = jax.block_until_ready(ref_forward(x, params))
    max_err = float(jnp.max(jnp.abs(out - ref)))
    assert max_err < 2e-3, f"mismatch vs reference: {max_err}"

    print("KERNEL_OK")
</pallas_src>

<mosaic_0001>
module attributes {stable_mosaic.version = 11 : i64} {
  func.func @ecapa_kernel(%arg0: i32, %arg1: memref<1x16x16xf32, #tpu.memory_space<vmem>>, %arg2: memref<80x128xbf16, #tpu.memory_space<vmem>>, %arg3: memref<1x128xf32, #tpu.memory_space<vmem>>, %arg4: memref<1x128xf32, #tpu.memory_space<vmem>>, %arg5: memref<1x128xf32, #tpu.memory_space<vmem>>, %arg6: memref<3x7x48x16xbf16, #tpu.memory_space<vmem>>, %arg7: memref<3x7x1x16xf32, #tpu.memory_space<vmem>>, %arg8: memref<3x128x32xbf16, #tpu.memory_space<vmem>>, %arg9: memref<3x1x32xf32, #tpu.memory_space<vmem>>, %arg10: memref<3x32x128xbf16, #tpu.memory_space<vmem>>, %arg11: memref<3x1x128xf32, #tpu.memory_space<vmem>>, %arg12: memref<3x1x128xf32, #tpu.memory_space<vmem>>, %arg13: memref<3x1x128xf32, #tpu.memory_space<vmem>>, %arg14: memref<384x32xbf16, #tpu.memory_space<vmem>>, %arg15: memref<1x32xf32, #tpu.memory_space<vmem>>, %arg16: memref<1x1x32xf32, #tpu.memory_space<vmem>>, %arg17: memref<32x16xbf16, #tpu.memory_space<vmem>>, %arg18: memref<32x16xbf16, #tpu.memory_space<vmem>>, %arg19: memref<16x112xf32, #tpu.memory_space<vmem>>) attributes {dimension_semantics = [#tpu.dimension_semantics<parallel>], iteration_bounds = array<i64: 2>, scalar_prefetch = 0 : i64, scratch_operands = 3 : i64, tpu.core_type = #tpu.core_type<tc>, window_params = [{transform_indices = @transform_0, window_bounds = array<i64: 1, 16, 16>}, {pipeline_mode = #tpu.pipeline_mode<synchronous>, transform_indices = @transform_1, window_bounds = array<i64: 80, 128>}, {pipeline_mode = #tpu.pipeline_mode<synchronous>, transform_indices = @transform_2, window_bounds = array<i64: 1, 128>}, {pipeline_mode = #tpu.pipeline_mode<synchronous>, transform_indices = @transform_3, window_bounds = array<i64: 1, 128>}, {pipeline_mode = #tpu.pipeline_mode<synchronous>, transform_indices = @transform_4, window_bounds = array<i64: 1, 128>}, {pipeline_mode = #tpu.pipeline_mode<synchronous>, transform_indices = @transform_5, window_bounds = array<i64: 3, 7, 48, 16>}, {pipeline_mode = #tpu.pipeline_mode<synchronous>, transform_indices = @transform_6, window_bounds = array<i64: 3, 7, 1, 16>}, {pipeline_mode = #tpu.pipeline_mode<synchronous>, transform_indices = @transform_7, window_bounds = array<i64: 3, 128, 32>}, {pipeline_mode = #tpu.pipeline_mode<synchronous>, transform_indices = @transform_8, window_bounds = array<i64: 3, 1, 32>}, {pipeline_mode = #tpu.pipeline_mode<synchronous>, transform_indices = @transform_9, window_bounds = array<i64: 3, 32, 128>}, {pipeline_mode = #tpu.pipeline_mode<synchronous>, transform_indices = @transform_10, window_bounds = array<i64: 3, 1, 128>}, {pipeline_mode = #tpu.pipeline_mode<synchronous>, transform_indices = @transform_11, window_bounds = array<i64: 3, 1, 128>}, {pipeline_mode = #tpu.pipeline_mode<synchronous>, transform_indices = @transform_12, window_bounds = array<i64: 3, 1, 128>}, {pipeline_mode = #tpu.pipeline_mode<synchronous>, transform_indices = @transform_13, window_bounds = array<i64: 384, 32>}, {pipeline_mode = #tpu.pipeline_mode<synchronous>, transform_indices = @transform_14, window_bounds = array<i64: 1, 32>}, {transform_indices = @transform_15, window_bounds = array<i64: 1, 1, 32>}]} {
    %cst = arith.constant 0.000000e+00 : bf16
    %0 = vector.broadcast %cst : bf16 to vector<8x16xbf16>
    %c0 = arith.constant 0 : index
    %c0_0 = arith.constant 0 : index
    %1 = vector.load %arg17[%c0, %c0_0] : memref<32x16xbf16, #tpu.memory_space<vmem>>, vector<8x16xbf16>
    tpu.vector_store %arg17[%c0, %c0_0], %0 {strides = array<i32>} : memref<32x16xbf16, #tpu.memory_space<vmem>>, vector<8x16xbf16>,
    %cst_1 = arith.constant 0.000000e+00 : bf16
    %2 = vector.broadcast %cst_1 : bf16 to vector<8x16xbf16>
    %c24 = arith.constant 24 : index
    %c0_2 = arith.constant 0 : index
    %3 = vector.load %arg17[%c24, %c0_2] : memref<32x16xbf16, #tpu.memory_space<vmem>>, vector<8x16xbf16>
    tpu.vector_store %arg17[%c24, %c0_2], %2 {strides = array<i32>} : memref<32x16xbf16, #tpu.memory_space<vmem>>, vector<8x16xbf16>,
    %c0_3 = arith.constant 0 : index
    %c0_4 = arith.constant 0 : index
    %c0_5 = arith.constant 0 : index
    %4 = vector.load %arg1[%c0_3, %c0_4, %c0_5] : memref<1x16x16xf32, #tpu.memory_space<vmem>>, vector<1x16x16xf32>
    %5 = vector.shape_cast %4 : vector<1x16x16xf32> to vector<16x16xf32>
    %6 = arith.truncf %5 : vector<16x16xf32> to vector<16x16xbf16>
    %c8 = arith.constant 8 : index
    %c0_6 = arith.constant 0 : index
    %7 = vector.load %arg17[%c8, %c0_6] : memref<32x16xbf16, #tpu.memory_space<vmem>>, vector<16x16xbf16>
    tpu.vector_store %arg17[%c8, %c0_6], %6 {strides = array<i32>} : memref<32x16xbf16, #tpu.memory_space<vmem>>, vector<16x16xbf16>,
    %cst_7 = arith.constant 0.000000e+00 : f32
    %8 = vector.broadcast %cst_7 : f32 to vector<16x128xf32>
    %c6 = arith.constant 6 : index
    %c0_8 = arith.constant 0 : index
    %9 = vector.load %arg17[%c6, %c0_8] : memref<32x16xbf16, #tpu.memory_space<vmem>>, vector<16x16xbf16>
    %c0_9 = arith.constant 0 : index
    %c0_10 = arith.constant 0 : index
    %10 = vector.load %arg2[%c0_9, %c0_10] : memref<80x128xbf16, #tpu.memory_space<vmem>>, vector<16x128xbf16>
    %cst_11 = arith.constant dense<0.000000e+00> : vector<16x128xf32>
    %11 = tpu.matmul %9, %10, %cst_11 {dimension_numbers = #tpu.dot_dimension_numbers<[1], [0], [0], [1], [0, 0, 1, 1], [], []>} : vector<16x16xbf16>, vector<16x128xbf16>, vector<16x128xf32> -> vector<16x128xf32>
    %12 = arith.addf %8, %11 : vector<16x128xf32>
    %c7 = arith.constant 7 : index
    %c0_12 = arith.constant 0 : index
    %13 = vector.load %arg17[%c7, %c0_12] : memref<32x16xbf16, #tpu.memory_space<vmem>>, vector<16x16xbf16>
    %c16 = arith.constant 16 : index
    %c0_13 = arith.constant 0 : index
    %14 = vector.load %arg2[%c16, %c0_13] : memref<80x128xbf16, #tpu.memory_space<vmem>>, vector<16x128xbf16>
    %cst_14 = arith.constant dense<0.000000e+00> : vector<16x128xf32>
    %15 = tpu.matmul %13, %14, %cst_14 {dimension_numbers = #tpu.dot_dimension_numbers<[1], [0], [0], [1], [0, 0, 1, 1], [], []>} : vector<16x16xbf16>, vector<16x128xbf16>, vector<16x128xf32> -> vector<16x128xf32>
    %16 = arith.addf %12, %15 : vector<16x128xf32>
    %c8_15 = arith.constant 8 : index
    %c0_16 = arith.constant 0 : index
    %17 = vector.load %arg17[%c8_15, %c0_16] : memref<32x16xbf16, #tpu.memory_space<vmem>>, vector<16x16xbf16>
    %c32 = arith.constant 32 : index
    %c0_17 = arith.constant 0 : index
    %18 = vector.load %arg2[%c32, %c0_17] : memref<80x128xbf16, #tpu.memory_space<vmem>>, vector<16x128xbf16>
    %cst_18 = arith.constant dense<0.000000e+00> : vector<16x128xf32>
    %19 = tpu.matmul %17, %18, %cst_18 {dimension_numbers = #tpu.dot_dimension_numbers<[1], [0], [0], [1], [0, 0, 1, 1], [], []>} : vector<16x16xbf16>, vector<16x128xbf16>, vector<16x128xf32> -> vector<16x128xf32>
    %20 = arith.addf %16, %19 : vector<16x128xf32>
    %c9 = arith.constant 9 : index
    %c0_19 = arith.constant 0 : index
    %21 = vector.load %arg17[%c9, %c0_19] : memref<32x16xbf16, #tpu.memory_space<vmem>>, vector<16x16xbf16>
    %c48 = arith.constant 48 : index
    %c0_20 = arith.constant 0 : index
    %22 = vector.load %arg2[%c48, %c0_20] : memref<80x128xbf16, #tpu.memory_space<vmem>>, vector<16x128xbf16>
    %cst_21 = arith.constant dense<0.000000e+00> : vector<16x128xf32>
    %23 = tpu.matmul %21, %22, %cst_21 {dimension_numbers = #tpu.dot_dimension_numbers<[1], [0], [0], [1], [0, 0, 1, 1], [], []>} : vector<16x16xbf16>, vector<16x128xbf16>, vector<16x128xf32> -> vector<16x128xf32>
    %24 = arith.addf %20, %23 : vector<16x128xf32>
    %c10 = arith.constant 10 : index
    %c0_22 = arith.constant 0 : index
    %25 = vector.load %arg17[%c10, %c0_22] : memref<32x16xbf16, #tpu.memory_space<vmem>>, vector<16x16xbf16>
    %c64 = arith.constant 64 : index
    %c0_23 = arith.constant 0 : index
    %26 = vector.load %arg2[%c64, %c0_23] : memref<80x128xbf16, #tpu.memory_space<vmem>>, vector<16x128xbf16>
    %cst_24 = arith.constant dense<0.000000e+00> : vector<16x128xf32>
    %27 = tpu.matmul %25, %26, %cst_24 {dimension_numbers = #tpu.dot_dimension_numbers<[1], [0], [0], [1], [0, 0, 1, 1], [], []>} : vector<16x16xbf16>, vector<16x128xbf16>, vector<16x128xf32> -> vector<16x128xf32>
    %28 = arith.addf %24, %27 : vector<16x128xf32>
    %c0_25 = arith.constant 0 : index
    %c0_26 = arith.constant 0 : index
    %29 = vector.load %arg3[%c0_25, %c0_26] : memref<1x128xf32, #tpu.memory_space<vmem>>, vector<1x128xf32>
    %30 = vector.broadcast %29 : vector<1x128xf32> to vector<16x128xf32>
    %31 = arith.addf %28, %30 : vector<16x128xf32>
    %cst_27 = arith.constant 0.000000e+00 : f32
    %32 = vector.broadcast %cst_27 : f32 to vector<16x128xf32>
    %33 = arith.maximumf %31, %32 : vector<16x128xf32>
    %c0_28 = arith.constant 0 : index
    %c0_29 = arith.constant 0 : index
    %34 = vector.load %arg4[%c0_28, %c0_29] : memref<1x128xf32, #tpu.memory_space<vmem>>, vector<1x128xf32>
    %35 = vector.broadcast %34 : vector<1x128xf32> to vector<16x128xf32>
    %36 = arith.mulf %33, %35 : vector<16x128xf32>
    %c0_30 = arith.constant 0 : index
    %c0_31 = arith.constant 0 : index
    %37 = vector.load %arg5[%c0_30, %c0_31] : memref<1x128xf32, #tpu.memory_space<vmem>>, vector<1x128xf32>
    %38 = vector.broadcast %37 : vector<1x128xf32> to vector<16x128xf32>
    %39 = arith.addf %36, %38 : vector<16x128xf32>
    %40 = vector.extract_strided_slice %39 {offsets = [0, 0], sizes = [16, 16], strides = [1, 1]} : vector<16x128xf32> to vector<16x16xf32>
    %41 = vector.extract_strided_slice %39 {offsets = [0, 16], sizes = [16, 112], strides = [1, 1]} : vector<16x128xf32> to vector<16x112xf32>
    %cst_32 = arith.constant 0.000000e+00 : bf16
    %42 = vector.broadcast %cst_32 : bf16 to vector<8x16xbf16>
    %c0_33 = arith.constant 0 : index
    %c0_34 = arith.constant 0 : index
    %43 = vector.load %arg18[%c0_33, %c0_34] : memref<32x16xbf16, #tpu.memory_space<vmem>>, vector<8x16xbf16>
    tpu.vector_store %arg18[%c0_33, %c0_34], %42 {strides = array<i32>} : memref<32x16xbf16, #tpu.memory_space<vmem>>, vector<8x16xbf16>,
    %cst_35 = arith.constant 0.000000e+00 : bf16
    %44 = vector.broadcast %cst_35 : bf16 to vector<8x16xbf16>
    %c24_36 = arith.constant 24 : index
    %c0_37 = arith.constant 0 : index
    %45 = vector.load %arg18[%c24_36, %c0_37] : memref<32x16xbf16, #tpu.memory_space<vmem>>, vector<8x16xbf16>
    tpu.vector_store %arg18[%c24_36, %c0_37], %44 {strides = array<i32>} : memref<32x16xbf16, #tpu.memory_space<vmem>>, vector<8x16xbf16>,
    %cst_38 = arith.constant dense<0.000000e+00> : vector<16xf32>
    %46 = vector.multi_reduction <add>, %40, %cst_38 [0] : vector<16x16xf32> to vector<16xf32>
    %47 = vector.shape_cast %46 : vector<16xf32> to vector<1x16xf32>
    %cst_39 = arith.constant 1.600000e+01 : f32
    %48 = vector.broadcast %cst_39 : f32 to vector<1x16xf32>
    %49 = arith.divf %47, %48 : vector<1x16xf32>
    %50 = vector.extract_strided_slice %41 {offsets = [0, 0], sizes = [16, 16], strides = [1, 1]} : vector<16x112xf32> to vector<16x16xf32>
    %51 = arith.truncf %50 : vector<16x16xf32> to vector<16x16xbf16>
    %c8_40 = arith.constant 8 : index
    %c0_41 = arith.constant 0 : index
    %52 = vector.load %arg18[%c8_40, %c0_41] : memref<32x16xbf16, #tpu.memory_space<vmem>>, vector<16x16xbf16>
    tpu.vector_store %arg18[%c8_40, %c0_41], %51 {strides = array<i32>} : memref<32x16xbf16, #tpu.memory_space<vmem>>, vector<16x16xbf16>,
    %cst_42 = arith.constant 0.000000e+00 : f32
    %53 = vector.broadcast %cst_42 : f32 to vector<16x16xf32>
    %c7_43 = arith.constant 7 : index
    %c0_44 = arith.constant 0 : index
    %54 = vector.load %arg18[%c7_43, %c0_44] : memref<32x16xbf16, #tpu.memory_space<vmem>>, vector<16x16xbf16>
    %c0_45 = arith.constant 0 : index
    %c0_46 = arith.constant 0 : index
    %c0_47 = arith.constant 0 : index
    %c0_48 = arith.constant 0 : index
    %55 = vector.load %arg6[%c0_45, %c0_46, %c0_47, %c0_48] : memref<3x7x48x16xbf16, #tpu.memory_space<vmem>>, vector<1x1x16x16xbf16>
    %56 = vector.shape_cast %55 : vector<1x1x16x16xbf16> to vector<16x16xbf16>
    %cst_49 = arith.constant dense<0.000000e+00> : vector<16x16xf32>
    %57 = tpu.matmul %54, %56, %cst_49 {dimension_numbers = #tpu.dot_dimension_numbers<[1], [0], [0], [1], [0, 0, 1, 1], [], []>} : vector<16x16xbf16>, vector<16x16xbf16>, vector<16x16xf32> -> vector<16x16xf32>
    %58 = arith.addf %53, %57 : vector<16x16xf32>
    %c8_50 = arith.constant 8 : index
    %c0_51 = arith.constant 0 : index
    %59 = vector.load %arg18[%c8_50, %c0_51] : memref<32x16xbf16, #tpu.memory_space<vmem>>, vector<16x16xbf16>
    %c0_52 = arith.constant 0 : index
    %c0_53 = arith.constant 0 : index
    %c16_54 = arith.constant 16 : index
    %c0_55 = arith.constant 0 : index
    %60 = vector.load %arg6[%c0_52, %c0_53, %c16_54, %c0_55] : memref<3x7x48x16xbf16, #tpu.memory_space<vmem>>, vector<1x1x16x16xbf16>
    %61 = vector.shape_cast %60 : vector<1x1x16x16xbf16> to vector<16x16xbf16>
    %cst_56 = arith.constant dense<0.000000e+00> : vector<16x16xf32>
    %62 = tpu.matmul %59, %61, %cst_56 {dimension_numbers = #tpu.dot_dimension_numbers<[1], [0], [0], [1], [0, 0, 1, 1], [], []>} : vector<16x16xbf16>, vector<16x16xbf16>, vector<16x16xf32> -> vector<16x16xf32>
    %63 = arith.addf %58, %62 : vector<16x16xf32>
    %c9_57 = arith.constant 9 : index
    %c0_58 = arith.constant 0 : index
    %64 = vector.load %arg18[%c9_57, %c0_58] : memref<32x16xbf16, #tpu.memory_space<vmem>>, vector<16x16xbf16>
    %c0_59 = arith.constant 0 : index
    %c0_60 = arith.constant 0 : index
    %c32_61 = arith.constant 32 : index
    %c0_62 = arith.constant 0 : index
    %65 = vector.load %arg6[%c0_59, %c0_60, %c32_61, %c0_62] : memref<3x7x48x16xbf16, #tpu.memory_space<vmem>>, vector<1x1x16x16xbf16>
    %66 = vector.shape_cast %65 : vector<1x1x16x16xbf16> to vector<16x16xbf16>
    %cst_63 = arith.constant dense<0.000000e+00> : vector<16x16xf32>
    %67 = tpu.matmul %64, %66, %cst_63 {dimension_numbers = #tpu.dot_dimension_numbers<[1], [0], [0], [1], [0, 0, 1, 1], [], []>} : vector<16x16xbf16>, vector<16x16xbf16>, vector<16x16xf32> -> vector<16x16xf32>
    %68 = arith.addf %63, %67 : vector<16x16xf32>
    %c0_64 = arith.constant 0 : index
    %c0_65 = arith.constant 0 : index
    %c0_66 = arith.constant 0 : index
    %c0_67 = arith.constant 0 : index
    %69 = vector.load %arg7[%c0_64, %c0_65, %c0_66, %c0_67] : memref<3x7x1x16xf32, #tpu.memory_space<vmem>>, vector<1x1x1x16xf32>
    %70 = vector.shape_cast %69 : vector<1x1x1x16xf32> to vector<1x16xf32>
    %71 = vector.broadcast %70 : vector<1x16xf32> to vector<16x16xf32>
    %72 = arith.addf %68, %71 : vector<16x16xf32>
    %cst_68 = arith.constant dense<0.000000e+00> : vector<16xf32>
    %73 = vector.multi_reduction <add>, %72, %cst_68 [0] : vector<16x16xf32> to vector<16xf32>
    %74 = vector.shape_cast %73 : vector<16xf32> to vector<1x16xf32>
    %cst_69 = arith.constant 1.600000e+01 : f32
    %75 = vector.broadcast %cst_69 : f32 to vector<1x16xf32>
    %76 = arith.divf %74, %75 : vector<1x16xf32>
    %c0_70 = arith.constant 0 : index
    %c0_71 = arith.constant 0 : index
    %77 = vector.load %arg19[%c0_70, %c0_71] : memref<16x112xf32, #tpu.memory_space<vmem>>, vector<16x16xf32>
    tpu.vector_store %arg19[%c0_70, %c0_71], %72 {strides = array<i32>} : memref<16x112xf32, #tpu.memory_space<vmem>>, vector<16x16xf32>,
    %78 = vector.extract_strided_slice %41 {offsets = [0, 16], sizes = [16, 16], strides = [1, 1]} : vector<16x112xf32> to vector<16x16xf32>
    %79 = arith.addf %72, %78 : vector<16x16xf32>
    %80 = arith.truncf %79 : vector<16x16xf32> to vector<16x16xbf16>
    %c8_72 = arith.constant 8 : index
    %c0_73 = arith.constant 0 : index
    %81 = vector.load %arg18[%c8_72, %c0_73] : memref<32x16xbf16, #tpu.memory_space<vmem>>, vector<16x16xbf16>
    tpu.vector_store %arg18[%c8_72, %c0_73], %80 {strides = array<i32>} : memref<32x16xbf16, #tpu.memory_space<vmem>>, vector<16x16xbf16>,
    %cst_74 = arith.constant 0.000000e+00 : f32
    %82 = vector.broadcast %cst_74 : f32 to vector<16x16xf32>
    %c7_75 = arith.constant 7 : index
    %c0_76 = arith.constant 0 : index
    %83 = vector.load %arg18[%c7_75, %c0_76] : memref<32x16xbf16, #tpu.memory_space<vmem>>, vector<16x16xbf16>
    %c0_77 = arith.constant 0 : index
    %c1 = arith.constant 1 : index
    %c0_78 = arith.constant 0 : index
    %c0_79 = arith.constant 0 : index
    %84 = vector.load %arg6[%c0_77, %c1, %c0_78, %c0_79] : memref<3x7x48x16xbf16, #tpu.memory_space<vmem>>, vector<1x1x16x16xbf16>
    %85 = vector.shape_cast %84 : vector<1x1x16x16xbf16> to vector<16x16xbf16>
    %cst_80 = arith.constant dense<0.000000e+00> : vector<16x16xf32>
    %86 = tpu.matmul %83, %85, %cst_80 {dimension_numbers = #tpu.dot_dimension_numbers<[1], [0], [0], [1], [0, 0, 1, 1], [], []>} : vector<16x16xbf16>, vector<16x16xbf16>, vector<16x16xf32> -> vector<16x16xf32>
    %87 = arith.addf %82, %86 : vector<16x16xf32>
    %c8_81 = arith.constant 8 : index
    %c0_82 = arith.constant 0 : index
    %88 = vector.load %arg18[%c8_81, %c0_82] : memref<32x16xbf16, #tpu.memory_space<vmem>>, vector<16x16xbf16>
    %c0_83 = arith.constant 0 : index
    %c1_84 = arith.constant 1 : index
    %c16_85 = arith.constant 16 : index
    %c0_86 = arith.constant 0 : index
    %89 = vector.load %arg6[%c0_83, %c1_84, %c16_85, %c0_86] : memref<3x7x48x16xbf16, #tpu.memory_space<vmem>>, vector<1x1x16x16xbf16>
    %90 = vector.shape_cast %89 : vector<1x1x16x16xbf16> to vector<16x16xbf16>
    %cst_87 = arith.constant dense<0.000000e+00> : vector<16x16xf32>
    %91 = tpu.matmul %88, %90, %cst_87 {dimension_numbers = #tpu.dot_dimension_numbers<[1], [0], [0], [1], [0, 0, 1, 1], [], []>} : vector<16x16xbf16>, vector<16x16xbf16>, vector<16x16xf32> -> vector<16x16xf32>
    %92 = arith.addf %87, %91 : vector<16x16xf32>
    %c9_88 = arith.constant 9 : index
    %c0_89 = arith.constant 0 : index
    %93 = vector.load %arg18[%c9_88, %c0_89] : memref<32x16xbf16, #tpu.memory_space<vmem>>, vector<16x16xbf16>
    %c0_90 = arith.constant 0 : index
    %c1_91 = arith.constant 1 : index
    %c32_92 = arith.constant 32 : index
    %c0_93 = arith.constant 0 : index
    %94 = vector.load %arg6[%c0_90, %c1_91, %c32_92, %c0_93] : memref<3x7x48x16xbf16, #tpu.memory_space<vmem>>, vector<1x1x16x16xbf16>
    %95 = vector.shape_cast %94 : vector<1x1x16x16xbf16> to vector<16x16xbf16>
    %cst_94 = arith.constant dense<0.000000e+00> : vector<16x16xf32>
    %96 = tpu.matmul %93, %95, %cst_94 {dimension_numbers = #tpu.dot_dimension_numbers<[1], [0], [0], [1], [0, 0, 1, 1], [], []>} : vector<16x16xbf16>, vector<16x16xbf16>, vector<16x16xf32> -> vector<16x16xf32>
    %97 = arith.addf %92, %96 : vector<16x16xf32>
    %c0_95 = arith.constant 0 : index
    %c1_96 = arith.constant 1 : index
    %c0_97 = arith.constant 0 : index
    %c0_98 = arith.constant 0 : index
    %98 = vector.load %arg7[%c0_95, %c1_96, %c0_97, %c0_98] : memref<3x7x1x16xf32, #tpu.memory_space<vmem>>, vector<1x1x1x16xf32>
    %99 = vector.shape_cast %98 : vector<1x1x1x16xf32> to vector<1x16xf32>
    %100 = vector.broadcast %99 : vector<1x16xf32> to vector<16x16xf32>
    %101 = arith.addf %97, %100 : vector<16x16xf32>
    %cst_99 = arith.constant dense<0.000000e+00> : vector<16xf32>
    %102 = vector.multi_reduction <add>, %101, %cst_99 [0] : vector<16x16xf32> to vector<16xf32>
    %103 = vector.shape_cast %102 : vector<16xf32> to vector<1x16xf32>
    %cst_100 = arith.constant 1.600000e+01 : f32
    %104 = vector.broadcast %cst_100 : f32 to vector<1x16xf32>
    %105 = arith.divf %103, %104 : vector<1x16xf32>
    %c0_101 = arith.constant 0 : index
    %c16_102 = arith.constant 16 : index
    %106 = vector.load %arg19[%c0_101, %c16_102] : memref<16x112xf32, #tpu.memory_space<vmem>>, vector<16x16xf32>
    tpu.vector_store %arg19[%c0_101, %c16_102], %101 {strides = array<i32>} : memref<16x112xf32, #tpu.memory_space<vmem>>, vector<16x16xf32>,
    %107 = vector.extract_strided_slice %41 {offsets = [0, 32], sizes = [16, 16], strides = [1, 1]} : vector<16x112xf32> to vector<16x16xf32>
    %108 = arith.addf %101, %107 : vector<16x16xf32>
    %109 = arith.truncf %108 : vector<16x16xf32> to vector<16x16xbf16>
    %c8_103 = arith.constant 8 : index
    %c0_104 = arith.constant 0 : index
    %110 = vector.load %arg18[%c8_103, %c0_104] : memref<32x16xbf16, #tpu.memory_space<vmem>>, vector<16x16xbf16>
    tpu.vector_store %arg18[%c8_103, %c0_104], %109 {strides = array<i32>} : memref<32x16xbf16, #tpu.memory_space<vmem>>, vector<16x16xbf16>,
    %cst_105 = arith.constant 0.000000e+00 : f32
    %111 = vector.broadcast %cst_105 : f32 to vector<16x16xf32>
    %c7_106 = arith.constant 7 : index
    %c0_107 = arith.constant 0 : index
    %112 = vector.load %arg18[%c7_106, %c0_107] : memref<32x16xbf16, #tpu.memory_space<vmem>>, vector<16x16xbf16>
    %c0_108 = arith.constant 0 : index
    %c2 = arith.constant 2 : index
    %c0_109 = arith.constant 0 : index
    %c0_110 = arith.constant 0 : index
    %113 = vector.load %arg6[%c0_108, %c2, %c0_109, %c0_110] : memref<3x7x48x16xbf16, #tpu.memory_space<vmem>>, vector<1x1x16x16xbf16>
    %114 = vector.shape_cast %113 : vector<1x1x16x16xbf16> to vector<16x16xbf16>
    %cst_111 = arith.constant dense<0.000000e+00> : vector<16x16xf32>
    %115 = tpu.matmul %112, %114, %cst_111 {dimension_numbers = #tpu.dot_dimension_numbers<[1], [0], [0], [1], [0, 0, 1, 1], [], []>} : vector<16x16xbf16>, vector<16x16xbf16>, vector<16x16xf32> -> vector<16x16xf32>
    %116 = arith.addf %111, %115 : vector<16x16xf32>
    %c8_112 = arith.constant 8 : index
    %c0_113 = arith.constant 0 : index
    %117 = vector.load %arg18[%c8_112, %c0_113] : memref<32x16xbf16, #tpu.memory_space<vmem>>, vector<16x16xbf16>
    %c0_114 = arith.constant 0 : index
    %c2_115 = arith.constant 2 : index
    %c16_116 = arith.constant 16 : index
    %c0_117 = arith.constant 0 : index
    %118 = vector.load %arg6[%c0_114, %c2_115, %c16_116, %c0_117] : memref<3x7x48x16xbf16, #tpu.memory_space<vmem>>, vector<1x1x16x16xbf16>
    %119 = vector.shape_cast %118 : vector<1x1x16x16xbf16> to vector<16x16xbf16>
    %cst_118 = arith.constant dense<0.000000e+00> : vector<16x16xf32>
    %120 = tpu.matmul %117, %119, %cst_118 {dimension_numbers = #tpu.dot_dimension_numbers<[1], [0], [0], [1], [0, 0, 1, 1], [], []>} : vector<16x16xbf16>, vector<16x16xbf16>, vector<16x16xf32> -> vector<16x16xf32>
    %121 = arith.addf %116, %120 : vector<16x16xf32>
    %c9_119 = arith.constant 9 : index
    %c0_120 = arith.constant 0 : index
    %122 = vector.load %arg18[%c9_119, %c0_120] : memref<32x16xbf16, #tpu.memory_space<vmem>>, vector<16x16xbf16>
    %c0_121 = arith.constant 0 : index
    %c2_122 = arith.constant 2 : index
    %c32_123 = arith.constant 32 : index
    %c0_124 = arith.constant 0 : index
    %123 = vector.load %arg6[%c0_121, %c2_122, %c32_123, %c0_124] : memref<3x7x48x16xbf16, #tpu.memory_space<vmem>>, vector<1x1x16x16xbf16>
    %124 = vector.shape_cast %123 : vector<1x1x16x16xbf16> to vector<16x16xbf16>
    %cst_125 = arith.constant dense<0.000000e+00> : vector<16x16xf32>
    %125 = tpu.matmul %122, %124, %cst_125 {dimension_numbers = #tpu.dot_dimension_numbers<[1], [0], [0], [1], [0, 0, 1, 1], [], []>} : vector<16x16xbf16>, vector<16x16xbf16>, vector<16x16xf32> -> vector<16x16xf32>
    %126 = arith.addf %121, %125 : vector<16x16xf32>
    %c0_126 = arith.constant 0 : index
    %c2_127 = arith.constant 2 : index
    %c0_128 = arith.constant 0 : index
    %c0_129 = arith.constant 0 : index
    %127 = vector.load %arg7[%c0_126, %c2_127, %c0_128, %c0_129] : memref<3x7x1x16xf32, #tpu.memory_space<vmem>>, vector<1x1x1x16xf32>
    %128 = vector.shape_cast %127 : vector<1x1x1x16xf32> to vector<1x16xf32>
    %129 = vector.broadcast %128 : vector<1x16xf32> to vector<16x16xf32>
    %130 = arith.addf %126, %129 : vector<16x16xf32>
    %cst_130 = arith.constant dense<0.000000e+00> : vector<16xf32>
    %131 = vector.multi_reduction <add>, %130, %cst_130 [0] : vector<16x16xf32> to vector<16xf32>
    %132 = vector.shape_cast %131 : vector<16xf32> to vector<1x16xf32>
    %cst_131 = arith.constant 1.600000e+01 : f32
    %133 = vector.broadcast %cst_131 : f32 to vector<1x16xf32>
    %134 = arith.divf %132, %133 : vector<1x16xf32>
    %c0_132 = arith.constant 0 : index
    %c32_133 = arith.constant 32 : index
    %135 = vector.load %arg19[%c0_132, %c32_133] : memref<16x112xf32, #tpu.memory_space<vmem>>, vector<16x16xf32>
    tpu.vector_store %arg19[%c0_132, %c32_133], %130 {strides = array<i32>} : memref<16x112xf32, #tpu.memory_space<vmem>>, vector<16x16xf32>,
    %136 = vector.extract_strided_slice %41 {offsets = [0, 48], sizes = [16, 16], strides = [1, 1]} : vector<16x112xf32> to vector<16x16xf32>
    %137 = arith.addf %130, %136 : vector<16x16xf32>
    %138 = arith.truncf %137 : vector<16x16xf32> to vector<16x16xbf16>
    %c8_134 = arith.constant 8 : index
    %c0_135 = arith.constant 0 : index
    %139 = vector.load %arg18[%c8_134, %c0_135] : memref<32x16xbf16, #tpu.memory_space<vmem>>, vector<16x16xbf16>
    tpu.vector_store %arg18[%c8_134, %c0_135], %138 {strides = array<i32>} : memref<32x16xbf16, #tpu.memory_space<vmem>>, vector<16x16xbf16>,
    %cst_136 = arith.constant 0.000000e+00 : f32
    %140 = vector.broadcast %cst_136 : f32 to vector<16x16xf32>
    %c7_137 = arith.constant 7 : index
    %c0_138 = arith.constant 0 : index
    %141 = vector.load %arg18[%c7_137, %c0_138] : memref<32x16xbf16, #tpu.memory_space<vmem>>, vector<16x16xbf16>
    %c0_139 = arith.constant 0 : index
    %c3 = arith.constant 3 : index
    %c0_140 = arith.constant 0 : index
    %c0_141 = arith.constant 0 : index
    %142 = vector.load %arg6[%c0_139, %c3, %c0_140, %c0_141] : memref<3x7x48x16xbf16, #tpu.memory_space<vmem>>, vector<1x1x16x16xbf16>
    %143 = vector.shape_cast %142 : vector<1x1x16x16xbf16> to vector<16x16xbf16>
    %cst_142 = arith.constant dense<0.000000e+00> : vector<16x16xf32>
    %144 = tpu.matmul %141, %143, %cst_142 {dimension_numbers = #tpu.dot_dimension_numbers<[1], [0], [0], [1], [0, 0, 1, 1], [], []>} : vector<16x16xbf16>, vector<16x16xbf16>, vector<16x16xf32> -> vector<16x16xf32>
    %145 = arith.addf %140, %144 : vector<16x16xf32>
    %c8_143 = arith.constant 8 : index
    %c0_144 = arith.constant 0 : index
    %146 = vector.load %arg18[%c8_143, %c0_144] : memref<32x16xbf16, #tpu.memory_space<vmem>>, vector<16x16xbf16>
    %c0_145 = arith.constant 0 : index
    %c3_146 = arith.constant 3 : index
    %c16_147 = arith.constant 16 : index
    %c0_148 = arith.constant 0 : index
    %147 = vector.load %arg6[%c0_145, %c3_146, %c16_147, %c0_148] : memref<3x7x48x16xbf16, #tpu.memory_space<vmem>>, vector<1x1x16x16xbf16>
    %148 = vector.shape_cast %147 : vector<1x1x16x16xbf16> to vector<16x16xbf16>
    %cst_149 = arith.constant dense<0.000000e+00> : vector<16x16xf32>
    %149 = tpu.matmul %146, %148, %cst_149 {dimension_numbers = #tpu.dot_dimension_numbers<[1], [0], [0], [1], [0, 0, 1, 1], [], []>} : vector<16x16xbf16>, vector<16x16xbf16>, vector<16x16xf32> -> vector<16x16xf32>
    %150 = arith.addf %145, %149 : vector<16x16xf32>
    %c9_150 = arith.constant 9 : index
    %c0_151 = arith.constant 0 : index
    %151 = vector.load %arg18[%c9_150, %c0_151] : memref<32x16xbf16, #tpu.memory_space<vmem>>, vector<16x16xbf16>
    %c0_152 = arith.constant 0 : index
    %c3_153 = arith.constant 3 : index
    %c32_154 = arith.constant 32 : index
    %c0_155 = arith.constant 0 : index
    %152 = vector.load %arg6[%c0_152, %c3_153, %c32_154, %c0_155] : memref<3x7x48x16xbf16, #tpu.memory_space<vmem>>, vector<1x1x16x16xbf16>
    %153 = vector.shape_cast %152 : vector<1x1x16x16xbf16> to vector<16x16xbf16>
    %cst_156 = arith.constant dense<0.000000e+00> : vector<16x16xf32>
    %154 = tpu.matmul %151, %153, %cst_156 {dimension_numbers = #tpu.dot_dimension_numbers<[1], [0], [0], [1], [0, 0, 1, 1], [], []>} : vector<16x16xbf16>, vector<16x16xbf16>, vector<16x16xf32> -> vector<16x16xf32>
    %155 = arith.addf %150, %154 : vector<16x16xf32>
    %c0_157 = arith.constant 0 : index
    %c3_158 = arith.constant 3 : index
    %c0_159 = arith.constant 0 : index
    %c0_160 = arith.constant 0 : index
    %156 = vector.load %arg7[%c0_157, %c3_158, %c0_159, %c0_160] : memref<3x7x1x16xf32, #tpu.memory_space<vmem>>, vector<1x1x1x16xf32>
    %157 = vector.shape_cast %156 : vector<1x1x1x16xf32> to vector<1x16xf32>
    %158 = vector.broadcast %157 : vector<1x16xf32> to vector<16x16xf32>
    %159 = arith.addf %155, %158 : vector<16x16xf32>
    %cst_161 = arith.constant dense<0.000000e+00> : vector<16xf32>
    %160 = vector.multi_reduction <add>, %159, %cst_161 [0] : vector<16x16xf32> to vector<16xf32>
    %161 = vector.shape_cast %160 : vector<16xf32> to vector<1x16xf32>
    %cst_162 = arith.constant 1.600000e+01 : f32
    %162 = vector.broadcast %cst_162 : f32 to vector<1x16xf32>
    %163 = arith.divf %161, %162 : vector<1x16xf32>
    %c0_163 = arith.constant 0 : index
    %c48_164 = arith.constant 48 : index
    %164 = vector.load %arg19[%c0_163, %c48_164] : memref<16x112xf32, #tpu.memory_space<vmem>>, vector<16x16xf32>
    tpu.vector_store %arg19[%c0_163, %c48_164], %159 {strides = array<i32>} : memref<16x112xf32, #tpu.memory_space<vmem>>, vector<16x16xf32>,
    %165 = vector.extract_strided_slice %41 {offsets = [0, 64], sizes = [16, 16], strides = [1, 1]} : vector<16x112xf32> to vector<16x16xf32>
    %166 = arith.addf %159, %165 : vector<16x16xf32>
    %167 = arith.truncf %166 : vector<16x16xf32> to vector<16x16xbf16>
    %c8_165 = arith.constant 8 : index
    %c0_166 = arith.constant 0 : index
    %168 = vector.load %arg18[%c8_165, %c0_166] : memref<32x16xbf16, #tpu.memory_space<vmem>>, vector<16x16xbf16>
    tpu.vector_store %arg18[%c8_165, %c0_166], %167 {strides = array<i32>} : memref<32x16xbf16, #tpu.memory_space<vmem>>, vector<16x16xbf16>,
    %cst_167 = arith.constant 0.000000e+00 : f32
    %169 = vector.broadcast %cst_167 : f32 to vector<16x16xf32>
    %c7_168 = arith.constant 7 : index
    %c0_169 = arith.constant 0 : index
    %170 = vector.load %arg18[%c7_168, %c0_169] : memref<32x16xbf16, #tpu.memory_space<vmem>>, vector<16x16xbf16>
    %c0_170 = arith.constant 0 : index
    %c4 = arith.constant 4 : index
    %c0_171 = arith.constant 0 : index
    %c0_172 = arith.constant 0 : index
    %171 = vector.load %arg6[%c0_170, %c4, %c0_171, %c0_172] : memref<3x7x48x16xbf16, #tpu.memory_space<vmem>>, vector<1x1x16x16xbf16>
    %172 = vector.shape_cast %171 : vector<1x1x16x16xbf16> to vector<16x16xbf16>
    %cst_173 = arith.constant dense<0.000000e+00> : vector<16x16xf32>
    %173 = tpu.matmul %170, %172, %cst_173 {dimension_numbers = #tpu.dot_dimension_numbers<[1], [0], [0], [1], [0, 0, 1, 1], [], []>} : vector<16x16xbf16>, vector<16x16xbf16>, vector<16x16xf32> -> vector<16x16xf32>
    %174 = arith.addf %169, %173 : vector<16x16xf32>
    %c8_174 = arith.constant 8 : index
    %c0_175 = arith.constant 0 : index
    %175 = vector.load %arg18[%c8_174, %c0_175] : memref<32x16xbf16, #tpu.memory_space<vmem>>, vector<16x16xbf16>
    %c0_176 = arith.constant 0 : index
    %c4_177 = arith.constant 4 : index
    %c16_178 = arith.constant 16 : index
    %c0_179 = arith.constant 0 : index
    %176 = vector.load %arg6[%c0_176, %c4_177, %c16_178, %c0_179] : memref<3x7x48x16xbf16, #tpu.memory_space<vmem>>, vector<1x1x16x16xbf16>
    %177 = vector.shape_cast %176 : vector<1x1x16x16xbf16> to vector<16x16xbf16>
    %cst_180 = arith.constant dense<0.000000e+00> : vector<16x16xf32>
    %178 = tpu.matmul %175, %177, %cst_180 {dimension_numbers = #tpu.dot_dimension_numbers<[1], [0], [0], [1], [0, 0, 1, 1], [], []>} : vector<16x16xbf16>, vector<16x16xbf16>, vector<16x16xf32> -> vector<16x16xf32>
    %179 = arith.addf %174, %178 : vector<16x16xf32>
    %c9_181 = arith.constant 9 : index
    %c0_182 = arith.constant 0 : index
    %180 = vector.load %arg18[%c9_181, %c0_182] : memref<32x16xbf16, #tpu.memory_space<vmem>>, vector<16x16xbf16>
    %c0_183 = arith.constant 0 : index
    %c4_184 = arith.constant 4 : index
    %c32_185 = arith.constant 32 : index
    %c0_186 = arith.constant 0 : index
    %181 = vector.load %arg6[%c0_183, %c4_184, %c32_185, %c0_186] : memref<3x7x48x16xbf16, #tpu.memory_space<vmem>>, vector<1x1x16x16xbf16>
    %182 = vector.shape_cast %181 : vector<1x1x16x16xbf16> to vector<16x16xbf16>
    %cst_187 = arith.constant dense<0.000000e+00> : vector<16x16xf32>
    %183 = tpu.matmul %180, %182, %cst_187 {dimension_numbers = #tpu.dot_dimension_numbers<[1], [0], [0], [1], [0, 0, 1, 1], [], []>} : vector<16x16xbf16>, vector<16x16xbf16>, vector<16x16xf32> -> vector<16x16xf32>
    %184 = arith.addf %179, %183 : vector<16x16xf32>
    %c0_188 = arith.constant 0 : index
    %c4_189 = arith.constant 4 : index
    %c0_190 = arith.constant 0 : index
    %c0_191 = arith.constant 0 : index
    %185 = vector.load %arg7[%c0_188, %c4_189, %c0_190, %c0_191] : memref<3x7x1x16xf32, #tpu.memory_space<vmem>>, vector<1x1x1x16xf32>
    %186 = vector.shape_cast %185 : vector<1x1x1x16xf32> to vector<1x16xf32>
    %187 = vector.broadcast %186 : vector<1x16xf32> to vector<16x16xf32>
    %188 = arith.addf %184, %187 : vector<16x16xf32>
    %cst_192 = arith.constant dense<0.000000e+00> : vector<16xf32>
    %189 = vector.multi_reduction <add>, %188, %cst_192 [0] : vector<16x16xf32> to vector<16xf32>
    %190 = vector.shape_cast %189 : vector<16xf32> to vector<1x16xf32>
    %cst_193 = arith.constant 1.600000e+01 : f32
    %191 = vector.broadcast %cst_193 : f32 to vector<1x16xf32>
    %192 = arith.divf %190, %191 : vector<1x16xf32>
    %c0_194 = arith.constant 0 : index
    %c64_195 = arith.constant 64 : index
    %193 = vector.load %arg19[%c0_194, %c64_195] : memref<16x112xf32, #tpu.memory_space<vmem>>, vector<16x16xf32>
    tpu.vector_store %arg19[%c0_194, %c64_195], %188 {strides = array<i32>} : memref<16x112xf32, #tpu.memory_space<vmem>>, vector<16x16xf32>,
    %194 = vector.extract_strided_slice %41 {offsets = [0, 80], sizes = [16, 16], strides = [1, 1]} : vector<16x112xf32> to vector<16x16xf32>
    %195 = arith.addf %188, %194 : vector<16x16xf32>
    %196 = arith.truncf %195 : vector<16x16xf32> to vector<16x16xbf16>
    %c8_196 = arith.constant 8 : index
    %c0_197 = arith.constant 0 : index
    %197 = vector.load %arg18[%c8_196, %c0_197] : memref<32x16xbf16, #tpu.memory_space<vmem>>, vector<16x16xbf16>
    tpu.vector_store %arg18[%c8_196, %c0_197], %196 {strides = array<i32>} : memref<32x16xbf16, #tpu.memory_space<vmem>>, vector<16x16xbf16>,
    %cst_198 = arith.constant 0.000000e+00 : f32
    %198 = vector.broadcast %cst_198 : f32 to vector<16x16xf32>
    %c7_199 = arith.constant 7 : index
    %c0_200 = arith.constant 0 : index
    %199 = vector.load %arg18[%c7_199, %c0_200] : memref<32x16xbf16, #tpu.memory_space<vmem>>, vector<16x16xbf16>
    %c0_201 = arith.constant 0 : index
    %c5 = arith.constant 5 : index
    %c0_202 = arith.constant 0 : index
    %c0_203 = arith.constant 0 : index
    %200 = vector.load %arg6[%c0_201, %c5, %c0_202, %c0_203] : memref<3x7x48x16xbf16, #tpu.memory_space<vmem>>, vector<1x1x16x16xbf16>
    %201 = vector.shape_cast %200 : vector<1x1x16x16xbf16> to vector<16x16xbf16>
    %cst_204 = arith.constant dense<0.000000e+00> : vector<16x16xf32>
    %202 = tpu.matmul %199, %201, %cst_204 {dimension_numbers = #tpu.dot_dimension_numbers<[1], [0], [0], [1], [0, 0, 1, 1], [], []>} : vector<16x16xbf16>, vector<16x16xbf16>, vector<16x16xf32> -> vector<16x16xf32>
    %203 = arith.addf %198, %202 : vector<16x16xf32>
    %c8_205 = arith.constant 8 : index
    %c0_206 = arith.constant 0 : index
    %204 = vector.load %arg18[%c8_205, %c0_206] : memref<32x16xbf16, #tpu.memory_space<vmem>>, vector<16x16xbf16>
    %c0_207 = arith.constant 0 : index
    %c5_208 = arith.constant 5 : index
    %c16_209 = arith.constant 16 : index
    %c0_210 = arith.constant 0 : index
    %205 = vector.load %arg6[%c0_207, %c5_208, %c16_209, %c0_210] : memref<3x7x48x16xbf16, #tpu.memory_space<vmem>>, vector<1x1x16x16xbf16>
    %206 = vector.shape_cast %205 : vector<1x1x16x16xbf16> to vector<16x16xbf16>
    %cst_211 = arith.constant dense<0.000000e+00> : vector<16x16xf32>
    %207 = tpu.matmul %204, %206, %cst_211 {dimension_numbers = #tpu.dot_dimension_numbers<[1], [0], [0], [1], [0, 0, 1, 1], [], []>} : vector<16x16xbf16>, vector<16x16xbf16>, vector<16x16xf32> -> vector<16x16xf32>
    %208 = arith.addf %203, %207 : vector<16x16xf32>
    %c9_212 = arith.constant 9 : index
    %c0_213 = arith.constant 0 : index
    %209 = vector.load %arg18[%c9_212, %c0_213] : memref<32x16xbf16, #tpu.memory_space<vmem>>, vector<16x16xbf16>
    %c0_214 = arith.constant 0 : index
    %c5_215 = arith.constant 5 : index
    %c32_216 = arith.constant 32 : index
    %c0_217 = arith.constant 0 : index
    %210 = vector.load %arg6[%c0_214, %c5_215, %c32_216, %c0_217] : memref<3x7x48x16xbf16, #tpu.memory_space<vmem>>, vector<1x1x16x16xbf16>
    %211 = vector.shape_cast %210 : vector<1x1x16x16xbf16> to vector<16x16xbf16>
    %cst_218 = arith.constant dense<0.000000e+00> : vector<16x16xf32>
    %212 = tpu.matmul %209, %211, %cst_218 {dimension_numbers = #tpu.dot_dimension_numbers<[1], [0], [0], [1], [0, 0, 1, 1], [], []>} : vector<16x16xbf16>, vector<16x16xbf16>, vector<16x16xf32> -> vector<16x16xf32>
    %213 = arith.addf %208, %212 : vector<16x16xf32>
    %c0_219 = arith.constant 0 : index
    %c5_220 = arith.constant 5 : index
    %c0_221 = arith.constant 0 : index
    %c0_222 = arith.constant 0 : index
    %214 = vector.load %arg7[%c0_219, %c5_220, %c0_221, %c0_222] : memref<3x7x1x16xf32, #tpu.memory_space<vmem>>, vector<1x1x1x16xf32>
    %215 = vector.shape_cast %214 : vector<1x1x1x16xf32> to vector<1x16xf32>
    %216 = vector.broadcast %215 : vector<1x16xf32> to vector<16x16xf32>
    %217 = arith.addf %213, %216 : vector<16x16xf32>
    %cst_223 = arith.constant dense<0.000000e+00> : vector<16xf32>
    %218 = vector.multi_reduction <add>, %217, %cst_223 [0] : vector<16x16xf32> to vector<16xf32>
    %219 = vector.shape_cast %218 : vector<16xf32> to vector<1x16xf32>
    %cst_224 = arith.constant 1.600000e+01 : f32
    %220 = vector.broadcast %cst_224 : f32 to vector<1x16xf32>
    %221 = arith.divf %219, %220 : vector<1x16xf32>
    %c0_225 = arith.constant 0 : index
    %c80 = arith.constant 80 : index
    %222 = vector.load %arg19[%c0_225, %c80] : memref<16x112xf32, #tpu.memory_space<vmem>>, vector<16x16xf32>
    tpu.vector_store %arg19[%c0_225, %c80], %217 {strides = array<i32>} : memref<16x112xf32, #tpu.memory_space<vmem>>, vector<16x16xf32>,
    %223 = vector.extract_strided_slice %41 {offsets = [0, 96], sizes = [16, 16], strides = [1, 1]} : vector<16x112xf32> to vector<16x16xf32>
    %224 = arith.addf %217, %223 : vector<16x16xf32>
    %225 = arith.truncf %224 : vector<16x16xf32> to vector<16x16xbf16>
    %c8_226 = arith.constant 8 : index
    %c0_227 = arith.constant 0 : index
    %226 = vector.load %arg18[%c8_226, %c0_227] : memref<32x16xbf16, #tpu.memory_space<vmem>>, vector<16x16xbf16>
    tpu.vector_store %arg18[%c8_226, %c0_227], %225 {strides = array<i32>} : memref<32x16xbf16, #tpu.memory_space<vmem>>, vector<16x16xbf16>,
    %cst_228 = arith.constant 0.000000e+00 : f32
    %227 = vector.broadcast %cst_228 : f32 to vector<16x16xf32>
    %c7_229 = arith.constant 7 : index
    %c0_230 = arith.constant 0 : index
    %228 = vector.load %arg18[%c7_229, %c0_230] : memref<32x16xbf16, #tpu.memory_space<vmem>>, vector<16x16xbf16>
    %c0_231 = arith.constant 0 : index
    %c6_232 = arith.constant 6 : index
    %c0_233 = arith.constant 0 : index
    %c0_234 = arith.constant 0 : index
    %229 = vector.load %arg6[%c0_231, %c6_232, %c0_233, %c0_234] : memref<3x7x48x16xbf16, #tpu.memory_space<vmem>>, vector<1x1x16x16xbf16>
    %230 = vector.shape_cast %229 : vector<1x1x16x16xbf16> to vector<16x16xbf16>
    %cst_235 = arith.constant dense<0.000000e+00> : vector<16x16xf32>
    %231 = tpu.matmul %228, %230, %cst_235 {dimension_numbers = #tpu.dot_dimension_numbers<[1], [0], [0], [1], [0, 0, 1, 1], [], []>} : vector<16x16xbf16>, vector<16x16xbf16>, vector<16x16xf32> -> vector<16x16xf32>
    %232 = arith.addf %227, %231 : vector<16x16xf32>
    %c8_236 = arith.constant 8 : index
    %c0_237 = arith.constant 0 : index
    %233 = vector.load %arg18[%c8_236, %c0_237] : memref<32x16xbf16, #tpu.memory_space<vmem>>, vector<16x16xbf16>
    %c0_238 = arith.constant 0 : index
    %c6_239 = arith.constant 6 : index
    %c16_240 = arith.constant 16 : index
    %c0_241 = arith.constant 0 : index
    %234 = vector.load %arg6[%c0_238, %c6_239, %c16_240, %c0_241] : memref<3x7x48x16xbf16, #tpu.memory_space<vmem>>, vector<1x1x16x16xbf16>
    %235 = vector.shape_cast %234 : vector<1x1x16x16xbf16> to vector<16x16xbf16>
    %cst_242 = arith.constant dense<0.000000e+00> : vector<16x16xf32>
    %236 = tpu.matmul %233, %235, %cst_242 {dimension_numbers = #tpu.dot_dimension_numbers<[1], [0], [0], [1], [0, 0, 1, 1], [], []>} : vector<16x16xbf16>, vector<16x16xbf16>, vector<16x16xf32> -> vector<16x16xf32>
    %237 = arith.addf %232, %236 : vector<16x16xf32>
    %c9_243 = arith.constant 9 : index
    %c0_244 = arith.constant 0 : index
    %238 = vector.load %arg18[%c9_243, %c0_244] : memref<32x16xbf16, #tpu.memory_space<vmem>>, vector<16x16xbf16>
    %c0_245 = arith.constant 0 : index
    %c6_246 = arith.constant 6 : index
    %c32_247 = arith.constant 32 : index
    %c0_248 = arith.constant 0 : index
    %239 = vector.load %arg6[%c0_245, %c6_246, %c32_247, %c0_248] : memref<3x7x48x16xbf16, #tpu.memory_space<vmem>>, vector<1x1x16x16xbf16>
    %240 = vector.shape_cast %239 : vector<1x1x16x16xbf16> to vector<16x16xbf16>
    %cst_249 = arith.constant dense<0.000000e+00> : vector<16x16xf32>
    %241 = tpu.matmul %238, %240, %cst_249 {dimension_numbers = #tpu.dot_dimension_numbers<[1], [0], [0], [1], [0, 0, 1, 1], [], []>} : vector<16x16xbf16>, vector<16x16xbf16>, vector<16x16xf32> -> vector<16x16xf32>
    %242 = arith.addf %237, %241 : vector<16x16xf32>
    %c0_250 = arith.constant 0 : index
    %c6_251 = arith.constant 6 : index
    %c0_252 = arith.constant 0 : index
    %c0_253 = arith.constant 0 : index
    %243 = vector.load %arg7[%c0_250, %c6_251, %c0_252, %c0_253] : memref<3x7x1x16xf32, #tpu.memory_space<vmem>>, vector<1x1x1x16xf32>
    %244 = vector.shape_cast %243 : vector<1x1x1x16xf32> to vector<1x16xf32>
    %245 = vector.broadcast %244 : vector<1x16xf32> to vector<16x16xf32>
    %246 = arith.addf %242, %245 : vector<16x16xf32>
    %cst_254 = arith.constant dense<0.000000e+00> : vector<16xf32>
    %247 = vector.multi_reduction <add>, %246, %cst_254 [0] : vector<16x16xf32> to vector<16xf32>
    %248 = vector.shape_cast %247 : vector<16xf32> to vector<1x16xf32>
    %cst_255 = arith.constant 1.600000e+01 : f32
    %249 = vector.broadcast %cst_255 : f32 to vector<1x16xf32>
    %250 = arith.divf %248, %249 : vector<1x16xf32>
    %c0_256 = arith.constant 0 : index
    %c96 = arith.constant 96 : index
    %251 = vector.load %arg19[%c0_256, %c96] : memref<16x112xf32, #tpu.memory_space<vmem>>, vector<16x16xf32>
    tpu.vector_store %arg19[%c0_256, %c96], %246 {strides = array<i32>} : memref<16x112xf32, #tpu.memory_space<vmem>>, vector<16x16xf32>,
    %252 = tpu.concatenate %49, %76, %105, %134, %163, %192, %221, %250 in 1 : vector<1x16xf32>, vector<1x16xf32>, vector<1x16xf32>, vector<1x16xf32>, vector<1x16xf32>, vector<1x16xf32>, vector<1x16xf32>, vector<1x16xf32> -> vector<1x128xf32>
    %253 = arith.truncf %252 : vector<1x128xf32> to vector<1x128xbf16>
    %c0_257 = arith.constant 0 : index
    %c0_258 = arith.constant 0 : index
    %c0_259 = arith.constant 0 : index
    %254 = vector.load %arg8[%c0_257, %c0_258, %c0_259] : memref<3x128x32xbf16, #tpu.memory_space<vmem>>, vector<1x128x32xbf16>
    %255 = vector.shape_cast %254 : vector<1x128x32xbf16> to vector<128x32xbf16>
    %cst_260 = arith.constant dense<0.000000e+00> : vector<1x32xf32>
    %256 = tpu.matmul %253, %255, %cst_260 {dimension_numbers = #tpu.dot_dimension_numbers<[1], [0], [0], [1], [0, 0, 1, 1], [], []>} : vector<1x128xbf16>, vector<128x32xbf16>, vector<1x32xf32> -> vector<1x32xf32>
    %c0_261 = arith.constant 0 : index
    %c0_262 = arith.constant 0 : index
    %c0_263 = arith.constant 0 : index
    %257 = vector.load %arg9[%c0_261, %c0_262, %c0_263] : memref<3x1x32xf32, #tpu.memory_space<vmem>>, vector<1x1x32xf32>
    %258 = vector.shape_cast %257 : vector<1x1x32xf32> to vector<1x32xf32>
    %259 = arith.addf %256, %258 : vector<1x32xf32>
    %cst_264 = arith.constant 0.000000e+00 : f32
    %260 = vector.broadcast %cst_264 : f32 to vector<1x32xf32>
    %261 = arith.maximumf %259, %260 : vector<1x32xf32>
    %262 = arith.truncf %261 : vector<1x32xf32> to vector<1x32xbf16>
    %c0_265 = arith.constant 0 : index
    %c0_266 = arith.constant 0 : index
    %c0_267 = arith.constant 0 : index
    %263 = vector.load %arg10[%c0_265, %c0_266, %c0_267] : memref<3x32x128xbf16, #tpu.memory_space<vmem>>, vector<1x32x128xbf16>
    %264 = vector.shape_cast %263 : vector<1x32x128xbf16> to vector<32x128xbf16>
    %cst_268 = arith.constant dense<0.000000e+00> : vector<1x128xf32>
    %265 = tpu.matmul %262, %264, %cst_268 {dimension_numbers = #tpu.dot_dimension_numbers<[1], [0], [0], [1], [0, 0, 1, 1], [], []>} : vector<1x32xbf16>, vector<32x128xbf16>, vector<1x128xf32> -> vector<1x128xf32>
    %c0_269 = arith.constant 0 : index
    %c0_270 = arith.constant 0 : index
    %c0_271 = arith.constant 0 : index
    %266 = vector.load %arg11[%c0_269, %c0_270, %c0_271] : memref<3x1x128xf32, #tpu.memory_space<vmem>>, vector<1x1x128xf32>
    %267 = vector.shape_cast %266 : vector<1x1x128xf32> to vector<1x128xf32>
    %268 = arith.addf %265, %267 : vector<1x128xf32>
    %269 = arith.negf %268 : vector<1x128xf32>
    %270 = math.exp %269 : vector<1x128xf32>
    %cst_272 = arith.constant 1.000000e+00 : f32
    %271 = vector.broadcast %cst_272 : f32 to vector<1x128xf32>
    %272 = arith.addf %271, %270 : vector<1x128xf32>
    %273 = arith.divf %271, %272 : vector<1x128xf32>
    %c0_273 = arith.constant 0 : index
    %c0_274 = arith.constant 0 : index
    %c0_275 = arith.constant 0 : index
    %274 = vector.load %arg12[%c0_273, %c0_274, %c0_275] : memref<3x1x128xf32, #tpu.memory_space<vmem>>, vector<1x1x128xf32>
    %275 = vector.shape_cast %274 : vector<1x1x128xf32> to vector<1x128xf32>
    %276 = arith.mulf %273, %275 : vector<1x128xf32>
    %c0_276 = arith.constant 0 : index
    %c0_277 = arith.constant 0 : index
    %c0_278 = arith.constant 0 : index
    %277 = vector.load %arg13[%c0_276, %c0_277, %c0_278] : memref<3x1x128xf32, #tpu.memory_space<vmem>>, vector<1x1x128xf32>
    %278 = vector.shape_cast %277 : vector<1x1x128xf32> to vector<1x128xf32>
    %279 = arith.mulf %252, %276 : vector<1x128xf32>
    %280 = arith.addf %279, %278 : vector<1x128xf32>
    %281 = vector.extract_strided_slice %276 {offsets = [0, 0], sizes = [1, 16], strides = [1, 1]} : vector<1x128xf32> to vector<1x16xf32>
    %282 = vector.broadcast %281 : vector<1x16xf32> to vector<16x16xf32>
    %283 = arith.mulf %40, %282 : vector<16x16xf32>
    %284 = vector.extract_strided_slice %278 {offsets = [0, 0], sizes = [1, 16], strides = [1, 1]} : vector<1x128xf32> to vector<1x16xf32>
    %285 = vector.broadcast %284 : vector<1x16xf32> to vector<16x16xf32>
    %286 = arith.addf %283, %285 : vector<16x16xf32>
    %c0_279 = arith.constant 0 : index
    %c0_280 = arith.constant 0 : index
    %287 = vector.load %arg19[%c0_279, %c0_280] : memref<16x112xf32, #tpu.memory_space<vmem>>, vector<16x112xf32>
    %288 = vector.extract_strided_slice %276 {offsets = [0, 16], sizes = [1, 112], strides = [1, 1]} : vector<1x128xf32> to vector<1x112xf32>
    %289 = vector.broadcast %288 : vector<1x112xf32> to vector<16x112xf32>
    %290 = arith.mulf %287, %289 : vector<16x112xf32>
    %291 = vector.extract_strided_slice %278 {offsets = [0, 16], sizes = [1, 112], strides = [1, 1]} : vector<1x128xf32> to vector<1x112xf32>
    %292 = vector.broadcast %291 : vector<1x112xf32> to vector<16x112xf32>
    %293 = arith.addf %290, %292 : vector<16x112xf32>
    %cst_281 = arith.constant dense<0.000000e+00> : vector<16xf32>
    %294 = vector.multi_reduction <add>, %286, %cst_281 [0] : vector<16x16xf32> to vector<16xf32>
    %295 = vector.shape_cast %294 : vector<16xf32> to vector<1x16xf32>
    %cst_282 = arith.constant 1.600000e+01 : f32
    %296 = vector.broadcast %cst_282 : f32 to vector<1x16xf32>
    %297 = arith.divf %295, %296 : vector<1x16xf32>
    %298 = vector.extract_strided_slice %293 {offsets = [0, 0], sizes = [16, 16], strides = [1, 1]} : vector<16x112xf32> to vector<16x16xf32>
    %299 = arith.truncf %298 : vector<16x16xf32> to vector<16x16xbf16>
    %c8_283 = arith.constant 8 : index
    %c0_284 = arith.constant 0 : index
    %300 = vector.load %arg18[%c8_283, %c0_284] : memref<32x16xbf16, #tpu.memory_space<vmem>>, vector<16x16xbf16>
    tpu.vector_store %arg18[%c8_283, %c0_284], %299 {strides = array<i32>} : memref<32x16xbf16, #tpu.memory_space<vmem>>, vector<16x16xbf16>,
    %cst_285 = arith.constant 0.000000e+00 : f32
    %301 = vector.broadcast %cst_285 : f32 to vector<16x16xf32>
    %c7_286 = arith.constant 7 : index
    %c0_287 = arith.constant 0 : index
    %302 = vector.load %arg18[%c7_286, %c0_287] : memref<32x16xbf16, #tpu.memory_space<vmem>>, vector<16x16xbf16>
    %c1_288 = arith.constant 1 : index
    %c0_289 = arith.constant 0 : index
    %c0_290 = arith.constant 0 : index
    %c0_291 = arith.constant 0 : index
    %303 = vector.load %arg6[%c1_288, %c0_289, %c0_290, %c0_291] : memref<3x7x48x16xbf16, #tpu.memory_space<vmem>>, vector<1x1x16x16xbf16>
    %304 = vector.shape_cast %303 : vector<1x1x16x16xbf16> to vector<16x16xbf16>
    %cst_292 = arith.constant dense<0.000000e+00> : vector<16x16xf32>
    %305 = tpu.matmul %302, %304, %cst_292 {dimension_numbers = #tpu.dot_dimension_numbers<[1], [0], [0], [1], [0, 0, 1, 1], [], []>} : vector<16x16xbf16>, vector<16x16xbf16>, vector<16x16xf32> -> vector<16x16xf32>
    %306 = arith.addf %301, %305 : vector<16x16xf32>
    %c8_293 = arith.constant 8 : index
    %c0_294 = arith.constant 0 : index
    %307 = vector.load %arg18[%c8_293, %c0_294] : memref<32x16xbf16, #tpu.memory_space<vmem>>, vector<16x16xbf16>
    %c1_295 = arith.constant 1 : index
    %c0_296 = arith.constant 0 : index
    %c16_297 = arith.constant 16 : index
    %c0_298 = arith.constant 0 : index
    %308 = vector.load %arg6[%c1_295, %c0_296, %c16_297, %c0_298] : memref<3x7x48x16xbf16, #tpu.memory_space<vmem>>, vector<1x1x16x16xbf16>
    %309 = vector.shape_cast %308 : vector<1x1x16x16xbf16> to vector<16x16xbf16>
    %cst_299 = arith.constant dense<0.000000e+00> : vector<16x16xf32>
    %310 = tpu.matmul %307, %309, %cst_299 {dimension_numbers = #tpu.dot_dimension_numbers<[1], [0], [0], [1], [0, 0, 1, 1], [], []>} : vector<16x16xbf16>, vector<16x16xbf16>, vector<16x16xf32> -> vector<16x16xf32>
    %311 = arith.addf %306, %310 : vector<16x16xf32>
    %c9_300 = arith.constant 9 : index
    %c0_301 = arith.constant 0 : index
    %312 = vector.load %arg18[%c9_300, %c0_301] : memref<32x16xbf16, #tpu.memory_space<vmem>>, vector<16x16xbf16>
    %c1_302 = arith.constant 1 : index
    %c0_303 = arith.constant 0 : index
    %c32_304 = arith.constant 32 : index
    %c0_305 = arith.constant 0 : index
    %313 = vector.load %arg6[%c1_302, %c0_303, %c32_304, %c0_305] : memref<3x7x48x16xbf16, #tpu.memory_space<vmem>>, vector<1x1x16x16xbf16>
    %314 = vector.shape_cast %313 : vector<1x1x16x16xbf16> to vector<16x16xbf16>
    %cst_306 = arith.constant dense<0.000000e+00> : vector<16x16xf32>
    %315 = tpu.matmul %312, %314, %cst_306 {dimension_numbers = #tpu.dot_dimension_numbers<[1], [0], [0], [1], [0, 0, 1, 1], [], []>} : vector<16x16xbf16>, vector<16x16xbf16>, vector<16x16xf32> -> vector<16x16xf32>
    %316 = arith.addf %311, %315 : vector<16x16xf32>
    %c1_307 = arith.constant 1 : index
    %c0_308 = arith.constant 0 : index
    %c0_309 = arith.constant 0 : index
    %c0_310 = arith.constant 0 : index
    %317 = vector.load %arg7[%c1_307, %c0_308, %c0_309, %c0_310] : memref<3x7x1x16xf32, #tpu.memory_space<vmem>>, vector<1x1x1x16xf32>
    %318 = vector.shape_cast %317 : vector<1x1x1x16xf32> to vector<1x16xf32>
    %319 = vector.broadcast %318 : vector<1x16xf32> to vector<16x16xf32>
    %320 = arith.addf %316, %319 : vector<16x16xf32>
    %cst_311 = arith.constant dense<0.000000e+00> : vector<16xf32>
    %321 = vector.multi_reduction <add>, %320, %cst_311 [0] : vector<16x16xf32> to vector<16xf32>
    %322 = vector.shape_cast %321 : vector<16xf32> to vector<1x16xf32>
    %cst_312 = arith.constant 1.600000e+01 : f32
    %323 = vector.broadcast %cst_312 : f32 to vector<1x16xf32>
    %324 = arith.divf %322, %323 : vector<1x16xf32>
    %c0_313 = arith.constant 0 : index
    %c0_314 = arith.constant 0 : index
    %325 = vector.load %arg19[%c0_313, %c0_314] : memref<16x112xf32, #tpu.memory_space<vmem>>, vector<16x16xf32>
    tpu.vector_store %arg19[%c0_313, %c0_314], %320 {strides = array<i32>} : memref<16x112xf32, #tpu.memory_space<vmem>>, vector<16x16xf32>,
    %326 = vector.extract_strided_slice %293 {offsets = [0, 16], sizes = [16, 16], strides = [1, 1]} : vector<16x112xf32> to vector<16x16xf32>
    %327 = arith.addf %320, %326 : vector<16x16xf32>
    %328 = arith.truncf %327 : vector<16x16xf32> to vector<16x16xbf16>
    %c8_315 = arith.constant 8 : index
    %c0_316 = arith.constant 0 : index
    %329 = vector.load %arg18[%c8_315, %c0_316] : memref<32x16xbf16, #tpu.memory_space<vmem>>, vector<16x16xbf16>
    tpu.vector_store %arg18[%c8_315, %c0_316], %328 {strides = array<i32>} : memref<32x16xbf16, #tpu.memory_space<vmem>>, vector<16x16xbf16>,
    %cst_317 = arith.constant 0.000000e+00 : f32
    %330 = vector.broadcast %cst_317 : f32 to vector<16x16xf32>
    %c7_318 = arith.constant 7 : index
    %c0_319 = arith.constant 0 : index
    %331 = vector.load %arg18[%c7_318, %c0_319] : memref<32x16xbf16, #tpu.memory_space<vmem>>, vector<16x16xbf16>
    %c1_320 = arith.constant 1 : index
    %c1_321 = arith.constant 1 : index
    %c0_322 = arith.constant 0 : index
    %c0_323 = arith.constant 0 : index
    %332 = vector.load %arg6[%c1_320, %c1_321, %c0_322, %c0_323] : memref<3x7x48x16xbf16, #tpu.memory_space<vmem>>, vector<1x1x16x16xbf16>
    %333 = vector.shape_cast %332 : vector<1x1x16x16xbf16> to vector<16x16xbf16>
    %cst_324 = arith.constant dense<0.000000e+00> : vector<16x16xf32>
    %334 = tpu.matmul %331, %333, %cst_324 {dimension_numbers = #tpu.dot_dimension_numbers<[1], [0], [0], [1], [0, 0, 1, 1], [], []>} : vector<16x16xbf16>, vector<16x16xbf16>, vector<16x16xf32> -> vector<16x16xf32>
    %335 = arith.addf %330, %334 : vector<16x16xf32>
    %c8_325 = arith.constant 8 : index
    %c0_326 = arith.constant 0 : index
    %336 = vector.load %arg18[%c8_325, %c0_326] : memref<32x16xbf16, #tpu.memory_space<vmem>>, vector<16x16xbf16>
    %c1_327 = arith.constant 1 : index
    %c1_328 = arith.constant 1 : index
    %c16_329 = arith.constant 16 : index
    %c0_330 = arith.constant 0 : index
    %337 = vector.load %arg6[%c1_327, %c1_328, %c16_329, %c0_330] : memref<3x7x48x16xbf16, #tpu.memory_space<vmem>>, vector<1x1x16x16xbf16>
    %338 = vector.shape_cast %337 : vector<1x1x16x16xbf16> to vector<16x16xbf16>
    %cst_331 = arith.constant dense<0.000000e+00> : vector<16x16xf32>
    %339 = tpu.matmul %336, %338, %cst_331 {dimension_numbers = #tpu.dot_dimension_numbers<[1], [0], [0], [1], [0, 0, 1, 1], [], []>} : vector<16x16xbf16>, vector<16x16xbf16>, vector<16x16xf32> -> vector<16x16xf32>
    %340 = arith.addf %335, %339 : vector<16x16xf32>
    %c9_332 = arith.constant 9 : index
    %c0_333 = arith.constant 0 : index
    %341 = vector.load %arg18[%c9_332, %c0_333] : memref<32x16xbf16, #tpu.memory_space<vmem>>, vector<16x16xbf16>
    %c1_334 = arith.constant 1 : index
    %c1_335 = arith.constant 1 : index
    %c32_336 = arith.constant 32 : index
    %c0_337 = arith.constant 0 : index
    %342 = vector.load %arg6[%c1_334, %c1_335, %c32_336, %c0_337] : memref<3x7x48x16xbf16, #tpu.memory_space<vmem>>, vector<1x1x16x16xbf16>
    %343 = vector.shape_cast %342 : vector<1x1x16x16xbf16> to vector<16x16xbf16>
    %cst_338 = arith.constant dense<0.000000e+00> : vector<16x16xf32>
    %344 = tpu.matmul %341, %343, %cst_338 {dimension_numbers = #tpu.dot_dimension_numbers<[1], [0], [0], [1], [0, 0, 1, 1], [], []>} : vector<16x16xbf16>, vector<16x16xbf16>, vector<16x16xf32> -> vector<16x16xf32>
    %345 = arith.addf %340, %344 : vector<16x16xf32>
    %c1_339 = arith.constant 1 : index
    %c1_340 = arith.constant 1 : index
    %c0_341 = arith.constant 0 : index
    %c0_342 = arith.constant 0 : index
    %346 = vector.load %arg7[%c1_339, %c1_340, %c0_341, %c0_342] : memref<3x7x1x16xf32, #tpu.memory_space<vmem>>, vector<1x1x1x16xf32>
    %347 = vector.shape_cast %346 : vector<1x1x1x16xf32> to vector<1x16xf32>
    %348 = vector.broadcast %347 : vector<1x16xf32> to vector<16x16xf32>
    %349 = arith.addf %345, %348 : vector<16x16xf32>
    %cst_343 = arith.constant dense<0.000000e+00> : vector<16xf32>
    %350 = vector.multi_reduction <add>, %349, %cst_343 [0] : vector<16x16xf32> to vector<16xf32>
    %351 = vector.shape_cast %350 : vector<16xf32> to vector<1x16xf32>
    %cst_344 = arith.constant 1.600000e+01 : f32
    %352 = vector.broadcast %cst_344 : f32 to vector<1x16xf32>
    %353 = arith.divf %351, %352 : vector<1x16xf32>
    %c0_345 = arith.constant 0 : index
    %c16_346 = arith.constant 16 : index
    %354 = vector.load %arg19[%c0_345, %c16_346] : memref<16x112xf32, #tpu.memory_space<vmem>>, vector<16x16xf32>
    tpu.vector_store %arg19[%c0_345, %c16_346], %349 {strides = array<i32>} : memref<16x112xf32, #tpu.memory_space<vmem>>, vector<16x16xf32>,
    %355 = vector.extract_strided_slice %293 {offsets = [0, 32], sizes = [16, 16], strides = [1, 1]} : vector<16x112xf32> to vector<16x16xf32>
    %356 = arith.addf %349, %355 : vector<16x16xf32>
    %357 = arith.truncf %356 : vector<16x16xf32> to vector<16x16xbf16>
    %c8_347 = arith.constant 8 : index
    %c0_348 = arith.constant 0 : index
    %358 = vector.load %arg18[%c8_347, %c0_348] : memref<32x16xbf16, #tpu.memory_space<vmem>>, vector<16x16xbf16>
    tpu.vector_store %arg18[%c8_347, %c0_348], %357 {strides = array<i32>} : memref<32x16xbf16, #tpu.memory_space<vmem>>, vector<16x16xbf16>,
    %cst_349 = arith.constant 0.000000e+00 : f32
    %359 = vector.broadcast %cst_349 : f32 to vector<16x16xf32>
    %c7_350 = arith.constant 7 : index
    %c0_351 = arith.constant 0 : index
    %360 = vector.load %arg18[%c7_350, %c0_351] : memref<32x16xbf16, #tpu.memory_space<vmem>>, vector<16x16xbf16>
    %c1_352 = arith.constant 1 : index
    %c2_353 = arith.constant 2 : index
    %c0_354 = arith.constant 0 : index
    %c0_355 = arith.constant 0 : index
    %361 = vector.load %arg6[%c1_352, %c2_353, %c0_354, %c0_355] : memref<3x7x48x16xbf16, #tpu.memory_space<vmem>>, vector<1x1x16x16xbf16>
    %362 = vector.shape_cast %361 : vector<1x1x16x16xbf16> to vector<16x16xbf16>
    %cst_356 = arith.constant dense<0.000000e+00> : vector<16x16xf32>
    %363 = tpu.matmul %360, %362, %cst_356 {dimension_numbers = #tpu.dot_dimension_numbers<[1], [0], [0], [1], [0, 0, 1, 1], [], []>} : vector<16x16xbf16>, vector<16x16xbf16>, vector<16x16xf32> -> vector<16x16xf32>
    %364 = arith.addf %359, %363 : vector<16x16xf32>
    %c8_357 = arith.constant 8 : index
    %c0_358 = arith.constant 0 : index
    %365 = vector.load %arg18[%c8_357, %c0_358] : memref<32x16xbf16, #tpu.memory_space<vmem>>, vector<16x16xbf16>
    %c1_359 = arith.constant 1 : index
    %c2_360 = arith.constant 2 : index
    %c16_361 = arith.constant 16 : index
    %c0_362 = arith.constant 0 : index
    %366 = vector.load %arg6[%c1_359, %c2_360, %c16_361, %c0_362] : memref<3x7x48x16xbf16, #tpu.memory_space<vmem>>, vector<1x1x16x16xbf16>
    %367 = vector.shape_cast %366 : vector<1x1x16x16xbf16> to vector<16x16xbf16>
    %cst_363 = arith.constant dense<0.000000e+00> : vector<16x16xf32>
    %368 = tpu.matmul %365, %367, %cst_363 {dimension_numbers = #tpu.dot_dimension_numbers<[1], [0], [0], [1], [0, 0, 1, 1], [], []>} : vector<16x16xbf16>, vector<16x16xbf16>, vector<16x16xf32> -> vector<16x16xf32>
    %369 = arith.addf %364, %368 : vector<16x16xf32>
    %c9_364 = arith.constant 9 : index
    %c0_365 = arith.constant 0 : index
    %370 = vector.load %arg18[%c9_364, %c0_365] : memref<32x16xbf16, #tpu.memory_space<vmem>>, vector<16x16xbf16>
    %c1_366 = arith.constant 1 : index
    %c2_367 = arith.constant 2 : index
    %c32_368 = arith.constant 32 : index
    %c0_369 = arith.constant 0 : index
    %371 = vector.load %arg6[%c1_366, %c2_367, %c32_368, %c0_369] : memref<3x7x48x16xbf16, #tpu.memory_space<vmem>>, vector<1x1x16x16xbf16>
    %372 = vector.shape_cast %371 : vector<1x1x16x16xbf16> to vector<16x16xbf16>
    %cst_370 = arith.constant dense<0.000000e+00> : vector<16x16xf32>
    %373 = tpu.matmul %370, %372, %cst_370 {dimension_numbers = #tpu.dot_dimension_numbers<[1], [0], [0], [1], [0, 0, 1, 1], [], []>} : vector<16x16xbf16>, vector<16x16xbf16>, vector<16x16xf32> -> vector<16x16xf32>
    %374 = arith.addf %369, %373 : vector<16x16xf32>
    %c1_371 = arith.constant 1 : index
    %c2_372 = arith.constant 2 : index
    %c0_373 = arith.constant 0 : index
    %c0_374 = arith.constant 0 : index
    %375 = vector.load %arg7[%c1_371, %c2_372, %c0_373, %c0_374] : memref<3x7x1x16xf32, #tpu.memory_space<vmem>>, vector<1x1x1x16xf32>
    %376 = vector.shape_cast %375 : vector<1x1x1x16xf32> to vector<1x16xf32>
    %377 = vector.broadcast %376 : vector<1x16xf32> to vector<16x16xf32>
    %378 = arith.addf %374, %377 : vector<16x16xf32>
    %cst_375 = arith.constant dense<0.000000e+00> : vector<16xf32>
    %379 = vector.multi_reduction <add>, %378, %cst_375 [0] : vector<16x16xf32> to vector<16xf32>
    %380 = vector.shape_cast %379 : vector<16xf32> to vector<1x16xf32>
    %cst_376 = arith.constant 1.600000e+01 : f32
    %381 = vector.broadcast %cst_376 : f32 to vector<1x16xf32>
    %382 = arith.divf %380, %381 : vector<1x16xf32>
    %c0_377 = arith.constant 0 : index
    %c32_378 = arith.constant 32 : index
    %383 = vector.load %arg19[%c0_377, %c32_378] : memref<16x112xf32, #tpu.memory_space<vmem>>, vector<16x16xf32>
    tpu.vector_store %arg19[%c0_377, %c32_378], %378 {strides = array<i32>} : memref<16x112xf32, #tpu.memory_space<vmem>>, vector<16x16xf32>,
    %384 = vector.extract_strided_slice %293 {offsets = [0, 48], sizes = [16, 16], strides = [1, 1]} : vector<16x112xf32> to vector<16x16xf32>
    %385 = arith.addf %378, %384 : vector<16x16xf32>
    %386 = arith.truncf %385 : vector<16x16xf32> to vector<16x16xbf16>
    %c8_379 = arith.constant 8 : index
    %c0_380 = arith.constant 0 : index
    %387 = vector.load %arg18[%c8_379, %c0_380] : memref<32x16xbf16, #tpu.memory_space<vmem>>, vector<16x16xbf16>
    tpu.vector_store %arg18[%c8_379, %c0_380], %386 {strides = array<i32>} : memref<32x16xbf16, #tpu.memory_space<vmem>>, vector<16x16xbf16>,
    %cst_381 = arith.constant 0.000000e+00 : f32
    %388 = vector.broadcast %cst_381 : f32 to vector<16x16xf32>
    %c7_382 = arith.constant 7 : index
    %c0_383 = arith.constant 0 : index
    %389 = vector.load %arg18[%c7_382, %c0_383] : memref<32x16xbf16, #tpu.memory_space<vmem>>, vector<16x16xbf16>
    %c1_384 = arith.constant 1 : index
    %c3_385 = arith.constant 3 : index
    %c0_386 = arith.constant 0 : index
    %c0_387 = arith.constant 0 : index
    %390 = vector.load %arg6[%c1_384, %c3_385, %c0_386, %c0_387] : memref<3x7x48x16xbf16, #tpu.memory_space<vmem>>, vector<1x1x16x16xbf16>
    %391 = vector.shape_cast %390 : vector<1x1x16x16xbf16> to vector<16x16xbf16>
    %cst_388 = arith.constant dense<0.000000e+00> : vector<16x16xf32>
    %392 = tpu.matmul %389, %391, %cst_388 {dimension_numbers = #tpu.dot_dimension_numbers<[1], [0], [0], [1], [0, 0, 1, 1], [], []>} : vector<16x16xbf16>, vector<16x16xbf16>, vector<16x16xf32> -> vector<16x16xf32>
    %393 = arith.addf %388, %392 : vector<16x16xf32>
    %c8_389 = arith.constant 8 : index
    %c0_390 = arith.constant 0 : index
    %394 = vector.load %arg18[%c8_389, %c0_390] : memref<32x16xbf16, #tpu.memory_space<vmem>>, vector<16x16xbf16>
    %c1_391 = arith.constant 1 : index
    %c3_392 = arith.constant 3 : index
    %c16_393 = arith.constant 16 : index
    %c0_394 = arith.constant 0 : index
    %395 = vector.load %arg6[%c1_391, %c3_392, %c16_393, %c0_394] : memref<3x7x48x16xbf16, #tpu.memory_space<vmem>>, vector<1x1x16x16xbf16>
    %396 = vector.shape_cast %395 : vector<1x1x16x16xbf16> to vector<16x16xbf16>
    %cst_395 = arith.constant dense<0.000000e+00> : vector<16x16xf32>
    %397 = tpu.matmul %394, %396, %cst_395 {dimension_numbers = #tpu.dot_dimension_numbers<[1], [0], [0], [1], [0, 0, 1, 1], [], []>} : vector<16x16xbf16>, vector<16x16xbf16>, vector<16x16xf32> -> vector<16x16xf32>
    %398 = arith.addf %393, %397 : vector<16x16xf32>
    %c9_396 = arith.constant 9 : index
    %c0_397 = arith.constant 0 : index
    %399 = vector.load %arg18[%c9_396, %c0_397] : memref<32x16xbf16, #tpu.memory_space<vmem>>, vector<16x16xbf16>
    %c1_398 = arith.constant 1 : index
    %c3_399 = arith.constant 3 : index
    %c32_400 = arith.constant 32 : index
    %c0_401 = arith.constant 0 : index
    %400 = vector.load %arg6[%c1_398, %c3_399, %c32_400, %c0_401] : memref<3x7x48x16xbf16, #tpu.memory_space<vmem>>, vector<1x1x16x16xbf16>
    %401 = vector.shape_cast %400 : vector<1x1x16x16xbf16> to vector<16x16xbf16>
    %cst_402 = arith.constant dense<0.000000e+00> : vector<16x16xf32>
    %402 = tpu.matmul %399, %401, %cst_402 {dimension_numbers = #tpu.dot_dimension_numbers<[1], [0], [0], [1], [0, 0, 1, 1], [], []>} : vector<16x16xbf16>, vector<16x16xbf16>, vector<16x16xf32> -> vector<16x16xf32>
    %403 = arith.addf %398, %402 : vector<16x16xf32>
    %c1_403 = arith.constant 1 : index
    %c3_404 = arith.constant 3 : index
    %c0_405 = arith.constant 0 : index
    %c0_406 = arith.constant 0 : index
    %404 = vector.load %arg7[%c1_403, %c3_404, %c0_405, %c0_406] : memref<3x7x1x16xf32, #tpu.memory_space<vmem>>, vector<1x1x1x16xf32>
    %405 = vector.shape_cast %404 : vector<1x1x1x16xf32> to vector<1x16xf32>
    %406 = vector.broadcast %405 : vector<1x16xf32> to vector<16x16xf32>
    %407 = arith.addf %403, %406 : vector<16x16xf32>
    %cst_407 = arith.constant dense<0.000000e+00> : vector<16xf32>
    %408 = vector.multi_reduction <add>, %407, %cst_407 [0] : vector<16x16xf32> to vector<16xf32>
    %409 = vector.shape_cast %408 : vector<16xf32> to vector<1x16xf32>
    %cst_408 = arith.constant 1.600000e+01 : f32
    %410 = vector.broadcast %cst_408 : f32 to vector<1x16xf32>
    %411 = arith.divf %409, %410 : vector<1x16xf32>
    %c0_409 = arith.constant 0 : index
    %c48_410 = arith.constant 48 : index
    %412 = vector.load %arg19[%c0_409, %c48_410] : memref<16x112xf32, #tpu.memory_space<vmem>>, vector<16x16xf32>
    tpu.vector_store %arg19[%c0_409, %c48_410], %407 {strides = array<i32>} : memref<16x112xf32, #tpu.memory_space<vmem>>, vector<16x16xf32>,
    %413 = vector.extract_strided_slice %293 {offsets = [0, 64], sizes = [16, 16], strides = [1, 1]} : vector<16x112xf32> to vector<16x16xf32>
    %414 = arith.addf %407, %413 : vector<16x16xf32>
    %415 = arith.truncf %414 : vector<16x16xf32> to vector<16x16xbf16>
    %c8_411 = arith.constant 8 : index
    %c0_412 = arith.constant 0 : index
    %416 = vector.load %arg18[%c8_411, %c0_412] : memref<32x16xbf16, #tpu.memory_space<vmem>>, vector<16x16xbf16>
    tpu.vector_store %arg18[%c8_411, %c0_412], %415 {strides = array<i32>} : memref<32x16xbf16, #tpu.memory_space<vmem>>, vector<16x16xbf16>,
    %cst_413 = arith.constant 0.000000e+00 : f32
    %417 = vector.broadcast %cst_413 : f32 to vector<16x16xf32>
    %c7_414 = arith.constant 7 : index
    %c0_415 = arith.constant 0 : index
    %418 = vector.load %arg18[%c7_414, %c0_415] : memref<32x16xbf16, #tpu.memory_space<vmem>>, vector<16x16xbf16>
    %c1_416 = arith.constant 1 : index
    %c4_417 = arith.constant 4 : index
    %c0_418 = arith.constant 0 : index
    %c0_419 = arith.constant 0 : index
    %419 = vector.load %arg6[%c1_416, %c4_417, %c0_418, %c0_419] : memref<3x7x48x16xbf16, #tpu.memory_space<vmem>>, vector<1x1x16x16xbf16>
    %420 = vector.shape_cast %419 : vector<1x1x16x16xbf16> to vector<16x16xbf16>
    %cst_420 = arith.constant dense<0.000000e+00> : vector<16x16xf32>
    %421 = tpu.matmul %418, %420, %cst_420 {dimension_numbers = #tpu.dot_dimension_numbers<[1], [0], [0], [1], [0, 0, 1, 1], [], []>} : vector<16x16xbf16>, vector<16x16xbf16>, vector<16x16xf32> -> vector<16x16xf32>
    %422 = arith.addf %417, %421 : vector<16x16xf32>
    %c8_421 = arith.constant 8 : index
    %c0_422 = arith.constant 0 : index
    %423 = vector.load %arg18[%c8_421, %c0_422] : memref<32x16xbf16, #tpu.memory_space<vmem>>, vector<16x16xbf16>
    %c1_423 = arith.constant 1 : index
    %c4_424 = arith.constant 4 : index
    %c16_425 = arith.constant 16 : index
    %c0_426 = arith.constant 0 : index
    %424 = vector.load %arg6[%c1_423, %c4_424, %c16_425, %c0_426] : memref<3x7x48x16xbf16, #tpu.memory_space<vmem>>, vector<1x1x16x16xbf16>
    %425 = vector.shape_cast %424 : vector<1x1x16x16xbf16> to vector<16x16xbf16>
    %cst_427 = arith.constant dense<0.000000e+00> : vector<16x16xf32>
    %426 = tpu.matmul %423, %425, %cst_427 {dimension_numbers = #tpu.dot_dimension_numbers<[1], [0], [0], [1], [0, 0, 1, 1], [], []>} : vector<16x16xbf16>, vector<16x16xbf16>, vector<16x16xf32> -> vector<16x16xf32>
    %427 = arith.addf %422, %426 : vector<16x16xf32>
    %c9_428 = arith.constant 9 : index
    %c0_429 = arith.constant 0 : index
    %428 = vector.load %arg18[%c9_428, %c0_429] : memref<32x16xbf16, #tpu.memory_space<vmem>>, vector<16x16xbf16>
    %c1_430 = arith.constant 1 : index
    %c4_431 = arith.constant 4 : index
    %c32_432 = arith.constant 32 : index
    %c0_433 = arith.constant 0 : index
    %429 = vector.load %arg6[%c1_430, %c4_431, %c32_432, %c0_433] : memref<3x7x48x16xbf16, #tpu.memory_space<vmem>>, vector<1x1x16x16xbf16>
    %430 = vector.shape_cast %429 : vector<1x1x16x16xbf16> to vector<16x16xbf16>
    %cst_434 = arith.constant dense<0.000000e+00> : vector<16x16xf32>
    %431 = tpu.matmul %428, %430, %cst_434 {dimension_numbers = #tpu.dot_dimension_numbers<[1], [0], [0], [1], [0, 0, 1, 1], [], []>} : vector<16x16xbf16>, vector<16x16xbf16>, vector<16x16xf32> -> vector<16x16xf32>
    %432 = arith.addf %427, %431 : vector<16x16xf32>
    %c1_435 = arith.constant 1 : index
    %c4_436 = arith.constant 4 : index
    %c0_437 = arith.constant 0 : index
    %c0_438 = arith.constant 0 : index
    %433 = vector.load %arg7[%c1_435, %c4_436, %c0_437, %c0_438] : memref<3x7x1x16xf32, #tpu.memory_space<vmem>>, vector<1x1x1x16xf32>
    %434 = vector.shape_cast %433 : vector<1x1x1x16xf32> to vector<1x16xf32>
    %435 = vector.broadcast %434 : vector<1x16xf32> to vector<16x16xf32>
    %436 = arith.addf %432, %435 : vector<16x16xf32>
    %cst_439 = arith.constant dense<0.000000e+00> : vector<16xf32>
    %437 = vector.multi_reduction <add>, %436, %cst_439 [0] : vector<16x16xf32> to vector<16xf32>
    %438 = vector.shape_cast %437 : vector<16xf32> to vector<1x16xf32>
    %cst_440 = arith.constant 1.600000e+01 : f32
    %439 = vector.broadcast %cst_440 : f32 to vector<1x16xf32>
    %440 = arith.divf %438, %439 : vector<1x16xf32>
    %c0_441 = arith.constant 0 : index
    %c64_442 = arith.constant 64 : index
    %441 = vector.load %arg19[%c0_441, %c64_442] : memref<16x112xf32, #tpu.memory_space<vmem>>, vector<16x16xf32>
    tpu.vector_store %arg19[%c0_441, %c64_442], %436 {strides = array<i32>} : memref<16x112xf32, #tpu.memory_space<vmem>>, vector<16x16xf32>,
    %442 = vector.extract_strided_slice %293 {offsets = [0, 80], sizes = [16, 16], strides = [1, 1]} : vector<16x112xf32> to vector<16x16xf32>
    %443 = arith.addf %436, %442 : vector<16x16xf32>
    %444 = arith.truncf %443 : vector<16x16xf32> to vector<16x16xbf16>
    %c8_443 = arith.constant 8 : index
    %c0_444 = arith.constant 0 : index
    %445 = vector.load %arg18[%c8_443, %c0_444] : memref<32x16xbf16, #tpu.memory_space<vmem>>, vector<16x16xbf16>
    tpu.vector_store %arg18[%c8_443, %c0_444], %444 {strides = array<i32>} : memref<32x16xbf16, #tpu.memory_space<vmem>>, vector<16x16xbf16>,
    %cst_445 = arith.constant 0.000000e+00 : f32
    %446 = vector.broadcast %cst_445 : f32 to vector<16x16xf32>
    %c7_446 = arith.constant 7 : index
    %c0_447 = arith.constant 0 : index
    %447 = vector.load %arg18[%c7_446, %c0_447] : memref<32x16xbf16, #tpu.memory_space<vmem>>, vector<16x16xbf16>
    %c1_448 = arith.constant 1 : index
    %c5_449 = arith.constant 5 : index
    %c0_450 = arith.constant 0 : index
    %c0_451 = arith.constant 0 : index
    %448 = vector.load %arg6[%c1_448, %c5_449, %c0_450, %c0_451] : memref<3x7x48x16xbf16, #tpu.memory_space<vmem>>, vector<1x1x16x16xbf16>
    %449 = vector.shape_cast %448 : vector<1x1x16x16xbf16> to vector<16x16xbf16>
    %cst_452 = arith.constant dense<0.000000e+00> : vector<16x16xf32>
    %450 = tpu.matmul %447, %449, %cst_452 {dimension_numbers = #tpu.dot_dimension_numbers<[1], [0], [0], [1], [0, 0, 1, 1], [], []>} : vector<16x16xbf16>, vector<16x16xbf16>, vector<16x16xf32> -> vector<16x16xf32>
    %451 = arith.addf %446, %450 : vector<16x16xf32>
    %c8_453 = arith.constant 8 : index
    %c0_454 = arith.constant 0 : index
    %452 = vector.load %arg18[%c8_453, %c0_454] : memref<32x16xbf16, #tpu.memory_space<vmem>>, vector<16x16xbf16>
    %c1_455 = arith.constant 1 : index
    %c5_456 = arith.constant 5 : index
    %c16_457 = arith.constant 16 : index
    %c0_458 = arith.constant 0 : index
    %453 = vector.load %arg6[%c1_455, %c5_456, %c16_457, %c0_458] : memref<3x7x48x16xbf16, #tpu.memory_space<vmem>>, vector<1x1x16x16xbf16>
    %454 = vector.shape_cast %453 : vector<1x1x16x16xbf16> to vector<16x16xbf16>
    %cst_459 = arith.constant dense<0.000000e+00> : vector<16x16xf32>
    %455 = tpu.matmul %452, %454, %cst_459 {dimension_numbers = #tpu.dot_dimension_numbers<[1], [0], [0], [1], [0, 0, 1, 1], [], []>} : vector<16x16xbf16>, vector<16x16xbf16>, vector<16x16xf32> -> vector<16x16xf32>
    %456 = arith.addf %451, %455 : vector<16x16xf32>
    %c9_460 = arith.constant 9 : index
    %c0_461 = arith.constant 0 : index
    %457 = vector.load %arg18[%c9_460, %c0_461] : memref<32x16xbf16, #tpu.memory_space<vmem>>, vector<16x16xbf16>
    %c1_462 = arith.constant 1 : index
    %c5_463 = arith.constant 5 : index
    %c32_464 = arith.constant 32 : index
    %c0_465 = arith.constant 0 : index
    %458 = vector.load %arg6[%c1_462, %c5_463, %c32_464, %c0_465] : memref<3x7x48x16xbf16, #tpu.memory_space<vmem>>, vector<1x1x16x16xbf16>
    %459 = vector.shape_cast %458 : vector<1x1x16x16xbf16> to vector<16x16xbf16>
    %cst_466 = arith.constant dense<0.000000e+00> : vector<16x16xf32>
    %460 = tpu.matmul %457, %459, %cst_466 {dimension_numbers = #tpu.dot_dimension_numbers<[1], [0], [0], [1], [0, 0, 1, 1], [], []>} : vector<16x16xbf16>, vector<16x16xbf16>, vector<16x16xf32> -> vector<16x16xf32>
    %461 = arith.addf %456, %460 : vector<16x16xf32>
    %c1_467 = arith.constant 1 : index
    %c5_468 = arith.constant 5 : index
    %c0_469 = arith.constant 0 : index
    %c0_470 = arith.constant 0 : index
    %462 = vector.load %arg7[%c1_467, %c5_468, %c0_469, %c0_470] : memref<3x7x1x16xf32, #tpu.memory_space<vmem>>, vector<1x1x1x16xf32>
    %463 = vector.shape_cast %462 : vector<1x1x1x16xf32> to vector<1x16xf32>
    %464 = vector.broadcast %463 : vector<1x16xf32> to vector<16x16xf32>
    %465 = arith.addf %461, %464 : vector<16x16xf32>
    %cst_471 = arith.constant dense<0.000000e+00> : vector<16xf32>
    %466 = vector.multi_reduction <add>, %465, %cst_471 [0] : vector<16x16xf32> to vector<16xf32>
    %467 = vector.shape_cast %466 : vector<16xf32> to vector<1x16xf32>
    %cst_472 = arith.constant 1.600000e+01 : f32
    %468 = vector.broadcast %cst_472 : f32 to vector<1x16xf32>
    %469 = arith.divf %467, %468 : vector<1x16xf32>
    %c0_473 = arith.constant 0 : index
    %c80_474 = arith.constant 80 : index
    %470 = vector.load %arg19[%c0_473, %c80_474] : memref<16x112xf32, #tpu.memory_space<vmem>>, vector<16x16xf32>
    tpu.vector_store %arg19[%c0_473, %c80_474], %465 {strides = array<i32>} : memref<16x112xf32, #tpu.memory_space<vmem>>, vector<16x16xf32>,
    %471 = vector.extract_strided_slice %293 {offsets = [0, 96], sizes = [16, 16], strides = [1, 1]} : vector<16x112xf32> to vector<16x16xf32>
    %472 = arith.addf %465, %471 : vector<16x16xf32>
    %473 = arith.truncf %472 : vector<16x16xf32> to vector<16x16xbf16>
    %c8_475 = arith.constant 8 : index
    %c0_476 = arith.constant 0 : index
    %474 = vector.load %arg18[%c8_475, %c0_476] : memref<32x16xbf16, #tpu.memory_space<vmem>>, vector<16x16xbf16>
    tpu.vector_store %arg18[%c8_475, %c0_476], %473 {strides = array<i32>} : memref<32x16xbf16, #tpu.memory_space<vmem>>, vector<16x16xbf16>,
    %cst_477 = arith.constant 0.000000e+00 : f32
    %475 = vector.broadcast %cst_477 : f32 to vector<16x16xf32>
    %c7_478 = arith.constant 7 : index
    %c0_479 = arith.constant 0 : index
    %476 = vector.load %arg18[%c7_478, %c0_479] : memref<32x16xbf16, #tpu.memory_space<vmem>>, vector<16x16xbf16>
    %c1_480 = arith.constant 1 : index
    %c6_481 = arith.constant 6 : index
    %c0_482 = arith.constant 0 : index
    %c0_483 = arith.constant 0 : index
    %477 = vector.load %arg6[%c1_480, %c6_481, %c0_482, %c0_483] : memref<3x7x48x16xbf16, #tpu.memory_space<vmem>>, vector<1x1x16x16xbf16>
    %478 = vector.shape_cast %477 : vector<1x1x16x16xbf16> to vector<16x16xbf16>
    %cst_484 = arith.constant dense<0.000000e+00> : vector<16x16xf32>
    %479 = tpu.matmul %476, %478, %cst_484 {dimension_numbers = #tpu.dot_dimension_numbers<[1], [0], [0], [1], [0, 0, 1, 1], [], []>} : vector<16x16xbf16>, vector<16x16xbf16>, vector<16x16xf32> -> vector<16x16xf32>
    %480 = arith.addf %475, %479 : vector<16x16xf32>
    %c8_485 = arith.constant 8 : index
    %c0_486 = arith.constant 0 : index
    %481 = vector.load %arg18[%c8_485, %c0_486] : memref<32x16xbf16, #tpu.memory_space<vmem>>, vector<16x16xbf16>
    %c1_487 = arith.constant 1 : index
    %c6_488 = arith.constant 6 : index
    %c16_489 = arith.constant 16 : index
    %c0_490 = arith.constant 0 : index
    %482 = vector.load %arg6[%c1_487, %c6_488, %c16_489, %c0_490] : memref<3x7x48x16xbf16, #tpu.memory_space<vmem>>, vector<1x1x16x16xbf16>
    %483 = vector.shape_cast %482 : vector<1x1x16x16xbf16> to vector<16x16xbf16>
    %cst_491 = arith.constant dense<0.000000e+00> : vector<16x16xf32>
    %484 = tpu.matmul %481, %483, %cst_491 {dimension_numbers = #tpu.dot_dimension_numbers<[1], [0], [0], [1], [0, 0, 1, 1], [], []>} : vector<16x16xbf16>, vector<16x16xbf16>, vector<16x16xf32> -> vector<16x16xf32>
    %485 = arith.addf %480, %484 : vector<16x16xf32>
    %c9_492 = arith.constant 9 : index
    %c0_493 = arith.constant 0 : index
    %486 = vector.load %arg18[%c9_492, %c0_493] : memref<32x16xbf16, #tpu.memory_space<vmem>>, vector<16x16xbf16>
    %c1_494 = arith.constant 1 : index
    %c6_495 = arith.constant 6 : index
    %c32_496 = arith.constant 32 : index
    %c0_497 = arith.constant 0 : index
    %487 = vector.load %arg6[%c1_494, %c6_495, %c32_496, %c0_497] : memref<3x7x48x16xbf16, #tpu.memory_space<vmem>>, vector<1x1x16x16xbf16>
    %488 = vector.shape_cast %487 : vector<1x1x16x16xbf16> to vector<16x16xbf16>
    %cst_498 = arith.constant dense<0.000000e+00> : vector<16x16xf32>
    %489 = tpu.matmul %486, %488, %cst_498 {dimension_numbers = #tpu.dot_dimension_numbers<[1], [0], [0], [1], [0, 0, 1, 1], [], []>} : vector<16x16xbf16>, vector<16x16xbf16>, vector<16x16xf32> -> vector<16x16xf32>
    %490 = arith.addf %485, %489 : vector<16x16xf32>
    %c1_499 = arith.constant 1 : index
    %c6_500 = arith.constant 6 : index
    %c0_501 = arith.constant 0 : index
    %c0_502 = arith.constant 0 : index
    %491 = vector.load %arg7[%c1_499, %c6_500, %c0_501, %c0_502] : memref<3x7x1x16xf32, #tpu.memory_space<vmem>>, vector<1x1x1x16xf32>
    %492 = vector.shape_cast %491 : vector<1x1x1x16xf32> to vector<1x16xf32>
    %493 = vector.broadcast %492 : vector<1x16xf32> to vector<16x16xf32>
    %494 = arith.addf %490, %493 : vector<16x16xf32>
    %cst_503 = arith.constant dense<0.000000e+00> : vector<16xf32>
    %495 = vector.multi_reduction <add>, %494, %cst_503 [0] : vector<16x16xf32> to vector<16xf32>
    %496 = vector.shape_cast %495 : vector<16xf32> to vector<1x16xf32>
    %cst_504 = arith.constant 1.600000e+01 : f32
    %497 = vector.broadcast %cst_504 : f32 to vector<1x16xf32>
    %498 = arith.divf %496, %497 : vector<1x16xf32>
    %c0_505 = arith.constant 0 : index
    %c96_506 = arith.constant 96 : index
    %499 = vector.load %arg19[%c0_505, %c96_506] : memref<16x112xf32, #tpu.memory_space<vmem>>, vector<16x16xf32>
    tpu.vector_store %arg19[%c0_505, %c96_506], %494 {strides = array<i32>} : memref<16x112xf32, #tpu.memory_space<vmem>>, vector<16x16xf32>,
    %500 = tpu.concatenate %297, %324, %353, %382, %411, %440, %469, %498 in 1 : vector<1x16xf32>, vector<1x16xf32>, vector<1x16xf32>, vector<1x16xf32>, vector<1x16xf32>, vector<1x16xf32>, vector<1x16xf32>, vector<1x16xf32> -> vector<1x128xf32>
    %501 = arith.truncf %500 : vector<1x128xf32> to vector<1x128xbf16>
    %c1_507 = arith.constant 1 : index
    %c0_508 = arith.constant 0 : index
    %c0_509 = arith.constant 0 : index
    %502 = vector.load %arg8[%c1_507, %c0_508, %c0_509] : memref<3x128x32xbf16, #tpu.memory_space<vmem>>, vector<1x128x32xbf16>
    %503 = vector.shape_cast %502 : vector<1x128x32xbf16> to vector<128x32xbf16>
    %cst_510 = arith.constant dense<0.000000e+00> : vector<1x32xf32>
    %504 = tpu.matmul %501, %503, %cst_510 {dimension_numbers = #tpu.dot_dimension_numbers<[1], [0], [0], [1], [0, 0, 1, 1], [], []>} : vector<1x128xbf16>, vector<128x32xbf16>, vector<1x32xf32> -> vector<1x32xf32>
    %c1_511 = arith.constant 1 : index
    %c0_512 = arith.constant 0 : index
    %c0_513 = arith.constant 0 : index
    %505 = vector.load %arg9[%c1_511, %c0_512, %c0_513] : memref<3x1x32xf32, #tpu.memory_space<vmem>>, vector<1x1x32xf32>
    %506 = vector.shape_cast %505 : vector<1x1x32xf32> to vector<1x32xf32>
    %507 = arith.addf %504, %506 : vector<1x32xf32>
    %cst_514 = arith.constant 0.000000e+00 : f32
    %508 = vector.broadcast %cst_514 : f32 to vector<1x32xf32>
    %509 = arith.maximumf %507, %508 : vector<1x32xf32>
    %510 = arith.truncf %509 : vector<1x32xf32> to vector<1x32xbf16>
    %c1_515 = arith.constant 1 : index
    %c0_516 = arith.constant 0 : index
    %c0_517 = arith.constant 0 : index
    %511 = vector.load %arg10[%c1_515, %c0_516, %c0_517] : memref<3x32x128xbf16, #tpu.memory_space<vmem>>, vector<1x32x128xbf16>
    %512 = vector.shape_cast %511 : vector<1x32x128xbf16> to vector<32x128xbf16>
    %cst_518 = arith.constant dense<0.000000e+00> : vector<1x128xf32>
    %513 = tpu.matmul %510, %512, %cst_518 {dimension_numbers = #tpu.dot_dimension_numbers<[1], [0], [0], [1], [0, 0, 1, 1], [], []>} : vector<1x32xbf16>, vector<32x128xbf16>, vector<1x128xf32> -> vector<1x128xf32>
    %c1_519 = arith.constant 1 : index
    %c0_520 = arith.constant 0 : index
    %c0_521 = arith.constant 0 : index
    %514 = vector.load %arg11[%c1_519, %c0_520, %c0_521] : memref<3x1x128xf32, #tpu.memory_space<vmem>>, vector<1x1x128xf32>
    %515 = vector.shape_cast %514 : vector<1x1x128xf32> to vector<1x128xf32>
    %516 = arith.addf %513, %515 : vector<1x128xf32>
    %517 = arith.negf %516 : vector<1x128xf32>
    %518 = math.exp %517 : vector<1x128xf32>
    %cst_522 = arith.constant 1.000000e+00 : f32
    %519 = vector.broadcast %cst_522 : f32 to vector<1x128xf32>
    %520 = arith.addf %519, %518 : vector<1x128xf32>
    %521 = arith.divf %519, %520 : vector<1x128xf32>
    %c1_523 = arith.constant 1 : index
    %c0_524 = arith.constant 0 : index
    %c0_525 = arith.constant 0 : index
    %522 = vector.load %arg12[%c1_523, %c0_524, %c0_525] : memref<3x1x128xf32, #tpu.memory_space<vmem>>, vector<1x1x128xf32>
    %523 = vector.shape_cast %522 : vector<1x1x128xf32> to vector<1x128xf32>
    %524 = arith.mulf %521, %523 : vector<1x128xf32>
    %c1_526 = arith.constant 1 : index
    %c0_527 = arith.constant 0 : index
    %c0_528 = arith.constant 0 : index
    %525 = vector.load %arg13[%c1_526, %c0_527, %c0_528] : memref<3x1x128xf32, #tpu.memory_space<vmem>>, vector<1x1x128xf32>
    %526 = vector.shape_cast %525 : vector<1x1x128xf32> to vector<1x128xf32>
    %527 = arith.mulf %500, %524 : vector<1x128xf32>
    %528 = arith.addf %527, %526 : vector<1x128xf32>
    %529 = vector.extract_strided_slice %524 {offsets = [0, 0], sizes = [1, 16], strides = [1, 1]} : vector<1x128xf32> to vector<1x16xf32>
    %530 = vector.broadcast %529 : vector<1x16xf32> to vector<16x16xf32>
    %531 = arith.mulf %286, %530 : vector<16x16xf32>
    %532 = vector.extract_strided_slice %526 {offsets = [0, 0], sizes = [1, 16], strides = [1, 1]} : vector<1x128xf32> to vector<1x16xf32>
    %533 = vector.broadcast %532 : vector<1x16xf32> to vector<16x16xf32>
    %534 = arith.addf %531, %533 : vector<16x16xf32>
    %c0_529 = arith.constant 0 : index
    %c0_530 = arith.constant 0 : index
    %535 = vector.load %arg19[%c0_529, %c0_530] : memref<16x112xf32, #tpu.memory_space<vmem>>, vector<16x112xf32>
    %536 = vector.extract_strided_slice %524 {offsets = [0, 16], sizes = [1, 112], strides = [1, 1]} : vector<1x128xf32> to vector<1x112xf32>
    %537 = vector.broadcast %536 : vector<1x112xf32> to vector<16x112xf32>
    %538 = arith.mulf %535, %537 : vector<16x112xf32>
    %539 = vector.extract_strided_slice %526 {offsets = [0, 16], sizes = [1, 112], strides = [1, 1]} : vector<1x128xf32> to vector<1x112xf32>
    %540 = vector.broadcast %539 : vector<1x112xf32> to vector<16x112xf32>
    %541 = arith.addf %538, %540 : vector<16x112xf32>
    %cst_531 = arith.constant dense<0.000000e+00> : vector<16xf32>
    %542 = vector.multi_reduction <add>, %534, %cst_531 [0] : vector<16x16xf32> to vector<16xf32>
    %543 = vector.shape_cast %542 : vector<16xf32> to vector<1x16xf32>
    %cst_532 = arith.constant 1.600000e+01 : f32
    %544 = vector.broadcast %cst_532 : f32 to vector<1x16xf32>
    %545 = arith.divf %543, %544 : vector<1x16xf32>
    %546 = vector.extract_strided_slice %541 {offsets = [0, 0], sizes = [16, 16], strides = [1, 1]} : vector<16x112xf32> to vector<16x16xf32>
    %547 = arith.truncf %546 : vector<16x16xf32> to vector<16x16xbf16>
    %c8_533 = arith.constant 8 : index
    %c0_534 = arith.constant 0 : index
    %548 = vector.load %arg18[%c8_533, %c0_534] : memref<32x16xbf16, #tpu.memory_space<vmem>>, vector<16x16xbf16>
    tpu.vector_store %arg18[%c8_533, %c0_534], %547 {strides = array<i32>} : memref<32x16xbf16, #tpu.memory_space<vmem>>, vector<16x16xbf16>,
    %cst_535 = arith.constant 0.000000e+00 : f32
    %549 = vector.broadcast %cst_535 : f32 to vector<16x16xf32>
    %c7_536 = arith.constant 7 : index
    %c0_537 = arith.constant 0 : index
    %550 = vector.load %arg18[%c7_536, %c0_537] : memref<32x16xbf16, #tpu.memory_space<vmem>>, vector<16x16xbf16>
    %c2_538 = arith.constant 2 : index
    %c0_539 = arith.constant 0 : index
    %c0_540 = arith.constant 0 : index
    %c0_541 = arith.constant 0 : index
    %551 = vector.load %arg6[%c2_538, %c0_539, %c0_540, %c0_541] : memref<3x7x48x16xbf16, #tpu.memory_space<vmem>>, vector<1x1x16x16xbf16>
    %552 = vector.shape_cast %551 : vector<1x1x16x16xbf16> to vector<16x16xbf16>
    %cst_542 = arith.constant dense<0.000000e+00> : vector<16x16xf32>
    %553 = tpu.matmul %550, %552, %cst_542 {dimension_numbers = #tpu.dot_dimension_numbers<[1], [0], [0], [1], [0, 0, 1, 1], [], []>} : vector<16x16xbf16>, vector<16x16xbf16>, vector<16x16xf32> -> vector<16x16xf32>
    %554 = arith.addf %549, %553 : vector<16x16xf32>
    %c8_543 = arith.constant 8 : index
    %c0_544 = arith.constant 0 : index
    %555 = vector.load %arg18[%c8_543, %c0_544] : memref<32x16xbf16, #tpu.memory_space<vmem>>, vector<16x16xbf16>
    %c2_545 = arith.constant 2 : index
    %c0_546 = arith.constant 0 : index
    %c16_547 = arith.constant 16 : index
    %c0_548 = arith.constant 0 : index
    %556 = vector.load %arg6[%c2_545, %c0_546, %c16_547, %c0_548] : memref<3x7x48x16xbf16, #tpu.memory_space<vmem>>, vector<1x1x16x16xbf16>
    %557 = vector.shape_cast %556 : vector<1x1x16x16xbf16> to vector<16x16xbf16>
    %cst_549 = arith.constant dense<0.000000e+00> : vector<16x16xf32>
    %558 = tpu.matmul %555, %557, %cst_549 {dimension_numbers = #tpu.dot_dimension_numbers<[1], [0], [0], [1], [0, 0, 1, 1], [], []>} : vector<16x16xbf16>, vector<16x16xbf16>, vector<16x16xf32> -> vector<16x16xf32>
    %559 = arith.addf %554, %558 : vector<16x16xf32>
    %c9_550 = arith.constant 9 : index
    %c0_551 = arith.constant 0 : index
    %560 = vector.load %arg18[%c9_550, %c0_551] : memref<32x16xbf16, #tpu.memory_space<vmem>>, vector<16x16xbf16>
    %c2_552 = arith.constant 2 : index
    %c0_553 = arith.constant 0 : index
    %c32_554 = arith.constant 32 : index
    %c0_555 = arith.constant 0 : index
    %561 = vector.load %arg6[%c2_552, %c0_553, %c32_554, %c0_555] : memref<3x7x48x16xbf16, #tpu.memory_space<vmem>>, vector<1x1x16x16xbf16>
    %562 = vector.shape_cast %561 : vector<1x1x16x16xbf16> to vector<16x16xbf16>
    %cst_556 = arith.constant dense<0.000000e+00> : vector<16x16xf32>
    %563 = tpu.matmul %560, %562, %cst_556 {dimension_numbers = #tpu.dot_dimension_numbers<[1], [0], [0], [1], [0, 0, 1, 1], [], []>} : vector<16x16xbf16>, vector<16x16xbf16>, vector<16x16xf32> -> vector<16x16xf32>
    %564 = arith.addf %559, %563 : vector<16x16xf32>
    %c2_557 = arith.constant 2 : index
    %c0_558 = arith.constant 0 : index
    %c0_559 = arith.constant 0 : index
    %c0_560 = arith.constant 0 : index
    %565 = vector.load %arg7[%c2_557, %c0_558, %c0_559, %c0_560] : memref<3x7x1x16xf32, #tpu.memory_space<vmem>>, vector<1x1x1x16xf32>
    %566 = vector.shape_cast %565 : vector<1x1x1x16xf32> to vector<1x16xf32>
    %567 = vector.broadcast %566 : vector<1x16xf32> to vector<16x16xf32>
    %568 = arith.addf %564, %567 : vector<16x16xf32>
    %cst_561 = arith.constant dense<0.000000e+00> : vector<16xf32>
    %569 = vector.multi_reduction <add>, %568, %cst_561 [0] : vector<16x16xf32> to vector<16xf32>
    %570 = vector.shape_cast %569 : vector<16xf32> to vector<1x16xf32>
    %cst_562 = arith.constant 1.600000e+01 : f32
    %571 = vector.broadcast %cst_562 : f32 to vector<1x16xf32>
    %572 = arith.divf %570, %571 : vector<1x16xf32>
    %573 = vector.extract_strided_slice %541 {offsets = [0, 16], sizes = [16, 16], strides = [1, 1]} : vector<16x112xf32> to vector<16x16xf32>
    %574 = arith.addf %568, %573 : vector<16x16xf32>
    %575 = arith.truncf %574 : vector<16x16xf32> to vector<16x16xbf16>
    %c8_563 = arith.constant 8 : index
    %c0_564 = arith.constant 0 : index
    %576 = vector.load %arg18[%c8_563, %c0_564] : memref<32x16xbf16, #tpu.memory_space<vmem>>, vector<16x16xbf16>
    tpu.vector_store %arg18[%c8_563, %c0_564], %575 {strides = array<i32>} : memref<32x16xbf16, #tpu.memory_space<vmem>>, vector<16x16xbf16>,
    %cst_565 = arith.constant 0.000000e+00 : f32
    %577 = vector.broadcast %cst_565 : f32 to vector<16x16xf32>
    %c7_566 = arith.constant 7 : index
    %c0_567 = arith.constant 0 : index
    %578 = vector.load %arg18[%c7_566, %c0_567] : memref<32x16xbf16, #tpu.memory_space<vmem>>, vector<16x16xbf16>
    %c2_568 = arith.constant 2 : index
    %c1_569 = arith.constant 1 : index
    %c0_570 = arith.constant 0 : index
    %c0_571 = arith.constant 0 : index
    %579 = vector.load %arg6[%c2_568, %c1_569, %c0_570, %c0_571] : memref<3x7x48x16xbf16, #tpu.memory_space<vmem>>, vector<1x1x16x16xbf16>
    %580 = vector.shape_cast %579 : vector<1x1x16x16xbf16> to vector<16x16xbf16>
    %cst_572 = arith.constant dense<0.000000e+00> : vector<16x16xf32>
    %581 = tpu.matmul %578, %580, %cst_572 {dimension_numbers = #tpu.dot_dimension_numbers<[1], [0], [0], [1], [0, 0, 1, 1], [], []>} : vector<16x16xbf16>, vector<16x16xbf16>, vector<16x16xf32> -> vector<16x16xf32>
    %582 = arith.addf %577, %581 : vector<16x16xf32>
    %c8_573 = arith.constant 8 : index
    %c0_574 = arith.constant 0 : index
    %583 = vector.load %arg18[%c8_573, %c0_574] : memref<32x16xbf16, #tpu.memory_space<vmem>>, vector<16x16xbf16>
    %c2_575 = arith.constant 2 : index
    %c1_576 = arith.constant 1 : index
    %c16_577 = arith.constant 16 : index
    %c0_578 = arith.constant 0 : index
    %584 = vector.load %arg6[%c2_575, %c1_576, %c16_577, %c0_578] : memref<3x7x48x16xbf16, #tpu.memory_space<vmem>>, vector<1x1x16x16xbf16>
    %585 = vector.shape_cast %584 : vector<1x1x16x16xbf16> to vector<16x16xbf16>
    %cst_579 = arith.constant dense<0.000000e+00> : vector<16x16xf32>
    %586 = tpu.matmul %583, %585, %cst_579 {dimension_numbers = #tpu.dot_dimension_numbers<[1], [0], [0], [1], [0, 0, 1, 1], [], []>} : vector<16x16xbf16>, vector<16x16xbf16>, vector<16x16xf32> -> vector<16x16xf32>
    %587 = arith.addf %582, %586 : vector<16x16xf32>
    %c9_580 = arith.constant 9 : index
    %c0_581 = arith.constant 0 : index
    %588 = vector.load %arg18[%c9_580, %c0_581] : memref<32x16xbf16, #tpu.memory_space<vmem>>, vector<16x16xbf16>
    %c2_582 = arith.constant 2 : index
    %c1_583 = arith.constant 1 : index
    %c32_584 = arith.constant 32 : index
    %c0_585 = arith.constant 0 : index
    %589 = vector.load %arg6[%c2_582, %c1_583, %c32_584, %c0_585] : memref<3x7x48x16xbf16, #tpu.memory_space<vmem>>, vector<1x1x16x16xbf16>
    %590 = vector.shape_cast %589 : vector<1x1x16x16xbf16> to vector<16x16xbf16>
    %cst_586 = arith.constant dense<0.000000e+00> : vector<16x16xf32>
    %591 = tpu.matmul %588, %590, %cst_586 {dimension_numbers = #tpu.dot_dimension_numbers<[1], [0], [0], [1], [0, 0, 1, 1], [], []>} : vector<16x16xbf16>, vector<16x16xbf16>, vector<16x16xf32> -> vector<16x16xf32>
    %592 = arith.addf %587, %591 : vector<16x16xf32>
    %c2_587 = arith.constant 2 : index
    %c1_588 = arith.constant 1 : index
    %c0_589 = arith.constant 0 : index
    %c0_590 = arith.constant 0 : index
    %593 = vector.load %arg7[%c2_587, %c1_588, %c0_589, %c0_590] : memref<3x7x1x16xf32, #tpu.memory_space<vmem>>, vector<1x1x1x16xf32>
    %594 = vector.shape_cast %593 : vector<1x1x1x16xf32> to vector<1x16xf32>
    %595 = vector.broadcast %594 : vector<1x16xf32> to vector<16x16xf32>
    %596 = arith.addf %592, %595 : vector<16x16xf32>
    %cst_591 = arith.constant dense<0.000000e+00> : vector<16xf32>
    %597 = vector.multi_reduction <add>, %596, %cst_591 [0] : vector<16x16xf32> to vector<16xf32>
    %598 = vector.shape_cast %597 : vector<16xf32> to vector<1x16xf32>
    %cst_592 = arith.constant 1.600000e+01 : f32
    %599 = vector.broadcast %cst_592 : f32 to vector<1x16xf32>
    %600 = arith.divf %598, %599 : vector<1x16xf32>
    %601 = vector.extract_strided_slice %541 {offsets = [0, 32], sizes = [16, 16], strides = [1, 1]} : vector<16x112xf32> to vector<16x16xf32>
    %602 = arith.addf %596, %601 : vector<16x16xf32>
    %603 = arith.truncf %602 : vector<16x16xf32> to vector<16x16xbf16>
    %c8_593 = arith.constant 8 : index
    %c0_594 = arith.constant 0 : index
    %604 = vector.load %arg18[%c8_593, %c0_594] : memref<32x16xbf16, #tpu.memory_space<vmem>>, vector<16x16xbf16>
    tpu.vector_store %arg18[%c8_593, %c0_594], %603 {strides = array<i32>} : memref<32x16xbf16, #tpu.memory_space<vmem>>, vector<16x16xbf16>,
    %cst_595 = arith.constant 0.000000e+00 : f32
    %605 = vector.broadcast %cst_595 : f32 to vector<16x16xf32>
    %c7_596 = arith.constant 7 : index
    %c0_597 = arith.constant 0 : index
    %606 = vector.load %arg18[%c7_596, %c0_597] : memref<32x16xbf16, #tpu.memory_space<vmem>>, vector<16x16xbf16>
    %c2_598 = arith.constant 2 : index
    %c2_599 = arith.constant 2 : index
    %c0_600 = arith.constant 0 : index
    %c0_601 = arith.constant 0 : index
    %607 = vector.load %arg6[%c2_598, %c2_599, %c0_600, %c0_601] : memref<3x7x48x16xbf16, #tpu.memory_space<vmem>>, vector<1x1x16x16xbf16>
    %608 = vector.shape_cast %607 : vector<1x1x16x16xbf16> to vector<16x16xbf16>
    %cst_602 = arith.constant dense<0.000000e+00> : vector<16x16xf32>
    %609 = tpu.matmul %606, %608, %cst_602 {dimension_numbers = #tpu.dot_dimension_numbers<[1], [0], [0], [1], [0, 0, 1, 1], [], []>} : vector<16x16xbf16>, vector<16x16xbf16>, vector<16x16xf32> -> vector<16x16xf32>
    %610 = arith.addf %605, %609 : vector<16x16xf32>
    %c8_603 = arith.constant 8 : index
    %c0_604 = arith.constant 0 : index
    %611 = vector.load %arg18[%c8_603, %c0_604] : memref<32x16xbf16, #tpu.memory_space<vmem>>, vector<16x16xbf16>
    %c2_605 = arith.constant 2 : index
    %c2_606 = arith.constant 2 : index
    %c16_607 = arith.constant 16 : index
    %c0_608 = arith.constant 0 : index
    %612 = vector.load %arg6[%c2_605, %c2_606, %c16_607, %c0_608] : memref<3x7x48x16xbf16, #tpu.memory_space<vmem>>, vector<1x1x16x16xbf16>
    %613 = vector.shape_cast %612 : vector<1x1x16x16xbf16> to vector<16x16xbf16>
    %cst_609 = arith.constant dense<0.000000e+00> : vector<16x16xf32>
    %614 = tpu.matmul %611, %613, %cst_609 {dimension_numbers = #tpu.dot_dimension_numbers<[1], [0], [0], [1], [0, 0, 1, 1], [], []>} : vector<16x16xbf16>, vector<16x16xbf16>, vector<16x16xf32> -> vector<16x16xf32>
    %615 = arith.addf %610, %614 : vector<16x16xf32>
    %c9_610 = arith.constant 9 : index
    %c0_611 = arith.constant 0 : index
    %616 = vector.load %arg18[%c9_610, %c0_611] : memref<32x16xbf16, #tpu.memory_space<vmem>>, vector<16x16xbf16>
    %c2_612 = arith.constant 2 : index
    %c2_613 = arith.constant 2 : index
    %c32_614 = arith.constant 32 : index
    %c0_615 = arith.constant 0 : index
    %617 = vector.load %arg6[%c2_612, %c2_613, %c32_614, %c0_615] : memref<3x7x48x16xbf16, #tpu.memory_space<vmem>>, vector<1x1x16x16xbf16>
    %618 = vector.shape_cast %617 : vector<1x1x16x16xbf16> to vector<16x16xbf16>
    %cst_616 = arith.constant dense<0.000000e+00> : vector<16x16xf32>
    %619 = tpu.matmul %616, %618, %cst_616 {dimension_numbers = #tpu.dot_dimension_numbers<[1], [0], [0], [1], [0, 0, 1, 1], [], []>} : vector<16x16xbf16>, vector<16x16xbf16>, vector<16x16xf32> -> vector<16x16xf32>
    %620 = arith.addf %615, %619 : vector<16x16xf32>
    %c2_617 = arith.constant 2 : index
    %c2_618 = arith.constant 2 : index
    %c0_619 = arith.constant 0 : index
    %c0_620 = arith.constant 0 : index
    %621 = vector.load %arg7[%c2_617, %c2_618, %c0_619, %c0_620] : memref<3x7x1x16xf32, #tpu.memory_space<vmem>>, vector<1x1x1x16xf32>
    %622 = vector.shape_cast %621 : vector<1x1x1x16xf32> to vector<1x16xf32>
    %623 = vector.broadcast %622 : vector<1x16xf32> to vector<16x16xf32>
    %624 = arith.addf %620, %623 : vector<16x16xf32>
    %cst_621 = arith.constant dense<0.000000e+00> : vector<16xf32>
    %625 = vector.multi_reduction <add>, %624, %cst_621 [0] : vector<16x16xf32> to vector<16xf32>
    %626 = vector.shape_cast %625 : vector<16xf32> to vector<1x16xf32>
    %cst_622 = arith.constant 1.600000e+01 : f32
    %627 = vector.broadcast %cst_622 : f32 to vector<1x16xf32>
    %628 = arith.divf %626, %627 : vector<1x16xf32>
    %629 = vector.extract_strided_slice %541 {offsets = [0, 48], sizes = [16, 16], strides = [1, 1]} : vector<16x112xf32> to vector<16x16xf32>
    %630 = arith.addf %624, %629 : vector<16x16xf32>
    %631 = arith.truncf %630 : vector<16x16xf32> to vector<16x16xbf16>
    %c8_623 = arith.constant 8 : index
    %c0_624 = arith.constant 0 : index
    %632 = vector.load %arg18[%c8_623, %c0_624] : memref<32x16xbf16, #tpu.memory_space<vmem>>, vector<16x16xbf16>
    tpu.vector_store %arg18[%c8_623, %c0_624], %631 {strides = array<i32>} : memref<32x16xbf16, #tpu.memory_space<vmem>>, vector<16x16xbf16>,
    %cst_625 = arith.constant 0.000000e+00 : f32
    %633 = vector.broadcast %cst_625 : f32 to vector<16x16xf32>
    %c7_626 = arith.constant 7 : index
    %c0_627 = arith.constant 0 : index
    %634 = vector.load %arg18[%c7_626, %c0_627] : memref<32x16xbf16, #tpu.memory_space<vmem>>, vector<16x16xbf16>
    %c2_628 = arith.constant 2 : index
    %c3_629 = arith.constant 3 : index
    %c0_630 = arith.constant 0 : index
    %c0_631 = arith.constant 0 : index
    %635 = vector.load %arg6[%c2_628, %c3_629, %c0_630, %c0_631] : memref<3x7x48x16xbf16, #tpu.memory_space<vmem>>, vector<1x1x16x16xbf16>
    %636 = vector.shape_cast %635 : vector<1x1x16x16xbf16> to vector<16x16xbf16>
    %cst_632 = arith.constant dense<0.000000e+00> : vector<16x16xf32>
    %637 = tpu.matmul %634, %636, %cst_632 {dimension_numbers = #tpu.dot_dimension_numbers<[1], [0], [0], [1], [0, 0, 1, 1], [], []>} : vector<16x16xbf16>, vector<16x16xbf16>, vector<16x16xf32> -> vector<16x16xf32>
    %638 = arith.addf %633, %637 : vector<16x16xf32>
    %c8_633 = arith.constant 8 : index
    %c0_634 = arith.constant 0 : index
    %639 = vector.load %arg18[%c8_633, %c0_634] : memref<32x16xbf16, #tpu.memory_space<vmem>>, vector<16x16xbf16>
    %c2_635 = arith.constant 2 : index
    %c3_636 = arith.constant 3 : index
    %c16_637 = arith.constant 16 : index
    %c0_638 = arith.constant 0 : index
    %640 = vector.load %arg6[%c2_635, %c3_636, %c16_637, %c0_638] : memref<3x7x48x16xbf16, #tpu.memory_space<vmem>>, vector<1x1x16x16xbf16>
    %641 = vector.shape_cast %640 : vector<1x1x16x16xbf16> to vector<16x16xbf16>
    %cst_639 = arith.constant dense<0.000000e+00> : vector<16x16xf32>
    %642 = tpu.matmul %639, %641, %cst_639 {dimension_numbers = #tpu.dot_dimension_numbers<[1], [0], [0], [1], [0, 0, 1, 1], [], []>} : vector<16x16xbf16>, vector<16x16xbf16>, vector<16x16xf32> -> vector<16x16xf32>
    %643 = arith.addf %638, %642 : vector<16x16xf32>
    %c9_640 = arith.constant 9 : index
    %c0_641 = arith.constant 0 : index
    %644 = vector.load %arg18[%c9_640, %c0_641] : memref<32x16xbf16, #tpu.memory_space<vmem>>, vector<16x16xbf16>
    %c2_642 = arith.constant 2 : index
    %c3_643 = arith.constant 3 : index
    %c32_644 = arith.constant 32 : index
    %c0_645 = arith.constant 0 : index
    %645 = vector.load %arg6[%c2_642, %c3_643, %c32_644, %c0_645] : memref<3x7x48x16xbf16, #tpu.memory_space<vmem>>, vector<1x1x16x16xbf16>
    %646 = vector.shape_cast %645 : vector<1x1x16x16xbf16> to vector<16x16xbf16>
    %cst_646 = arith.constant dense<0.000000e+00> : vector<16x16xf32>
    %647 = tpu.matmul %644, %646, %cst_646 {dimension_numbers = #tpu.dot_dimension_numbers<[1], [0], [0], [1], [0, 0, 1, 1], [], []>} : vector<16x16xbf16>, vector<16x16xbf16>, vector<16x16xf32> -> vector<16x16xf32>
    %648 = arith.addf %643, %647 : vector<16x16xf32>
    %c2_647 = arith.constant 2 : index
    %c3_648 = arith.constant 3 : index
    %c0_649 = arith.constant 0 : index
    %c0_650 = arith.constant 0 : index
    %649 = vector.load %arg7[%c2_647, %c3_648, %c0_649, %c0_650] : memref<3x7x1x16xf32, #tpu.memory_space<vmem>>, vector<1x1x1x16xf32>
    %650 = vector.shape_cast %649 : vector<1x1x1x16xf32> to vector<1x16xf32>
    %651 = vector.broadcast %650 : vector<1x16xf32> to vector<16x16xf32>
    %652 = arith.addf %648, %651 : vector<16x16xf32>
    %cst_651 = arith.constant dense<0.000000e+00> : vector<16xf32>
    %653 = vector.multi_reduction <add>, %652, %cst_651 [0] : vector<16x16xf32> to vector<16xf32>
    %654 = vector.shape_cast %653 : vector<16xf32> to vector<1x16xf32>
    %cst_652 = arith.constant 1.600000e+01 : f32
    %655 = vector.broadcast %cst_652 : f32 to vector<1x16xf32>
    %656 = arith.divf %654, %655 : vector<1x16xf32>
    %657 = vector.extract_strided_slice %541 {offsets = [0, 64], sizes = [16, 16], strides = [1, 1]} : vector<16x112xf32> to vector<16x16xf32>
    %658 = arith.addf %652, %657 : vector<16x16xf32>
    %659 = arith.truncf %658 : vector<16x16xf32> to vector<16x16xbf16>
    %c8_653 = arith.constant 8 : index
    %c0_654 = arith.constant 0 : index
    %660 = vector.load %arg18[%c8_653, %c0_654] : memref<32x16xbf16, #tpu.memory_space<vmem>>, vector<16x16xbf16>
    tpu.vector_store %arg18[%c8_653, %c0_654], %659 {strides = array<i32>} : memref<32x16xbf16, #tpu.memory_space<vmem>>, vector<16x16xbf16>,
    %cst_655 = arith.constant 0.000000e+00 : f32
    %661 = vector.broadcast %cst_655 : f32 to vector<16x16xf32>
    %c7_656 = arith.constant 7 : index
    %c0_657 = arith.constant 0 : index
    %662 = vector.load %arg18[%c7_656, %c0_657] : memref<32x16xbf16, #tpu.memory_space<vmem>>, vector<16x16xbf16>
    %c2_658 = arith.constant 2 : index
    %c4_659 = arith.constant 4 : index
    %c0_660 = arith.constant 0 : index
    %c0_661 = arith.constant 0 : index
    %663 = vector.load %arg6[%c2_658, %c4_659, %c0_660, %c0_661] : memref<3x7x48x16xbf16, #tpu.memory_space<vmem>>, vector<1x1x16x16xbf16>
    %664 = vector.shape_cast %663 : vector<1x1x16x16xbf16> to vector<16x16xbf16>
    %cst_662 = arith.constant dense<0.000000e+00> : vector<16x16xf32>
    %665 = tpu.matmul %662, %664, %cst_662 {dimension_numbers = #tpu.dot_dimension_numbers<[1], [0], [0], [1], [0, 0, 1, 1], [], []>} : vector<16x16xbf16>, vector<16x16xbf16>, vector<16x16xf32> -> vector<16x16xf32>
    %666 = arith.addf %661, %665 : vector<16x16xf32>
    %c8_663 = arith.constant 8 : index
    %c0_664 = arith.constant 0 : index
    %667 = vector.load %arg18[%c8_663, %c0_664] : memref<32x16xbf16, #tpu.memory_space<vmem>>, vector<16x16xbf16>
    %c2_665 = arith.constant 2 : index
    %c4_666 = arith.constant 4 : index
    %c16_667 = arith.constant 16 : index
    %c0_668 = arith.constant 0 : index
    %668 = vector.load %arg6[%c2_665, %c4_666, %c16_667, %c0_668] : memref<3x7x48x16xbf16, #tpu.memory_space<vmem>>, vector<1x1x16x16xbf16>
    %669 = vector.shape_cast %668 : vector<1x1x16x16xbf16> to vector<16x16xbf16>
    %cst_669 = arith.constant dense<0.000000e+00> : vector<16x16xf32>
    %670 = tpu.matmul %667, %669, %cst_669 {dimension_numbers = #tpu.dot_dimension_numbers<[1], [0], [0], [1], [0, 0, 1, 1], [], []>} : vector<16x16xbf16>, vector<16x16xbf16>, vector<16x16xf32> -> vector<16x16xf32>
    %671 = arith.addf %666, %670 : vector<16x16xf32>
    %c9_670 = arith.constant 9 : index
    %c0_671 = arith.constant 0 : index
    %672 = vector.load %arg18[%c9_670, %c0_671] : memref<32x16xbf16, #tpu.memory_space<vmem>>, vector<16x16xbf16>
    %c2_672 = arith.constant 2 : index
    %c4_673 = arith.constant 4 : index
    %c32_674 = arith.constant 32 : index
    %c0_675 = arith.constant 0 : index
    %673 = vector.load %arg6[%c2_672, %c4_673, %c32_674, %c0_675] : memref<3x7x48x16xbf16, #tpu.memory_space<vmem>>, vector<1x1x16x16xbf16>
    %674 = vector.shape_cast %673 : vector<1x1x16x16xbf16> to vector<16x16xbf16>
    %cst_676 = arith.constant dense<0.000000e+00> : vector<16x16xf32>
    %675 = tpu.matmul %672, %674, %cst_676 {dimension_numbers = #tpu.dot_dimension_numbers<[1], [0], [0], [1], [0, 0, 1, 1], [], []>} : vector<16x16xbf16>, vector<16x16xbf16>, vector<16x16xf32> -> vector<16x16xf32>
    %676 = arith.addf %671, %675 : vector<16x16xf32>
    %c2_677 = arith.constant 2 : index
    %c4_678 = arith.constant 4 : index
    %c0_679 = arith.constant 0 : index
    %c0_680 = arith.constant 0 : index
    %677 = vector.load %arg7[%c2_677, %c4_678, %c0_679, %c0_680] : memref<3x7x1x16xf32, #tpu.memory_space<vmem>>, vector<1x1x1x16xf32>
    %678 = vector.shape_cast %677 : vector<1x1x1x16xf32> to vector<1x16xf32>
    %679 = vector.broadcast %678 : vector<1x16xf32> to vector<16x16xf32>
    %680 = arith.addf %676, %679 : vector<16x16xf32>
    %cst_681 = arith.constant dense<0.000000e+00> : vector<16xf32>
    %681 = vector.multi_reduction <add>, %680, %cst_681 [0] : vector<16x16xf32> to vector<16xf32>
    %682 = vector.shape_cast %681 : vector<16xf32> to vector<1x16xf32>
    %cst_682 = arith.constant 1.600000e+01 : f32
    %683 = vector.broadcast %cst_682 : f32 to vector<1x16xf32>
    %684 = arith.divf %682, %683 : vector<1x16xf32>
    %685 = vector.extract_strided_slice %541 {offsets = [0, 80], sizes = [16, 16], strides = [1, 1]} : vector<16x112xf32> to vector<16x16xf32>
    %686 = arith.addf %680, %685 : vector<16x16xf32>
    %687 = arith.truncf %686 : vector<16x16xf32> to vector<16x16xbf16>
    %c8_683 = arith.constant 8 : index
    %c0_684 = arith.constant 0 : index
    %688 = vector.load %arg18[%c8_683, %c0_684] : memref<32x16xbf16, #tpu.memory_space<vmem>>, vector<16x16xbf16>
    tpu.vector_store %arg18[%c8_683, %c0_684], %687 {strides = array<i32>} : memref<32x16xbf16, #tpu.memory_space<vmem>>, vector<16x16xbf16>,
    %cst_685 = arith.constant 0.000000e+00 : f32
    %689 = vector.broadcast %cst_685 : f32 to vector<16x16xf32>
    %c7_686 = arith.constant 7 : index
    %c0_687 = arith.constant 0 : index
    %690 = vector.load %arg18[%c7_686, %c0_687] : memref<32x16xbf16, #tpu.memory_space<vmem>>, vector<16x16xbf16>
    %c2_688 = arith.constant 2 : index
    %c5_689 = arith.constant 5 : index
    %c0_690 = arith.constant 0 : index
    %c0_691 = arith.constant 0 : index
    %691 = vector.load %arg6[%c2_688, %c5_689, %c0_690, %c0_691] : memref<3x7x48x16xbf16, #tpu.memory_space<vmem>>, vector<1x1x16x16xbf16>
    %692 = vector.shape_cast %691 : vector<1x1x16x16xbf16> to vector<16x16xbf16>
    %cst_692 = arith.constant dense<0.000000e+00> : vector<16x16xf32>
    %693 = tpu.matmul %690, %692, %cst_692 {dimension_numbers = #tpu.dot_dimension_numbers<[1], [0], [0], [1], [0, 0, 1, 1], [], []>} : vector<16x16xbf16>, vector<16x16xbf16>, vector<16x16xf32> -> vector<16x16xf32>
    %694 = arith.addf %689, %693 : vector<16x16xf32>
    %c8_693 = arith.constant 8 : index
    %c0_694 = arith.constant 0 : index
    %695 = vector.load %arg18[%c8_693, %c0_694] : memref<32x16xbf16, #tpu.memory_space<vmem>>, vector<16x16xbf16>
    %c2_695 = arith.constant 2 : index
    %c5_696 = arith.constant 5 : index
    %c16_697 = arith.constant 16 : index
    %c0_698 = arith.constant 0 : index
    %696 = vector.load %arg6[%c2_695, %c5_696, %c16_697, %c0_698] : memref<3x7x48x16xbf16, #tpu.memory_space<vmem>>, vector<1x1x16x16xbf16>
    %697 = vector.shape_cast %696 : vector<1x1x16x16xbf16> to vector<16x16xbf16>
    %cst_699 = arith.constant dense<0.000000e+00> : vector<16x16xf32>
    %698 = tpu.matmul %695, %697, %cst_699 {dimension_numbers = #tpu.dot_dimension_numbers<[1], [0], [0], [1], [0, 0, 1, 1], [], []>} : vector<16x16xbf16>, vector<16x16xbf16>, vector<16x16xf32> -> vector<16x16xf32>
    %699 = arith.addf %694, %698 : vector<16x16xf32>
    %c9_700 = arith.constant 9 : index
    %c0_701 = arith.constant 0 : index
    %700 = vector.load %arg18[%c9_700, %c0_701] : memref<32x16xbf16, #tpu.memory_space<vmem>>, vector<16x16xbf16>
    %c2_702 = arith.constant 2 : index
    %c5_703 = arith.constant 5 : index
    %c32_704 = arith.constant 32 : index
    %c0_705 = arith.constant 0 : index
    %701 = vector.load %arg6[%c2_702, %c5_703, %c32_704, %c0_705] : memref<3x7x48x16xbf16, #tpu.memory_space<vmem>>, vector<1x1x16x16xbf16>
    %702 = vector.shape_cast %701 : vector<1x1x16x16xbf16> to vector<16x16xbf16>
    %cst_706 = arith.constant dense<0.000000e+00> : vector<16x16xf32>
    %703 = tpu.matmul %700, %702, %cst_706 {dimension_numbers = #tpu.dot_dimension_numbers<[1], [0], [0], [1], [0, 0, 1, 1], [], []>} : vector<16x16xbf16>, vector<16x16xbf16>, vector<16x16xf32> -> vector<16x16xf32>
    %704 = arith.addf %699, %703 : vector<16x16xf32>
    %c2_707 = arith.constant 2 : index
    %c5_708 = arith.constant 5 : index
    %c0_709 = arith.constant 0 : index
    %c0_710 = arith.constant 0 : index
    %705 = vector.load %arg7[%c2_707, %c5_708, %c0_709, %c0_710] : memref<3x7x1x16xf32, #tpu.memory_space<vmem>>, vector<1x1x1x16xf32>
    %706 = vector.shape_cast %705 : vector<1x1x1x16xf32> to vector<1x16xf32>
    %707 = vector.broadcast %706 : vector<1x16xf32> to vector<16x16xf32>
    %708 = arith.addf %704, %707 : vector<16x16xf32>
    %cst_711 = arith.constant dense<0.000000e+00> : vector<16xf32>
    %709 = vector.multi_reduction <add>, %708, %cst_711 [0] : vector<16x16xf32> to vector<16xf32>
    %710 = vector.shape_cast %709 : vector<16xf32> to vector<1x16xf32>
    %cst_712 = arith.constant 1.600000e+01 : f32
    %711 = vector.broadcast %cst_712 : f32 to vector<1x16xf32>
    %712 = arith.divf %710, %711 : vector<1x16xf32>
    %713 = vector.extract_strided_slice %541 {offsets = [0, 96], sizes = [16, 16], strides = [1, 1]} : vector<16x112xf32> to vector<16x16xf32>
    %714 = arith.addf %708, %713 : vector<16x16xf32>
    %715 = arith.truncf %714 : vector<16x16xf32> to vector<16x16xbf16>
    %c8_713 = arith.constant 8 : index
    %c0_714 = arith.constant 0 : index
    %716 = vector.load %arg18[%c8_713, %c0_714] : memref<32x16xbf16, #tpu.memory_space<vmem>>, vector<16x16xbf16>
    tpu.vector_store %arg18[%c8_713, %c0_714], %715 {strides = array<i32>} : memref<32x16xbf16, #tpu.memory_space<vmem>>, vector<16x16xbf16>,
    %cst_715 = arith.constant 0.000000e+00 : f32
    %717 = vector.broadcast %cst_715 : f32 to vector<16x16xf32>
    %c7_716 = arith.constant 7 : index
    %c0_717 = arith.constant 0 : index
    %718 = vector.load %arg18[%c7_716, %c0_717] : memref<32x16xbf16, #tpu.memory_space<vmem>>, vector<16x16xbf16>
    %c2_718 = arith.constant 2 : index
    %c6_719 = arith.constant 6 : index
    %c0_720 = arith.constant 0 : index
    %c0_721 = arith.constant 0 : index
    %719 = vector.load %arg6[%c2_718, %c6_719, %c0_720, %c0_721] : memref<3x7x48x16xbf16, #tpu.memory_space<vmem>>, vector<1x1x16x16xbf16>
    %720 = vector.shape_cast %719 : vector<1x1x16x16xbf16> to vector<16x16xbf16>
    %cst_722 = arith.constant dense<0.000000e+00> : vector<16x16xf32>
    %721 = tpu.matmul %718, %720, %cst_722 {dimension_numbers = #tpu.dot_dimension_numbers<[1], [0], [0], [1], [0, 0, 1, 1], [], []>} : vector<16x16xbf16>, vector<16x16xbf16>, vector<16x16xf32> -> vector<16x16xf32>
    %722 = arith.addf %717, %721 : vector<16x16xf32>
    %c8_723 = arith.constant 8 : index
    %c0_724 = arith.constant 0 : index
    %723 = vector.load %arg18[%c8_723, %c0_724] : memref<32x16xbf16, #tpu.memory_space<vmem>>, vector<16x16xbf16>
    %c2_725 = arith.constant 2 : index
    %c6_726 = arith.constant 6 : index
    %c16_727 = arith.constant 16 : index
    %c0_728 = arith.constant 0 : index
    %724 = vector.load %arg6[%c2_725, %c6_726, %c16_727, %c0_728] : memref<3x7x48x16xbf16, #tpu.memory_space<vmem>>, vector<1x1x16x16xbf16>
    %725 = vector.shape_cast %724 : vector<1x1x16x16xbf16> to vector<16x16xbf16>
    %cst_729 = arith.constant dense<0.000000e+00> : vector<16x16xf32>
    %726 = tpu.matmul %723, %725, %cst_729 {dimension_numbers = #tpu.dot_dimension_numbers<[1], [0], [0], [1], [0, 0, 1, 1], [], []>} : vector<16x16xbf16>, vector<16x16xbf16>, vector<16x16xf32> -> vector<16x16xf32>
    %727 = arith.addf %722, %726 : vector<16x16xf32>
    %c9_730 = arith.constant 9 : index
    %c0_731 = arith.constant 0 : index
    %728 = vector.load %arg18[%c9_730, %c0_731] : memref<32x16xbf16, #tpu.memory_space<vmem>>, vector<16x16xbf16>
    %c2_732 = arith.constant 2 : index
    %c6_733 = arith.constant 6 : index
    %c32_734 = arith.constant 32 : index
    %c0_735 = arith.constant 0 : index
    %729 = vector.load %arg6[%c2_732, %c6_733, %c32_734, %c0_735] : memref<3x7x48x16xbf16, #tpu.memory_space<vmem>>, vector<1x1x16x16xbf16>
    %730 = vector.shape_cast %729 : vector<1x1x16x16xbf16> to vector<16x16xbf16>
    %cst_736 = arith.constant dense<0.000000e+00> : vector<16x16xf32>
    %731 = tpu.matmul %728, %730, %cst_736 {dimension_numbers = #tpu.dot_dimension_numbers<[1], [0], [0], [1], [0, 0, 1, 1], [], []>} : vector<16x16xbf16>, vector<16x16xbf16>, vector<16x16xf32> -> vector<16x16xf32>
    %732 = arith.addf %727, %731 : vector<16x16xf32>
    %c2_737 = arith.constant 2 : index
    %c6_738 = arith.constant 6 : index
    %c0_739 = arith.constant 0 : index
    %c0_740 = arith.constant 0 : index
    %733 = vector.load %arg7[%c2_737, %c6_738, %c0_739, %c0_740] : memref<3x7x1x16xf32, #tpu.memory_space<vmem>>, vector<1x1x1x16xf32>
    %734 = vector.shape_cast %733 : vector<1x1x1x16xf32> to vector<1x16xf32>
    %735 = vector.broadcast %734 : vector<1x16xf32> to vector<16x16xf32>
    %736 = arith.addf %732, %735 : vector<16x16xf32>
    %cst_741 = arith.constant dense<0.000000e+00> : vector<16xf32>
    %737 = vector.multi_reduction <add>, %736, %cst_741 [0] : vector<16x16xf32> to vector<16xf32>
    %738 = vector.shape_cast %737 : vector<16xf32> to vector<1x16xf32>
    %cst_742 = arith.constant 1.600000e+01 : f32
    %739 = vector.broadcast %cst_742 : f32 to vector<1x16xf32>
    %740 = arith.divf %738, %739 : vector<1x16xf32>
    %741 = tpu.concatenate %545, %572, %600, %628, %656, %684, %712, %740 in 1 : vector<1x16xf32>, vector<1x16xf32>, vector<1x16xf32>, vector<1x16xf32>, vector<1x16xf32>, vector<1x16xf32>, vector<1x16xf32>, vector<1x16xf32> -> vector<1x128xf32>
    %742 = arith.truncf %741 : vector<1x128xf32> to vector<1x128xbf16>
    %c2_743 = arith.constant 2 : index
    %c0_744 = arith.constant 0 : index
    %c0_745 = arith.constant 0 : index
    %743 = vector.load %arg8[%c2_743, %c0_744, %c0_745] : memref<3x128x32xbf16, #tpu.memory_space<vmem>>, vector<1x128x32xbf16>
    %744 = vector.shape_cast %743 : vector<1x128x32xbf16> to vector<128x32xbf16>
    %cst_746 = arith.constant dense<0.000000e+00> : vector<1x32xf32>
    %745 = tpu.matmul %742, %744, %cst_746 {dimension_numbers = #tpu.dot_dimension_numbers<[1], [0], [0], [1], [0, 0, 1, 1], [], []>} : vector<1x128xbf16>, vector<128x32xbf16>, vector<1x32xf32> -> vector<1x32xf32>
    %c2_747 = arith.constant 2 : index
    %c0_748 = arith.constant 0 : index
    %c0_749 = arith.constant 0 : index
    %746 = vector.load %arg9[%c2_747, %c0_748, %c0_749] : memref<3x1x32xf32, #tpu.memory_space<vmem>>, vector<1x1x32xf32>
    %747 = vector.shape_cast %746 : vector<1x1x32xf32> to vector<1x32xf32>
    %748 = arith.addf %745, %747 : vector<1x32xf32>
    %cst_750 = arith.constant 0.000000e+00 : f32
    %749 = vector.broadcast %cst_750 : f32 to vector<1x32xf32>
    %750 = arith.maximumf %748, %749 : vector<1x32xf32>
    %751 = arith.truncf %750 : vector<1x32xf32> to vector<1x32xbf16>
    %c2_751 = arith.constant 2 : index
    %c0_752 = arith.constant 0 : index
    %c0_753 = arith.constant 0 : index
    %752 = vector.load %arg10[%c2_751, %c0_752, %c0_753] : memref<3x32x128xbf16, #tpu.memory_space<vmem>>, vector<1x32x128xbf16>
    %753 = vector.shape_cast %752 : vector<1x32x128xbf16> to vector<32x128xbf16>
    %cst_754 = arith.constant dense<0.000000e+00> : vector<1x128xf32>
    %754 = tpu.matmul %751, %753, %cst_754 {dimension_numbers = #tpu.dot_dimension_numbers<[1], [0], [0], [1], [0, 0, 1, 1], [], []>} : vector<1x32xbf16>, vector<32x128xbf16>, vector<1x128xf32> -> vector<1x128xf32>
    %c2_755 = arith.constant 2 : index
    %c0_756 = arith.constant 0 : index
    %c0_757 = arith.constant 0 : index
    %755 = vector.load %arg11[%c2_755, %c0_756, %c0_757] : memref<3x1x128xf32, #tpu.memory_space<vmem>>, vector<1x1x128xf32>
    %756 = vector.shape_cast %755 : vector<1x1x128xf32> to vector<1x128xf32>
    %757 = arith.addf %754, %756 : vector<1x128xf32>
    %758 = arith.negf %757 : vector<1x128xf32>
    %759 = math.exp %758 : vector<1x128xf32>
    %cst_758 = arith.constant 1.000000e+00 : f32
    %760 = vector.broadcast %cst_758 : f32 to vector<1x128xf32>
    %761 = arith.addf %760, %759 : vector<1x128xf32>
    %762 = arith.divf %760, %761 : vector<1x128xf32>
    %c2_759 = arith.constant 2 : index
    %c0_760 = arith.constant 0 : index
    %c0_761 = arith.constant 0 : index
    %763 = vector.load %arg12[%c2_759, %c0_760, %c0_761] : memref<3x1x128xf32, #tpu.memory_space<vmem>>, vector<1x1x128xf32>
    %764 = vector.shape_cast %763 : vector<1x1x128xf32> to vector<1x128xf32>
    %765 = arith.mulf %762, %764 : vector<1x128xf32>
    %c2_762 = arith.constant 2 : index
    %c0_763 = arith.constant 0 : index
    %c0_764 = arith.constant 0 : index
    %766 = vector.load %arg13[%c2_762, %c0_763, %c0_764] : memref<3x1x128xf32, #tpu.memory_space<vmem>>, vector<1x1x128xf32>
    %767 = vector.shape_cast %766 : vector<1x1x128xf32> to vector<1x128xf32>
    %768 = arith.mulf %741, %765 : vector<1x128xf32>
    %769 = arith.addf %768, %767 : vector<1x128xf32>
    %770 = tpu.concatenate %280, %528, %769 in 1 : vector<1x128xf32>, vector<1x128xf32>, vector<1x128xf32> -> vector<1x384xf32>
    %771 = arith.truncf %770 : vector<1x384xf32> to vector<1x384xbf16>
    %c0_765 = arith.constant 0 : index
    %c0_766 = arith.constant 0 : index
    %772 = vector.load %arg14[%c0_765, %c0_766] : memref<384x32xbf16, #tpu.memory_space<vmem>>, vector<384x32xbf16>
    %cst_767 = arith.constant dense<0.000000e+00> : vector<1x32xf32>
    %773 = tpu.matmul %771, %772, %cst_767 {dimension_numbers = #tpu.dot_dimension_numbers<[1], [0], [0], [1], [0, 0, 1, 1], [], []>} : vector<1x384xbf16>, vector<384x32xbf16>, vector<1x32xf32> -> vector<1x32xf32>
    %c0_768 = arith.constant 0 : index
    %c0_769 = arith.constant 0 : index
    %774 = vector.load %arg15[%c0_768, %c0_769] : memref<1x32xf32, #tpu.memory_space<vmem>>, vector<1x32xf32>
    %775 = arith.addf %773, %774 : vector<1x32xf32>
    %776 = arith.mulf %775, %775 : vector<1x32xf32>
    %777 = vector.shape_cast %776 : vector<1x32xf32> to vector<1x1x32xf32>
    %cst_770 = arith.constant dense<0.000000e+00> : vector<1xf32>
    %778 = vector.multi_reduction <add>, %777, %cst_770 [1, 2] : vector<1x1x32xf32> to vector<1xf32>
    %779 = vector.shape_cast %778 : vector<1xf32> to vector<1x1x1xf32>
    %780 = vector.extract %779[0, 0, 0] : f32 from vector<1x1x1xf32>
    %781 = math.sqrt %780 : f32
    %cst_771 = arith.constant 9.99999996E-13 : f32
    %782 = arith.maximumf %781, %cst_771 : f32
    %783 = vector.broadcast %782 : f32 to vector<1x32xf32>
    %784 = arith.divf %775, %783 : vector<1x32xf32>
    %c0_772 = arith.constant 0 : index
    %c0_773 = arith.constant 0 : index
    %c0_774 = arith.constant 0 : index
    %785 = vector.load %arg16[%c0_772, %c0_773, %c0_774] : memref<1x1x32xf32, #tpu.memory_space<vmem>>, vector<1x1x32xf32>
    %786 = vector.shape_cast %785 : vector<1x1x32xf32> to vector<1x32xf32>
    %787 = vector.shape_cast %784 : vector<1x32xf32> to vector<1x1x32xf32>
    tpu.vector_store %arg16[%c0_772, %c0_773, %c0_774], %787 {strides = array<i32>} : memref<1x1x32xf32, #tpu.memory_space<vmem>>, vector<1x1x32xf32>,
    return
  }
  func.func @transform_0(%arg0: i32) -> (i32, i32, i32) {
    %c0_i32 = arith.constant 0 : i32
    %c0_i32_0 = arith.constant 0 : i32
    %c0_i32_1 = arith.constant 0 : i32
    return %arg0, %c0_i32, %c0_i32_0 : i32, i32, i32
  }
  func.func @transform_1(%arg0: i32) -> (i32, i32) {
    %c0_i32 = arith.constant 0 : i32
    %c0_i32_0 = arith.constant 0 : i32
    %c0_i32_1 = arith.constant 0 : i32
    return %c0_i32, %c0_i32_0 : i32, i32
  }
  func.func @transform_2(%arg0: i32) -> (i32, i32) {
    %c0_i32 = arith.constant 0 : i32
    %c0_i32_0 = arith.constant 0 : i32
    %c0_i32_1 = arith.constant 0 : i32
    return %c0_i32, %c0_i32_0 : i32, i32
  }
  func.func @transform_3(%arg0: i32) -> (i32, i32) {
    %c0_i32 = arith.constant 0 : i32
    %c0_i32_0 = arith.constant 0 : i32
    %c0_i32_1 = arith.constant 0 : i32
    return %c0_i32, %c0_i32_0 : i32, i32
  }
  func.func @transform_4(%arg0: i32) -> (i32, i32) {
    %c0_i32 = arith.constant 0 : i32
    %c0_i32_0 = arith.constant 0 : i32
    %c0_i32_1 = arith.constant 0 : i32
    return %c0_i32, %c0_i32_0 : i32, i32
  }
  func.func @transform_5(%arg0: i32) -> (i32, i32, i32, i32) {
    %c0_i32 = arith.constant 0 : i32
    %c0_i32_0 = arith.constant 0 : i32
    %c0_i32_1 = arith.constant 0 : i32
    %c0_i32_2 = arith.constant 0 : i32
    %c0_i32_3 = arith.constant 0 : i32
    return %c0_i32, %c0_i32_0, %c0_i32_1, %c0_i32_2 : i32, i32, i32, i32
  }
  func.func @transform_6(%arg0: i32) -> (i32, i32, i32, i32) {
    %c0_i32 = arith.constant 0 : i32
    %c0_i32_0 = arith.constant 0 : i32
    %c0_i32_1 = arith.constant 0 : i32
    %c0_i32_2 = arith.constant 0 : i32
    %c0_i32_3 = arith.constant 0 : i32
    return %c0_i32, %c0_i32_0, %c0_i32_1, %c0_i32_2 : i32, i32, i32, i32
  }
  func.func @transform_7(%arg0: i32) -> (i32, i32, i32) {
    %c0_i32 = arith.constant 0 : i32
    %c0_i32_0 = arith.constant 0 : i32
    %c0_i32_1 = arith.constant 0 : i32
    %c0_i32_2 = arith.constant 0 : i32
    return %c0_i32, %c0_i32_0, %c0_i32_1 : i32, i32, i32
  }
  func.func @transform_8(%arg0: i32) -> (i32, i32, i32) {
    %c0_i32 = arith.constant 0 : i32
    %c0_i32_0 = arith.constant 0 : i32
    %c0_i32_1 = arith.constant 0 : i32
    %c0_i32_2 = arith.constant 0 : i32
    return %c0_i32, %c0_i32_0, %c0_i32_1 : i32, i32, i32
  }
  func.func @transform_9(%arg0: i32) -> (i32, i32, i32) {
    %c0_i32 = arith.constant 0 : i32
    %c0_i32_0 = arith.constant 0 : i32
    %c0_i32_1 = arith.constant 0 : i32
    %c0_i32_2 = arith.constant 0 : i32
    return %c0_i32, %c0_i32_0, %c0_i32_1 : i32, i32, i32
  }
  func.func @transform_10(%arg0: i32) -> (i32, i32, i32) {
    %c0_i32 = arith.constant 0 : i32
    %c0_i32_0 = arith.constant 0 : i32
    %c0_i32_1 = arith.constant 0 : i32
    %c0_i32_2 = arith.constant 0 : i32
    return %c0_i32, %c0_i32_0, %c0_i32_1 : i32, i32, i32
  }
  func.func @transform_11(%arg0: i32) -> (i32, i32, i32) {
    %c0_i32 = arith.constant 0 : i32
    %c0_i32_0 = arith.constant 0 : i32
    %c0_i32_1 = arith.constant 0 : i32
    %c0_i32_2 = arith.constant 0 : i32
    return %c0_i32, %c0_i32_0, %c0_i32_1 : i32, i32, i32
  }
  func.func @transform_12(%arg0: i32) -> (i32, i32, i32) {
    %c0_i32 = arith.constant 0 : i32
    %c0_i32_0 = arith.constant 0 : i32
    %c0_i32_1 = arith.constant 0 : i32
    %c0_i32_2 = arith.constant 0 : i32
    return %c0_i32, %c0_i32_0, %c0_i32_1 : i32, i32, i32
  }
  func.func @transform_13(%arg0: i32) -> (i32, i32) {
    %c0_i32 = arith.constant 0 : i32
    %c0_i32_0 = arith.constant 0 : i32
    %c0_i32_1 = arith.constant 0 : i32
    return %c0_i32, %c0_i32_0 : i32, i32
  }
  func.func @transform_14(%arg0: i32) -> (i32, i32) {
    %c0_i32 = arith.constant 0 : i32
    %c0_i32_0 = arith.constant 0 : i32
    %c0_i32_1 = arith.constant 0 : i32
    return %c0_i32, %c0_i32_0 : i32, i32
  }
  func.func @transform_15(%arg0: i32) -> (i32, i32, i32) {
    %c0_i32 = arith.constant 0 : i32
    %c0_i32_0 = arith.constant 0 : i32
    %c0_i32_1 = arith.constant 0 : i32
    return %arg0, %c0_i32, %c0_i32_0 : i32, i32, i32
  }
}

</mosaic_0001>

<bundles_post_ra>
// kernel: tpu_custom_call.1
= control target key start
LH: loop header
LB: loop body
LE: loop exit
PB: predicated region body
PF: predicated region fallthrough
CT: control target
= control target key end

     0   :  { %s7484_s0 = inlined_call_operand.vmem [shape: f32[2,16,16], index: 0, kind: input, shape index: {}]   ;;  %s7485_s1 = inlined_call_operand.vmem [shape: bf16[80,128], index: 1, kind: input, shape index: {}]   ;;  %s7486_s2 = inlined_call_operand.vmem [shape: f32[1,128], index: 2, kind: input, shape index: {}]   ;;  %s7487_s3 = inlined_call_operand.vmem [shape: f32[1,128], index: 3, kind: input, shape index: {}]   ;;  %s7488_s4 = inlined_call_operand.vmem [shape: f32[1,128], index: 4, kind: input, shape index: {}]   ;;  %s7489_s5 = inlined_call_operand.vmem [shape: bf16[3,7,48,16], index: 5, kind: input, shape index: {}]   ;;  %s7490_s6 = inlined_call_operand.vmem [shape: f32[3,7,1,16], index: 6, kind: input, shape index: {}]   ;;  %s7491_s7 = inlined_call_operand.vmem [shape: bf16[3,128,32], index: 7, kind: input, shape index: {}]   ;;  %s7492_s8 = inlined_call_operand.vmem [shape: f32[3,1,32], index: 8, kind: input, shape index: {}]   ;;  %s7493_s9 = inlined_call_operand.vmem [shape: bf16[3,32,128], index: 9, kind: input, shape index: {}]   ;;  %s7494_s10 = inlined_call_operand.vmem [shape: f32[3,1,128], index: 10, kind: input, shape index: {}]   ;;  %s7495_s11 = inlined_call_operand.vmem [shape: f32[3,1,128], index: 11, kind: input, shape index: {}]   ;;  %s7496_s12 = inlined_call_operand.vmem [shape: f32[3,1,128], index: 12, kind: input, shape index: {}]   ;;  %s7497_s13 = inlined_call_operand.vmem [shape: bf16[384,32], index: 13, kind: input, shape index: {}]   ;;  %s7498_s14 = inlined_call_operand.vmem [shape: f32[1,32], index: 14, kind: input, shape index: {}]   ;;  %s7499_s15 = inlined_call_operand.hbm [shape: f32[2,1,32], index: 15, kind: output, shape index: {}]  }
   0x1   :  { %7524 = sst [smem:[#allocation12_spill]] %s7484_s0 }
   0x2   :  { %7525 = sst [smem:[#allocation13_spill]] %s7485_s1 }
   0x3   :  { %7526 = sst [smem:[#allocation14_spill]] %s7486_s2 }
   0x4   :  { %7527 = sst [smem:[#allocation15_spill]] %s7487_s3 }
   0x5   :  { %7528 = sst [smem:[#allocation16_spill]] %s7488_s4 }
   0x6   :  { %20 = vsyncpa [#allocation6], 0 }
   0x7   :  { %22 = vsyncpa [#allocation6 + $0x1], 0  ;;  %s6391_s18 = smov 0   ;;  %s6393_s19 = smov 0  }
   0x8   :  { %s6395_s20 = smov 0   ;;  %s6397_s21 = smov 0  }
   0x9 LB: > { %7529 = sst [smem:[#allocation8_spill]] %s6295_s20  ;;  %s6412_s22 = sadd.s32 4294967295, %s6299_s21   ;;  %s6299_s21 = sphi %s6397_s21, %s7558_s21   ;;  %s6295_s20 = sphi %s6395_s20, %s7560_s20   ;;  %s6291_s19 = sphi %s6393_s19, %s7562_s19   ;;  %s6287_s18 = sphi %s6391_s18, %s7561_s18  }
   0xa   : > { %s5146_s23 = sadd.s32 4294967294, %s6299_s21   ;;  %s6416_s24 = sadd.s32 1, %s6299_s21  }
   0xb   : > { %7530 = sst [smem:[#allocation9_spill]] %s6416_s24  ;;  %s355_s25 = sadd.s32 1, %s6295_s20 }
   0xc   : > { %s352_s26 = ssub.s32 %s6299_s21, %s6416_s24  ;;  %p365_p0 = scmp.ne.s32.totalorder %s6295_s20, %s6291_s19 }
   0xd   : > { %p353_p1 = scmp.eq.s32.totalorder %s352_s26, 0  ;;  %p366_p2 = scmp.eq.s32.totalorder %s6412_s22, 1 }
   0xe   : > { %p371_p3 = scmp.ne.s32.totalorder %s6291_s19, %s6287_s18  ;;  %p372_p4 = scmp.eq.s32.totalorder %s5146_s23, 1 }
   0xf   : > { %s6427_s27 = scalar_select %p353_p1, %s6295_s20, %s355_s25  }
  0x10   : > { %p6429_p5 = por %p366_p2, %p365_p0  ;;  %p6433_p6 = por %p372_p4, %p371_p3 }
  0x11   : > { %7531 = sst [smem:[#allocation10_spill]] %s6427_s27  ;;  %p5149_p7 = scmp.ge.s32.totalorder %s6299_s21, 1 }
  0x12   : > { %s7533_s29 = scalar_select %p6433_p6, 1, 0 }
  0x13   : > { %p440_p8 = scmp.lt.s32.totalorder %s6299_s21, 3 }
  0x14   : > { %7534 = sst [smem:[#allocation11_spill]] %s7533_s29 }
  0x15   : > { %p441_p9 = pnand %p5149_p7, %p440_p8 }
  0x16   : > { %s7535_s1 = sld [smem:[#allocation13_spill]] (!%p441_p9)  ;;  %p487_p10 = scmp.lt.s32.totalorder (!%p441_p9), %s6412_s22, 1 }
  0x17   : > { %444 = sbr.rel (%p441_p9) target bundleno = 5699 (0x1643), region = 80  ;;  %s7536_s0 = sld [smem:[#allocation12_spill]] (!%p441_p9) }
  0x18   : > { %s7537_s2 = sld [smem:[#allocation14_spill]] (!%p441_p9)  ;;  %s7505_s26 = smov (!%p441_p9), 80  }
  0x19   : > { %s7538_s3 = sld [smem:[#allocation15_spill]] (!%p441_p9)  ;;  %s7501_s27 = smov (!%p441_p9), 112  }
  0x1a   : > { %s7539_s4 = sld [smem:[#allocation16_spill]] (!%p441_p9)  ;;  %s7507_s16 = smov (!%p441_p9), 64  }
  0x1b   : > { %s7509_s17 = smov (!%p441_p9), 32   ;;  %s485_s24 = sand.u32 (!%p441_p9), 1, %s6291_s19  }
  0x1c   : > { %v5991_v0 = vld [vmem:[%s7535_s1 + $0x10] sm:$0xff]  ;;  %vm493_vm0 = vcmask 125952   ;;  %v5990_v1 = vld [vmem:[%s7535_s1 + $0x8] sm:$0xff]  ;;  %v6301_v2 = vmov 0   ;;  %v5989_v3 = vld [vmem:[%s7535_s1] sm:$0xff]  ;;  %s488_s30 = scalar_select %p487_p10, %s6412_s22, 1 }
  0x1d   : > { %494 = vst.msk [vmem:[#allocation2] sm:$0xf] %vm493_vm0, %v6301_v2  ;;  %v5992_v4 = vld [vmem:[%s7535_s1 + $0x18] sm:$0xff]  ;;  %609 = vmatpush.bf16.msra.mxu2 %v5991_v0  ;;  %553 = vmatpush.bf16.msra.mxu0 %v5990_v1  ;;  %v5993_v5 = vld [vmem:[%s7535_s1 + $0x20] sm:$0xff]  ;;  %vm542_vm1 = vcmask 130048   ;;  %vm563_vm2 = vcmask 1044480   ;;  %s5087_s29 = scalar_lea.hbm %s7499_s15, %s6412_s22 }
  0x1e   : > { %495 = vst.msk [vmem:[#allocation2 + $0xc] sm:$0xf] %vm493_vm0, %v6301_v2  ;;  %583 = vmatpush.bf16.msra.mxu1 %v5989_v3  ;;  %660 = vmatpush.bf16.msra.mxu3 %v5992_v4  ;;  %s5988_s23 = sshll.u32 %s488_s30, 4  ;;  %vm518_vm3 = vsmask.f32 4352  ;;  %vm675_vm5 = vcmask 1046528  }
  0x1f   : > { %724 = vst.msk [vmem:[#allocation3] sm:$0xf] %vm493_vm0, %v6301_v2  ;;  %s491_s20 = scalar_lea.vmem %s7536_s0, %s5988_s23  ;;  %vm631_vm4 = vsmask.f32 7424  ;;  %v6185_v59 = vld [vmem:[%s7537_s2] ss:$0 sm:$0xff] }
  0x20   : > { %725 = vst.msk [vmem:[#allocation3 + $0xc] sm:$0xf] %vm493_vm0, %v6301_v2  ;;  %v496_v6 = vld [vmem:[%s491_s20] sm:$0xff]  ;;  %v497_v7 = vld [vmem:[%s491_s20 + $0x8] sm:$0xff]  ;;  %s7503_s20 = smov 96   ;;  %s7511_s30 = smov 48  }
  0x21   : > { %695 = vmatpush.bf16.msrb.mxu0 %v5993_v5  ;;  %v498_v8 = vpack.c.bf16 %v496_v6, %v496_v6  ;;  %v499_v9 = vpack.c.bf16 %v497_v7, %v497_v7  ;;  %v6186_v1 = vld [vmem:[%s7538_s3] ss:$0 sm:$0xff]  ;;  %s7513_s23 = smov 16   ;;  %s7541_s0 = smov 32   ;;  %vm1071_vm7 = vcmask 261248   ;;  %vm1953_vm8 = vcmask 261120  }
  0x22   : > { %v6187_v5 = vld [vmem:[%s7539_s4] ss:$0 sm:$0xff]  ;;  %s7542_s1 = smov 48   ;;  %s7543_s2 = smov 64   ;;  %vm1955_vm9 = vcmask 392192   ;;  %vm1957_vm10 = vcmask 523264  }
  0x23   : > { %500 = vst.msk [vmem:[#allocation2 + $0x4] sm:$0xf] %vm493_vm0, %v498_v8  ;;  %s7544_s3 = smov 80   ;;  %vm1959_vm11 = vcmask 654336   ;;  %vm7523_vm12 = vcmask 785408   ;;  %vm1241_vm13 = vcmask 392448  }
  0x24   : > { %501 = vst.msk [vmem:[#allocation2 + $0x8] sm:$0xf] %vm493_vm0, %v499_v9  ;;  %v6282_v11 = vld [vmem:[#allocation2] sm:$0x8]  ;;  %vm7522_vm14 = vcmask 916480   ;;  %vm7521_vm15 = vcmask 523648  }
  0x25   : > { %v620_v10 = vld [vmem:[#allocation2 + $0xc] sm:$0x1] }
  0x26   : > { %v628_v12 = vunpack.c.l.b16 %v620_v10 }
  0x28   : > { %v630_v18 = vpack.c.b16 %v628_v12, %v628_v12 }
  0x2a   : > { %v6284_v14 = vld [vmem:[#allocation2] sm:$0xf0]   ;;  %v640_v24 = vshll.u32 %v630_v18, 16  ;;  %v677_v48 = vrot.slane %v630_v18, 1  ;;  %v5997_v18 = vld [vmem:[%s7489_s5 + $0x10] sm:$0xff] }
  0x2b   : > { %v503_v13 = vld [vmem:[#allocation2 + $0x4] sm:$0xff]   ;;  %v6283_v21 = vor.u32 %v6284_v14, %v6282_v11  ;;  %875 = vmatpush.bf16.msrb.mxu3 %v5997_v18 }
  0x2c   : > { %v504_v15 = vld [vmem:[#allocation2 + $0x8] sm:$0x7]  ;;  %v515_v19 = vunpack.c.h.b16 %v503_v13  ;;  %5166 = vmatmul.msk.bf16.vlgmr.msra.gmra.mxu2 %vm542_vm1, %v503_v13  ;;  %v642_v39 = vrot.slane %v640_v24, 1  ;;  %v6230_v43 = vld [vmem:[#allocation2 + $0x4] sm:$0xe] }
  0x2d   : > { %v618_v16 = vld [vmem:[#allocation2 + $0x4] sm:$0xff]   ;;  %v561_v20 = vunpack.c.l.b16 %v504_v15  ;;  %v520_v25 = vshrl.u32 %v6283_v21, 16  ;;  %v523_v26 = vshll.u32 %v6283_v21, 16  ;;  %v564_v29 = vrot.slane %v6283_v21, 3  ;;  %v836_v21 = vld [vmem:[#allocation3 + $0xc] sm:$0x1] }
  0x2e   : > { %v6229_v17 = vld [vmem:[#allocation2 + $0x4] sm:$0xf0]  ;;  %v517_v22 = vpack.c.b16 %v515_v19, %v515_v19  ;;  %v633_v31 = vshrl.u32 %v618_v16, 16  ;;  %v635_v32 = vshll.u32 %v618_v16, 16 }
  0x2f   : > { %v562_v23 = vpack.c.b16 %v561_v20, %v561_v20  ;;  %v522_v33 = vrot.slane %v520_v25, 3  ;;  %v525_v34 = vrot.slane %v523_v26, 4  ;;  %v6231_v46 = vor.u32 %v6230_v43, %v6229_v17  ;;  %v5994_v17 = vld [vmem:[%s7489_s5] sm:$0xff]  ;;  %v5995_v19 = vld [vmem:[%s7489_s5 + $0x8] sm:$0xff] }
  0x30   : > { %v528_v27 = vshrl.u32 %v517_v22, 16  ;;  %v531_v28 = vshll.u32 %v517_v22, 16  ;;  %v637_v38 = vrot.slane %v635_v32, 1  ;;  %827 = vmatpush.bf16.msrb.mxu2 %v5994_v17  ;;  %783 = vmatpush.bf16.msrb.mxu1 %v5995_v19  ;;  %v755_v22 = vld [vmem:[#allocation3] sm:$0x8] }
  0x31   : > { %v565_v30 = vrot.slane %v562_v23, 3  ;;  %v526_v40 = vor.u32 %v525_v34, %v522_v33  ;;  %v676_v47 = vrot.slane %v6231_v46, 1  ;;  %v844_v23 = vunpack.c.l.b16 %v836_v21  ;;  %v916_v17 = vld [vmem:[#allocation3] sm:$0x8] }
  0x32   : > { %v530_v35 = vrot.slane %v528_v27, 3  ;;  %v533_v36 = vrot.slane %v531_v28, 4  ;;  %v638_v42 = vor.u32 %v637_v38, %v633_v31  ;;  %v791_v26 = vunpack.c.l.b16 %v755_v22 }
  0x33   : > { %v566_v37 = vsel %vm563_vm2, %v564_v29, %v565_v30  ;;  %v678_v49 = vsel %vm675_vm5, %v676_v47, %v677_v48  ;;  %v846_v28 = vpack.c.b16 %v844_v23, %v844_v23  ;;  %vm7520_vm2 = vcmask 654848  }
  0x34   : > { %v534_v41 = vor.u32 %v533_v36, %v530_v35  ;;  %5161 = vmatmul.msk.bf16.vlgmr.msra.gmra.mxu1 %vm542_vm1, %v566_v37  ;;  %v643_v45 = vsel %vm631_vm4, %v638_v42, %v642_v39  ;;  %vm7519_vm5 = vcmask 786048  }
  0x35   : > { %5171 = vmatmul.msk.bf16.vlgmr.msra.gmra.mxu3 %vm542_vm1, %v643_v45  ;;  %v855_v31 = vshll.u32 %v846_v28, 16 }
  0x36   : > { %v535_v44 = vsel %vm518_vm3, %v526_v40, %v534_v41 }
  0x37   : > { %5156 = vmatmul.msk.bf16.vlgmr.msra.gmra.mxu0 %vm542_vm1, %v535_v44  ;;  %v857_v41 = vrot.slane %v855_v31, 1 }
  0x47   : > { %5176 = vmatmul.msk.bf16.vlgmr.msrb.gmra.mxu0 %vm542_vm1, %v678_v49 }
  0xaf   : > { %v611_v52 = vpop.f32.mrf.mxu2 }
  0xb1   : > { %v585_v51 = vpop.f32.mrf.mxu1 }
  0xb4   : > { %v555_v50 = vpop.f32.mrf.mxu0 }
  0xb5   : > { %v586_v54 = vadd.f32 %v585_v51, %v555_v50 }
  0xb7   : > { %v616_v56 = vadd.f32 %v611_v52, %v586_v54  ;;  %v613_v63 = vpop.f32.mrf.mxu2 }
  0xb8   : > { %v662_v55 = vpop.f32.mrf.mxu3 }
  0xb9   : > { %v587_v57 = vpop.f32.mrf.mxu1  ;;  %v667_v58 = vadd.f32 %v662_v55, %v616_v56  ;;  %v6001_v55 = vld [vmem:[%s7489_s5 + $0x28] sm:$0xff]  ;;  %v5999_v56 = vld [vmem:[%s7489_s5 + $0x20] sm:$0xff] }
  0xba   : > { %1037 = vmatpush.bf16.msra.mxu2 %v6001_v55  ;;  %945 = vmatpush.bf16.msra.mxu0 %v5999_v56 }
  0xbc   : > { %v557_v53 = vpop.f32.mrf.mxu0 }
  0xbd   : > { %v588_v61 = vadd.f32 %v587_v57, %v557_v53  ;;  %v5998_v57 = vld [vmem:[%s7489_s5 + $0x18] sm:$0xff] }
  0xbe   : > { %989 = vmatpush.bf16.msra.mxu1 %v5998_v57 }
  0xbf   : > { %v617_v3 = vadd.f32 %v613_v63, %v588_v61 }
  0xc0   : > { %v664_v2 = vpop.f32.mrf.mxu3 }
  0xc1   : > { %v668_v6 = vadd.f32 %v664_v2, %v617_v3 }
  0xc4   : > { %v697_v60 = vpop.f32.mrf.mxu0 }
  0xc5   : > { %v702_v62 = vadd.f32 %v697_v60, %v667_v58 }
  0xc7   : > { %v708_v0 = vadd.f32 %v6185_v59, %v702_v62  ;;  %v6188_v62 = vld [vmem:[%s7490_s6] ss:$0 sm:$0xff] }
  0xc9   : > { %v710_v4 = vmax.f32 %v708_v0, 0.0 }
  0xcb   : > { %v716_v7 = vmul.f32 %v6186_v1, %v710_v4 }
  0xcc   : > { %v699_v8 = vpop.f32.mrf.mxu0 }
  0xcd   : > { %v6482_v9 = vadd.f32 %v6187_v5, %v716_v7  ;;  %v703_v10 = vadd.f32 %v699_v8, %v668_v6 }
  0xcf   : > { %v709_v11 = vadd.f32 %v6185_v59, %v703_v10  ;;  %1074 = vrot.lane.b32.xlu2 %v6482_v9, %s7505_s26  ;;  %904 = vrot.lane.b32.xlu1 %v6482_v9, %s7503_s20  ;;  %v743_v12 = vpack.c.bf16 %v6482_v9, %v6482_v9 }
  0xd1   : > { %v711_v13 = vmax.f32 %v709_v11, 0.0  ;;  %747 = vrot.lane.b32.xlu0 %v743_v12, %s7501_s27 }
  0xd3   : > { %v717_v14 = vmul.f32 %v6186_v1, %v711_v13  ;;  %v6309_v1 = vmov 16.0  }
  0xd4   : > { %6211 = vrcp.f32 %v6309_v1  ;;  %v6003_v1 = vld [vmem:[%s7489_s5 + $0x38] sm:$0xff] }
  0xd5   : > { %v6491_v15 = vadd.f32 %v6187_v5, %v717_v14  ;;  %1115 = vmatpush.bf16.msra.mxu3 %v6003_v1 }
  0xd7   : > { %1076 = vrot.lane.b32.xlu2 %v6491_v15, %s7505_s26  ;;  %906 = vrot.lane.b32.xlu1 %v6491_v15, %s7503_s20  ;;  %v744_v16 = vpack.c.bf16 %v6491_v15, %v6491_v15  ;;  %s7545_s26 = smov 96   ;;  %s6310_s20 = smov 1e-12  }
  0xd9   : > { %749 = vrot.lane.b32.xlu0 %v744_v16, %s7501_s27  ;;  %v998_v16 = vld [vmem:[#allocation3 + $0xc] sm:$0x1] }
  0xda   : > { %v6212_v8 = vpop.eup %6211 }
  0xdb   : > { %v736_v13 = vmul.f32 16.0, %v6212_v8  ;;  %vm740_vm6 = vweird.f32 %v6212_v8 }
  0xdd   : > { %v737_v23 = vsub.f32 1.0, %v736_v13 }
  0xdf   : > { %1414 = vrot.lane.b32.xlu2 %v6482_v9, %s7511_s30  ;;  %1246 = vrot.lane.b32.xlu1 %v6491_v15, %s7507_s16 }
  0xe1   : > { %1244 = vrot.lane.b32.xlu0 %v6482_v9, %s7507_s16  ;;  %s7546_s16 = smov 112  }
  0xe7   : > { %1586 = vrot.lane.b32.xlu2 %v6491_v15, %s7509_s17  ;;  %1584 = vrot.lane.b32.xlu1 %v6482_v9, %s7509_s17  ;;  %s486_s17 = scalar_lea.vmem [#allocation5], %s485_s24 }
  0xe9   : > { %1416 = vrot.lane.b32.xlu0 %v6491_v15, %s7511_s30  ;;  %s7540_s30 = smov 16  }
  0xef   : > { %1756 = vrot.lane.b32.xlu1 %v6491_v15, %s7513_s23 }
  0xf1   : > { %1754 = vrot.lane.b32.xlu0 %v6482_v9, %s7513_s23 }
 0x141   : > { %v905_v0 = vpop.permute.xlu1 %904 }
 0x143   : > { %v748_v20 = vpop.permute.xlu0 %747 }
 0x144   : > { %753 = vst.msk [vmem:[#allocation3 + $0x4] sm:$0xf] %vm493_vm0, %v748_v20 }
 0x149   : > { %v907_v14 = vpop.permute.xlu1 %906 }
 0x14b   : > { %v756_v24 = vld [vmem:[#allocation3 + $0x4] sm:$0xf]  ;;  %v750_v25 = vpop.permute.xlu0 %749 }
 0x14c   : > { %754 = vst.msk [vmem:[#allocation3 + $0x8] sm:$0xf] %vm493_vm0, %v750_v25  ;;  %v764_v27 = vunpack.c.l.b16 %v756_v24  ;;  %v5189_v30 = vld [vmem:[#allocation3 + $0x4] sm:$0xf]  ;;  %v1006_v24 = vunpack.c.l.b16 %v998_v16  ;;  %v953_v25 = vunpack.c.l.b16 %v916_v17 }
 0x14e   : > { %v792_v29 = vpack.c.b16 %v764_v27, %v791_v26  ;;  %v1008_v31 = vpack.c.b16 %v1006_v24, %v1006_v24  ;;  %v1086_v24 = vld [vmem:[#allocation3] sm:$0x8] }
 0x150   : > { %v795_v34 = vshrl.u32 %v792_v29, 16  ;;  %v798_v35 = vshll.u32 %v792_v29, 16 }
 0x152   : > { %v797_v42 = vrot.slane %v795_v34, 3  ;;  %v800_v43 = vrot.slane %v798_v35, 4 }
 0x153   : > { %v757_v32 = vld [vmem:[#allocation3 + $0x8] sm:$0xf] }
 0x154   : > { %v5996_v33 = vld [vmem:[#allocation3 + $0x4] sm:$0xf0]  ;;  %v765_v36 = vunpack.c.l.b16 %v757_v32  ;;  %v801_v52 = vor.u32 %v800_v43, %v797_v42 }
 0x155   : > { %v5190_v37 = vor.u32 %v5996_v33, %v5189_v30  ;;  %v738_v30 = vmul.f32 %v6212_v8, %v737_v23  ;;  %v1168_v23 = vld [vmem:[#allocation3 + $0xc] sm:$0x1] }
 0x156   : > { %v766_v38 = vpack.c.b16 %v765_v36, %v764_v27  ;;  %v793_v39 = vpack.c.b16 %v765_v36, %v765_v36 }
 0x157   : > { %v850_v40 = vshll.u32 %v5190_v37, 16  ;;  %v848_v44 = vshrl.u32 %v5190_v37, 16  ;;  %v739_v36 = vadd.f32 %v6212_v8, %v738_v30  ;;  %v1017_v37 = vshll.u32 %v1008_v31, 16 }
 0x158   : > { %5181 = vmatmul.msk.bf16.vlgmr.msrb.gmra.mxu1 %vm542_vm1, %v766_v38  ;;  %v803_v46 = vshrl.u32 %v793_v39, 16  ;;  %v806_v47 = vshll.u32 %v793_v39, 16  ;;  %v1176_v30 = vunpack.c.l.b16 %v1168_v23  ;;  %v1123_v31 = vunpack.c.l.b16 %v1086_v24 }
 0x159   : > { %v852_v45 = vrot.slane %v850_v40, 1 }
 0x15a   : > { %v805_v49 = vrot.slane %v803_v46, 3  ;;  %v808_v50 = vrot.slane %v806_v47, 4  ;;  %v6550_v47 = vsel %vm740_vm6, %v6212_v8, %v739_v36  ;;  %v1178_v36 = vpack.c.b16 %v1176_v30, %v1176_v30  ;;  %v1256_v30 = vld [vmem:[#allocation3] sm:$0x8] }
 0x15b   : > { %v853_v48 = vor.u32 %v852_v45, %v848_v44  ;;  %vm7518_vm6 = vcmask 917248  }
 0x15c   : > { %v809_v53 = vor.u32 %v808_v50, %v805_v49 }
 0x15d   : > { %v858_v51 = vsel %vm631_vm4, %v853_v48, %v857_v41 }
 0x15e   : > { %5195 = vmatmul.msk.bf16.vlgmr.msrb.gmra.mxu3 %vm542_vm1, %v858_v51  ;;  %v810_v54 = vsel %vm518_vm3, %v801_v52, %v809_v53  ;;  %v1019_v51 = vrot.slane %v1017_v37, 1 }
 0x15f   : > { %5186 = vmatmul.msk.bf16.vlgmr.msrb.gmra.mxu2 %vm542_vm1, %v810_v54 }
 0x1d5   : > { %v785_v58 = vpop.f32.mrf.mxu1 }
 0x1dd   : > { %v787_v4 = vpop.f32.mrf.mxu1 }
 0x1e1   : > { %v877_v59 = vpop.f32.mrf.mxu3 }
 0x1e2   : > { %v829_v60 = vpop.f32.mrf.mxu2 }
 0x1e3   : > { %v830_v61 = vadd.f32 %v829_v60, %v785_v58 }
 0x1e5   : > { %v882_v63 = vadd.f32 %v877_v59, %v830_v61 }
 0x1e7   : > { %v888_v2 = vadd.f32 %v6188_v62, %v882_v63 }
 0x1e9   : > { %v910_v3 = vadd.f32 %v905_v0, %v888_v2  ;;  %900 = vst.msk [vmem:[#allocation4] sm:$0xff] %vm542_vm1, %v888_v2  ;;  %v879_v10 = vpop.f32.mrf.mxu3  ;;  %v890_v18 = vsel %vm542_vm1, %v888_v2, 0.0  ;;  %v6002_v2 = vld [vmem:[%s7489_s5 + $0x30] sm:$0xff] }
 0x1ea   : > { %v831_v5 = vpop.f32.mrf.mxu2  ;;  %1159 = vmatpush.bf16.msrb.mxu0 %v6002_v2 }
 0x1eb   : > { %v912_v6 = vpack.c.bf16 %v910_v3, %v910_v3  ;;  %v832_v7 = vadd.f32 %v831_v5, %v787_v4  ;;  %v6005_v3 = vld [vmem:[%s7489_s5 + $0x40] sm:$0xff] }
 0x1ec   : > { %1207 = vmatpush.bf16.msrb.mxu1 %v6005_v3 }
 0x1ed   : > { %914 = vst.msk [vmem:[#allocation3 + $0x4] sm:$0xf] %vm493_vm0, %v912_v6  ;;  %v883_v11 = vadd.f32 %v879_v10, %v832_v7  ;;  %v6189_v7 = vld [vmem:[%s7490_s6 + $0x1] ss:$0 sm:$0xff] }
 0x1ef   : > { %v889_v12 = vadd.f32 %v6188_v62, %v883_v11  ;;  %v1075_v11 = vpop.permute.xlu2 %1074 }
 0x1f1   : > { %v891_v19 = vsel %vm542_vm1, %v889_v12, 0.0  ;;  %v911_v20 = vadd.f32 %v907_v14, %v889_v12  ;;  %901 = vst.msk [vmem:[#allocation4 + $0x8] sm:$0xff] %vm542_vm1, %v889_v12 }
 0x1f2   : > { %v892_v21 = vadd.f32 %v891_v19, %v890_v18 }
 0x1f3   : > { %v913_v22 = vpack.c.bf16 %v911_v20, %v911_v20 }
 0x1f4   : > { %v917_v26 = vld [vmem:[#allocation3 + $0x4] sm:$0xf]  ;;  %v893_v27 = vrot.slane %v892_v21, 4 }
 0x1f5   : > { %915 = vst.msk [vmem:[#allocation3 + $0x8] sm:$0xf] %vm493_vm0, %v913_v22  ;;  %v926_v28 = vunpack.c.l.b16 %v917_v26  ;;  %v5214_v35 = vld [vmem:[#allocation3 + $0x4] sm:$0xf] }
 0x1f6   : > { %v894_v29 = vadd.f32 %v893_v27, %v892_v21 }
 0x1f7   : > { %v954_v32 = vpack.c.b16 %v926_v28, %v953_v25  ;;  %v1077_v22 = vpop.permute.xlu2 %1076 }
 0x1f8   : > { %v895_v33 = vrot.slane %v894_v29, 2 }
 0x1f9   : > { %v957_v38 = vshrl.u32 %v954_v32, 16  ;;  %v960_v42 = vshll.u32 %v954_v32, 16 }
 0x1fa   : > { %v896_v34 = vadd.f32 %v895_v33, %v894_v29 }
 0x1fb   : > { %v959_v52 = vrot.slane %v957_v38, 3  ;;  %v962_v53 = vrot.slane %v960_v42, 4 }
 0x1fc   : > { %v918_v39 = vld [vmem:[#allocation3 + $0x8] sm:$0xf]  ;;  %v897_v41 = vrot.slane %v896_v34, 1 }
 0x1fd   : > { %v6000_v40 = vld [vmem:[#allocation3 + $0x4] sm:$0xf0]  ;;  %v927_v43 = vunpack.c.l.b16 %v918_v39  ;;  %v963_v62 = vor.u32 %v962_v53, %v959_v52 }
 0x1fe   : > { %v5215_v44 = vor.u32 %v6000_v40, %v5214_v35  ;;  %v898_v45 = vadd.f32 %v897_v41, %v896_v34  ;;  %v1187_v41 = vshll.u32 %v1178_v36, 16 }
 0x1ff   : > { %v928_v46 = vpack.c.b16 %v927_v43, %v926_v28  ;;  %v955_v49 = vpack.c.b16 %v927_v43, %v927_v43 }
 0x200   : > { %v1012_v48 = vshll.u32 %v5215_v44, 16  ;;  %v899_v50 = vmul.f32 %v898_v45, %v6550_v47  ;;  %v1010_v54 = vshrl.u32 %v5215_v44, 16 }
 0x201   : > { %5204 = vmatmul.msk.bf16.vlgmr.msra.gmra.mxu0 %vm542_vm1, %v928_v46  ;;  %v965_v56 = vshrl.u32 %v955_v49, 16  ;;  %v968_v57 = vshll.u32 %v955_v49, 16 }
 0x202   : > { %v1014_v55 = vrot.slane %v1012_v48, 1  ;;  %1925 = vrot.lane.b32.xlu2 %v899_v50, %s7540_s30 }
 0x203   : > { %v967_v59 = vrot.slane %v965_v56, 3  ;;  %v970_v60 = vrot.slane %v968_v57, 4 }
 0x204   : > { %v1015_v58 = vor.u32 %v1014_v55, %v1010_v54  ;;  %v1189_v55 = vrot.slane %v1187_v41, 1 }
 0x205   : > { %v971_v63 = vor.u32 %v970_v60, %v967_v59 }
 0x206   : > { %v1020_v61 = vsel %vm631_vm4, %v1015_v58, %v1019_v51 }
 0x207   : > { %5220 = vmatmul.msk.bf16.vlgmr.msra.gmra.mxu2 %vm542_vm1, %v1020_v61  ;;  %v972_v0 = vsel %vm518_vm3, %v963_v62, %v971_v63 }
 0x208   : > { %5209 = vmatmul.msk.bf16.vlgmr.msra.gmra.mxu1 %vm542_vm1, %v972_v0 }
 0x27e   : > { %v947_v4 = vpop.f32.mrf.mxu0 }
 0x285   : > { %v991_v5 = vpop.f32.mrf.mxu1 }
 0x286   : > { %v992_v6 = vadd.f32 %v991_v5, %v947_v4  ;;  %v949_v16 = vpop.f32.mrf.mxu0  ;;  %v6007_v5 = vld [vmem:[%s7489_s5 + $0x50] sm:$0xff] }
 0x287   : > { %1285 = vmatpush.bf16.msrb.mxu2 %v6007_v5 }
 0x28a   : > { %v1039_v8 = vpop.f32.mrf.mxu2 }
 0x28b   : > { %v1044_v10 = vadd.f32 %v1039_v8, %v992_v6  ;;  %v6006_v6 = vld [vmem:[%s7489_s5 + $0x48] sm:$0xff] }
 0x28c   : > { %1329 = vmatpush.bf16.msrb.mxu3 %v6006_v6 }
 0x28d   : > { %v6571_v12 = vadd.f32 %v6189_v7, %v1044_v10  ;;  %v993_v13 = vpop.f32.mrf.mxu1 }
 0x28e   : > { %v994_v18 = vadd.f32 %v993_v13, %v949_v16 }
 0x28f   : > { %v1080_v14 = vadd.f32 %v1075_v11, %v6571_v12  ;;  %v1053_v25 = vsel %vm542_vm1, %v6571_v12, 0.0 }
 0x291   : > { %v1082_v17 = vpack.c.bf16 %v1080_v14, %v1080_v14  ;;  %v6190_v14 = vld [vmem:[%s7490_s6 + $0x2] ss:$0 sm:$0xff] }
 0x292   : > { %v1041_v19 = vpop.f32.mrf.mxu2 }
 0x293   : > { %1084 = vst.msk [vmem:[#allocation3 + $0x4] sm:$0xf] %vm493_vm0, %v1082_v17  ;;  %v1045_v20 = vadd.f32 %v1041_v19, %v994_v18  ;;  %v1245_v18 = vpop.permute.xlu0 %1244 }
 0x295   : > { %v6575_v21 = vadd.f32 %v6189_v7, %v1045_v20  ;;  %v6009_v7 = vld [vmem:[%s7489_s5 + $0x58] sm:$0xff] }
 0x296   : > { %1377 = vmatpush.bf16.msra.mxu0 %v6009_v7 }
 0x297   : > { %v1054_v26 = vsel %vm542_vm1, %v6575_v21, 0.0  ;;  %v1081_v27 = vadd.f32 %v1077_v22, %v6575_v21 }
 0x298   : > { %v1055_v28 = vadd.f32 %v1054_v26, %v1053_v25 }
 0x299   : > { %v1083_v29 = vpack.c.bf16 %v1081_v27, %v1081_v27 }
 0x29a   : > { %v1087_v32 = vld [vmem:[#allocation3 + $0x4] sm:$0xf]  ;;  %v1056_v33 = vrot.slane %v1055_v28, 4 }
 0x29b   : > { %1085 = vst.msk [vmem:[#allocation3 + $0x8] sm:$0xf] %vm493_vm0, %v1083_v29  ;;  %v1096_v34 = vunpack.c.l.b16 %v1087_v32  ;;  %v5240_v40 = vld [vmem:[#allocation3 + $0x4] sm:$0xf]  ;;  %v1338_v29 = vld [vmem:[#allocation3 + $0xc] sm:$0x1] }
 0x29c   : > { %v1057_v35 = vadd.f32 %v1056_v33, %v1055_v28  ;;  %v1247_v28 = vpop.permute.xlu1 %1246  ;;  %v1346_v36 = vunpack.c.l.b16 %v1338_v29 }
 0x29d   : > { %v1124_v37 = vpack.c.b16 %v1096_v34, %v1123_v31 }
 0x29e   : > { %v1058_v38 = vrot.slane %v1057_v35, 2 }
 0x29f   : > { %v1127_v42 = vshrl.u32 %v1124_v37, 16  ;;  %v1130_v46 = vshll.u32 %v1124_v37, 16  ;;  %v1293_v37 = vunpack.c.l.b16 %v1256_v30 }
 0x2a0   : > { %v1059_v39 = vadd.f32 %v1058_v38, %v1057_v35 }
 0x2a1   : > { %v1129_v56 = vrot.slane %v1127_v42, 3  ;;  %v1132_v57 = vrot.slane %v1130_v46, 4  ;;  %v1348_v42 = vpack.c.b16 %v1346_v36, %v1346_v36  ;;  %v1417_v36 = vpop.permute.xlu0 %1416 }
 0x2a2   : > { %v1088_v43 = vld [vmem:[#allocation3 + $0x8] sm:$0xf]  ;;  %v1060_v45 = vrot.slane %v1059_v39, 1 }
 0x2a3   : > { %v6004_v44 = vld [vmem:[#allocation3 + $0x4] sm:$0xf0]  ;;  %v1097_v48 = vunpack.c.l.b16 %v1088_v43  ;;  %v1133_v2 = vor.u32 %v1132_v57, %v1129_v56 }
 0x2a4   : > { %v5241_v49 = vor.u32 %v6004_v44, %v5240_v40  ;;  %v1061_v50 = vadd.f32 %v1060_v45, %v1059_v39 }
 0x2a5   : > { %v1098_v51 = vpack.c.b16 %v1097_v48, %v1096_v34  ;;  %v1125_v53 = vpack.c.b16 %v1097_v48, %v1097_v48  ;;  %v1357_v48 = vshll.u32 %v1348_v42, 16  ;;  %v1426_v42 = vld [vmem:[#allocation3] sm:$0x8] }
 0x2a6   : > { %v1182_v52 = vshll.u32 %v5241_v49, 16  ;;  %v1062_v54 = vmul.f32 %v1061_v50, %v6550_v47  ;;  %v1180_v58 = vshrl.u32 %v5241_v49, 16 }
 0x2a7   : > { %5230 = vmatmul.msk.bf16.vlgmr.msra.gmra.mxu3 %vm542_vm1, %v1098_v51  ;;  %v1135_v60 = vshrl.u32 %v1125_v53, 16  ;;  %v1138_v61 = vshll.u32 %v1125_v53, 16 }
 0x2a8   : > { %v1184_v59 = vrot.slane %v1182_v52, 1  ;;  %1929 = vrot.lane.b32.xlu0 %v1062_v54, %s7541_s0 }
 0x2a9   : > { %v1137_v63 = vrot.slane %v1135_v60, 3  ;;  %v1140_v0 = vrot.slane %v1138_v61, 4  ;;  %v1359_v61 = vrot.slane %v1357_v48, 1 }
 0x2aa   : > { %v1185_v62 = vor.u32 %v1184_v59, %v1180_v58 }
 0x2ab   : > { %v1141_v3 = vor.u32 %v1140_v0, %v1137_v63 }
 0x2ac   : > { %v1190_v1 = vsel %vm631_vm4, %v1185_v62, %v1189_v55 }
 0x2ad   : > { %5246 = vmatmul.msk.bf16.vlgmr.msrb.gmra.mxu1 %vm542_vm1, %v1190_v1  ;;  %v1142_v4 = vsel %vm518_vm3, %v1133_v2, %v1141_v3 }
 0x2ae   : > { %5235 = vmatmul.msk.bf16.vlgmr.msrb.gmra.mxu0 %vm542_vm1, %v1142_v4 }
 0x32a   : > { %v1117_v8 = vpop.f32.mrf.mxu3  ;;  %v1209_v10 = vpop.f32.mrf.mxu1 }
 0x32b   : > { %v1161_v11 = vpop.f32.mrf.mxu0 }
 0x32c   : > { %v1162_v13 = vadd.f32 %v1161_v11, %v1117_v8 }
 0x32e   : > { %v1214_v16 = vadd.f32 %v1209_v10, %v1162_v13  ;;  %v6010_v13 = vld [vmem:[%s7489_s5 + $0x60] sm:$0xff] }
 0x32f   : > { %1499 = vmatpush.bf16.msra.mxu2 %v6010_v13 }
 0x330   : > { %v6602_v17 = vadd.f32 %v6190_v14, %v1214_v16  ;;  %v6011_v16 = vld [vmem:[%s7489_s5 + $0x68] sm:$0xff] }
 0x331   : > { %1455 = vmatpush.bf16.msra.mxu1 %v6011_v16 }
 0x332   : > { %v1250_v19 = vadd.f32 %v1245_v18, %v6602_v17  ;;  %v1119_v20 = vpop.f32.mrf.mxu3  ;;  %v1211_v25 = vpop.f32.mrf.mxu1  ;;  %v1223_v31 = vsel %vm542_vm1, %v6602_v17, 0.0 }
 0x333   : > { %v1163_v22 = vpop.f32.mrf.mxu0 }
 0x334   : > { %v1252_v23 = vpack.c.bf16 %v1250_v19, %v1250_v19  ;;  %v1164_v24 = vadd.f32 %v1163_v22, %v1119_v20 }
 0x336   : > { %1254 = vst.msk [vmem:[#allocation3 + $0x4] sm:$0xf] %vm493_vm0, %v1252_v23  ;;  %v1215_v26 = vadd.f32 %v1211_v25, %v1164_v24  ;;  %v6191_v23 = vld [vmem:[%s7490_s6 + $0x3] ss:$0 sm:$0xff] }
 0x338   : > { %v6606_v27 = vadd.f32 %v6190_v14, %v1215_v26  ;;  %v6013_v14 = vld [vmem:[%s7489_s5 + $0x70] sm:$0xff]  ;;  %v1415_v26 = vpop.permute.xlu2 %1414 }
 0x339   : > { %1547 = vmatpush.bf16.msra.mxu3 %v6013_v14 }
 0x33a   : > { %v1224_v32 = vsel %vm542_vm1, %v6606_v27, 0.0  ;;  %v1251_v33 = vadd.f32 %v1247_v28, %v6606_v27 }
 0x33b   : > { %v1225_v34 = vadd.f32 %v1224_v32, %v1223_v31 }
 0x33c   : > { %v1253_v35 = vpack.c.bf16 %v1251_v33, %v1251_v33 }
 0x33d   : > { %v1257_v38 = vld [vmem:[#allocation3 + $0x4] sm:$0xf]  ;;  %v1226_v39 = vrot.slane %v1225_v34, 4 }
 0x33e   : > { %1255 = vst.msk [vmem:[#allocation3 + $0x8] sm:$0xf] %vm493_vm0, %v1253_v35  ;;  %v1266_v40 = vunpack.c.l.b16 %v1257_v38  ;;  %v5266_v46 = vld [vmem:[#allocation3 + $0x4] sm:$0xf] }
 0x33f   : > { %v1227_v41 = vadd.f32 %v1226_v39, %v1225_v34 }
 0x340   : > { %v1294_v43 = vpack.c.b16 %v1266_v40, %v1293_v37 }
 0x341   : > { %v1228_v44 = vrot.slane %v1227_v41, 2 }
 0x342   : > { %v1297_v49 = vshrl.u32 %v1294_v43, 16  ;;  %v1300_v53 = vshll.u32 %v1294_v43, 16 }
 0x343   : > { %v1229_v45 = vadd.f32 %v1228_v44, %v1227_v41 }
 0x344   : > { %v1299_v62 = vrot.slane %v1297_v49, 3  ;;  %v1302_v63 = vrot.slane %v1300_v53, 4  ;;  %v1463_v49 = vunpack.c.l.b16 %v1426_v42 }
 0x345   : > { %v1258_v50 = vld [vmem:[#allocation3 + $0x8] sm:$0xf]  ;;  %v1230_v52 = vrot.slane %v1229_v45, 1 }
 0x346   : > { %v6008_v51 = vld [vmem:[#allocation3 + $0x4] sm:$0xf0]  ;;  %v1267_v54 = vunpack.c.l.b16 %v1258_v50  ;;  %v1303_v8 = vor.u32 %v1302_v63, %v1299_v62 }
 0x347   : > { %v5267_v55 = vor.u32 %v6008_v51, %v5266_v46  ;;  %v1231_v56 = vadd.f32 %v1230_v52, %v1229_v45 }
 0x348   : > { %v1268_v57 = vpack.c.b16 %v1267_v54, %v1266_v40  ;;  %v1295_v59 = vpack.c.b16 %v1267_v54, %v1267_v54  ;;  %v1508_v40 = vld [vmem:[#allocation3 + $0xc] sm:$0x1] }
 0x349   : > { %v1352_v58 = vshll.u32 %v5267_v55, 16  ;;  %v1232_v60 = vmul.f32 %v1231_v56, %v6550_v47  ;;  %v1350_v0 = vshrl.u32 %v5267_v55, 16  ;;  %v1516_v46 = vunpack.c.l.b16 %v1508_v40 }
 0x34a   : > { %5256 = vmatmul.msk.bf16.vlgmr.msrb.gmra.mxu2 %vm542_vm1, %v1268_v57  ;;  %v1305_v2 = vshrl.u32 %v1295_v59, 16  ;;  %v1308_v3 = vshll.u32 %v1295_v59, 16 }
 0x34b   : > { %v1354_v1 = vrot.slane %v1352_v58, 1  ;;  %1933 = vrot.lane.b32.xlu1 %v1232_v60, %s7542_s1  ;;  %v1518_v52 = vpack.c.b16 %v1516_v46, %v1516_v46 }
 0x34c   : > { %v1307_v5 = vrot.slane %v1305_v2, 3  ;;  %v1310_v6 = vrot.slane %v1308_v3, 4 }
 0x34d   : > { %v1355_v4 = vor.u32 %v1354_v1, %v1350_v0  ;;  %v1527_v58 = vshll.u32 %v1518_v52, 16 }
 0x34e   : > { %v1311_v10 = vor.u32 %v1310_v6, %v1307_v5 }
 0x34f   : > { %v1360_v7 = vsel %vm631_vm4, %v1355_v4, %v1359_v61  ;;  %v1529_v5 = vrot.slane %v1527_v58, 1 }
 0x350   : > { %5272 = vmatmul.msk.bf16.vlgmr.msra.gmra.mxu0 %vm542_vm1, %v1360_v7  ;;  %v1312_v11 = vsel %vm518_vm3, %v1303_v8, %v1311_v10 }
 0x351   : > { %5261 = vmatmul.msk.bf16.vlgmr.msrb.gmra.mxu3 %vm542_vm1, %v1312_v11 }
 0x3cd   : > { %v1287_v18 = vpop.f32.mrf.mxu2  ;;  %v1379_v19 = vpop.f32.mrf.mxu0 }
 0x3d4   : > { %v1331_v20 = vpop.f32.mrf.mxu3 }
 0x3d5   : > { %v1332_v22 = vadd.f32 %v1331_v20, %v1287_v18  ;;  %v1289_v29 = vpop.f32.mrf.mxu2  ;;  %v1381_v33 = vpop.f32.mrf.mxu0 }
 0x3d7   : > { %v1384_v24 = vadd.f32 %v1379_v19, %v1332_v22  ;;  %v6017_v22 = vld [vmem:[%s7489_s5 + $0x88] sm:$0xff] }
 0x3d8   : > { %1717 = vmatpush.bf16.msrb.mxu2 %v6017_v22 }
 0x3d9   : > { %v6633_v25 = vadd.f32 %v6191_v23, %v1384_v24  ;;  %v6014_v24 = vld [vmem:[%s7489_s5 + $0x78] sm:$0xff] }
 0x3da   : > { %1669 = vmatpush.bf16.msrb.mxu1 %v6014_v24 }
 0x3db   : > { %v1420_v28 = vadd.f32 %v1415_v26, %v6633_v25  ;;  %v1393_v37 = vsel %vm542_vm1, %v6633_v25, 0.0 }
 0x3dc   : > { %v1333_v30 = vpop.f32.mrf.mxu3 }
 0x3dd   : > { %v1422_v31 = vpack.c.bf16 %v1420_v28, %v1420_v28  ;;  %v1334_v32 = vadd.f32 %v1333_v30, %v1289_v29 }
 0x3df   : > { %1424 = vst.msk [vmem:[#allocation3 + $0x4] sm:$0xf] %vm493_vm0, %v1422_v31  ;;  %v1385_v34 = vadd.f32 %v1381_v33, %v1334_v32  ;;  %v6192_v31 = vld [vmem:[%s7490_s6 + $0x4] ss:$0 sm:$0xff] }
 0x3e1   : > { %v6637_v35 = vadd.f32 %v6191_v23, %v1385_v34  ;;  %v6015_v23 = vld [vmem:[%s7489_s5 + $0x80] sm:$0xff]  ;;  %v1585_v34 = vpop.permute.xlu1 %1584 }
 0x3e2   : > { %1625 = vmatpush.bf16.msrb.mxu0 %v6015_v23 }
 0x3e3   : > { %v1394_v38 = vsel %vm542_vm1, %v6637_v35, 0.0  ;;  %v1421_v39 = vadd.f32 %v1417_v36, %v6637_v35 }
 0x3e4   : > { %v1395_v41 = vadd.f32 %v1394_v38, %v1393_v37 }
 0x3e5   : > { %v1423_v43 = vpack.c.bf16 %v1421_v39, %v1421_v39 }
 0x3e6   : > { %v1427_v44 = vld [vmem:[#allocation3 + $0x4] sm:$0xf]  ;;  %v1396_v45 = vrot.slane %v1395_v41, 4 }
 0x3e7   : > { %1425 = vst.msk [vmem:[#allocation3 + $0x8] sm:$0xf] %vm493_vm0, %v1423_v43  ;;  %v1436_v48 = vunpack.c.l.b16 %v1427_v44  ;;  %v1587_v44 = vpop.permute.xlu2 %1586 }
 0x3e8   : > { %v1397_v50 = vadd.f32 %v1396_v45, %v1395_v41 }
 0x3e9   : > { %v1464_v53 = vpack.c.b16 %v1436_v48, %v1463_v49  ;;  %v1678_v49 = vld [vmem:[#allocation3 + $0xc] sm:$0x1] }
 0x3ea   : > { %v1398_v51 = vrot.slane %v1397_v50, 2 }
 0x3eb   : > { %v1467_v60 = vshrl.u32 %v1464_v53, 16  ;;  %v1470_v61 = vshll.u32 %v1464_v53, 16 }
 0x3ec   : > { %v1399_v54 = vadd.f32 %v1398_v51, %v1397_v50  ;;  %v1596_v51 = vld [vmem:[#allocation3] sm:$0x8] }
 0x3ed   : > { %v1469_v6 = vrot.slane %v1467_v60, 3  ;;  %v1472_v7 = vrot.slane %v1470_v61, 4 }
 0x3ee   : > { %v1428_v55 = vld [vmem:[#allocation3 + $0x8] sm:$0xf]  ;;  %v1400_v56 = vrot.slane %v1399_v54, 1 }
 0x3ef   : > { %v6012_v57 = vld [vmem:[#allocation3 + $0x4] sm:$0xff]  ;;  %v1437_v59 = vunpack.c.l.b16 %v1428_v55  ;;  %v1473_v18 = vor.u32 %v1472_v7, %v1469_v6  ;;  %v1686_v55 = vunpack.c.l.b16 %v1678_v49 }
 0x3f0   : > { %v1401_v62 = vadd.f32 %v1400_v56, %v1399_v54  ;;  %v1522_v63 = vshll.u32 %v6012_v57, 16  ;;  %v1520_v3 = vshrl.u32 %v6012_v57, 16  ;;  %v1633_v57 = vunpack.c.l.b16 %v1596_v51 }
 0x3f1   : > { %v1438_v0 = vpack.c.b16 %v1437_v59, %v1436_v48  ;;  %v1465_v1 = vpack.c.b16 %v1437_v59, %v1437_v59  ;;  %v1688_v60 = vpack.c.b16 %v1686_v55, %v1686_v55  ;;  %v1757_v55 = vpop.permute.xlu1 %1756 }
 0x3f2   : > { %v1402_v2 = vmul.f32 %v1401_v62, %v6550_v47  ;;  %v1524_v4 = vrot.slane %v1522_v63, 1 }
 0x3f3   : > { %5282 = vmatmul.msk.bf16.vlgmr.msra.gmra.mxu1 %vm542_vm1, %v1438_v0  ;;  %v1475_v8 = vshrl.u32 %v1465_v1, 16  ;;  %v1478_v10 = vshll.u32 %v1465_v1, 16 }
 0x3f4   : > { %1937 = vrot.lane.b32.xlu2 %v1402_v2, %s7543_s2  ;;  %v1525_v11 = vor.u32 %v1524_v4, %v1520_v3  ;;  %v1697_v2 = vshll.u32 %v1688_v60, 16 }
 0x3f5   : > { %v1477_v13 = vrot.slane %v1475_v8, 3  ;;  %v1480_v14 = vrot.slane %v1478_v10, 4 }
 0x3f6   : > { %v1530_v16 = vsel %vm631_vm4, %v1525_v11, %v1529_v5 }
 0x3f7   : > { %5298 = vmatmul.msk.bf16.vlgmr.msra.gmra.mxu3 %vm542_vm1, %v1530_v16  ;;  %v1481_v19 = vor.u32 %v1480_v14, %v1477_v13  ;;  %v1699_v16 = vrot.slane %v1697_v2, 1 }
 0x3f9   : > { %v1482_v20 = vsel %vm518_vm3, %v1473_v18, %v1481_v19 }
 0x3fa   : > { %5287 = vmatmul.msk.bf16.vlgmr.msra.gmra.mxu2 %vm542_vm1, %v1482_v20 }
 0x470   : > { %v1457_v26 = vpop.f32.mrf.mxu1 }
 0x478   : > { %v1459_v37 = vpop.f32.mrf.mxu1 }
 0x47a   : > { %v1549_v28 = vpop.f32.mrf.mxu3 }
 0x47d   : > { %v1501_v29 = vpop.f32.mrf.mxu2 }
 0x47e   : > { %v1502_v30 = vadd.f32 %v1501_v29, %v1457_v26 }
 0x480   : > { %v1554_v32 = vadd.f32 %v1549_v28, %v1502_v30 }
 0x482   : > { %v1561_v33 = vadd.f32 %v6192_v31, %v1554_v32  ;;  %v1551_v41 = vpop.f32.mrf.mxu3  ;;  %v1755_v32 = vpop.permute.xlu0 %1754 }
 0x484   : > { %v1590_v36 = vadd.f32 %v1585_v34, %v1561_v33  ;;  %v1563_v45 = vsel %vm542_vm1, %v1561_v33, 0.0 }
 0x485   : > { %v1503_v38 = vpop.f32.mrf.mxu2 }
 0x486   : > { %v1592_v39 = vpack.c.bf16 %v1590_v36, %v1590_v36  ;;  %v1504_v40 = vadd.f32 %v1503_v38, %v1459_v37  ;;  %v6019_v37 = vld [vmem:[%s7489_s5 + $0x98] sm:$0xff]  ;;  %v6018_v38 = vld [vmem:[%s7489_s5 + $0x90] sm:$0xff] }
 0x487   : > { %1795 = vmatpush.bf16.msrb.mxu3 %v6019_v37  ;;  %1839 = vmatpush.bf16.msra.mxu0 %v6018_v38 }
 0x488   : > { %1594 = vst.msk [vmem:[#allocation3 + $0x4] sm:$0xf] %vm493_vm0, %v1592_v39  ;;  %v1555_v42 = vadd.f32 %v1551_v41, %v1504_v40  ;;  %v6193_v41 = vld [vmem:[%s7490_s6 + $0x5] ss:$0 sm:$0xff] }
 0x48a   : > { %v6665_v43 = vadd.f32 %v6192_v31, %v1555_v42  ;;  %v6684_v34 = vpop.permute.xlu0 %1929 }
 0x48c   : > { %v1564_v46 = vsel %vm542_vm1, %v6665_v43, 0.0  ;;  %v1591_v48 = vadd.f32 %v1587_v44, %v6665_v43 }
 0x48d   : > { %v1565_v50 = vadd.f32 %v1564_v46, %v1563_v45 }
 0x48e   : > { %v1593_v52 = vpack.c.bf16 %v1591_v48, %v1591_v48 }
 0x48f   : > { %v1597_v53 = vld [vmem:[#allocation3 + $0x4] sm:$0xf]  ;;  %v1566_v54 = vrot.slane %v1565_v50, 4 }
 0x490   : > { %1595 = vst.msk [vmem:[#allocation3 + $0x8] sm:$0xf] %vm493_vm0, %v1593_v52  ;;  %v1606_v56 = vunpack.c.l.b16 %v1597_v53 }
 0x491   : > { %v1567_v58 = vadd.f32 %v1566_v54, %v1565_v50 }
 0x492   : > { %v1634_v61 = vpack.c.b16 %v1606_v56, %v1633_v57 }
 0x493   : > { %v1568_v59 = vrot.slane %v1567_v58, 2 }
 0x494   : > { %v1637_v4 = vshrl.u32 %v1634_v61, 16  ;;  %v1640_v5 = vshll.u32 %v1634_v61, 16  ;;  %v1766_v61 = vld [vmem:[#allocation3] sm:$0x8] }
 0x495   : > { %v1569_v62 = vadd.f32 %v1568_v59, %v1567_v58  ;;  %v1848_v59 = vld [vmem:[#allocation3 + $0xc] sm:$0x1] }
 0x496   : > { %v1639_v18 = vrot.slane %v1637_v4, 3  ;;  %v1642_v19 = vrot.slane %v1640_v5, 4 }
 0x497   : > { %v1598_v63 = vld [vmem:[#allocation3 + $0x8] sm:$0xf]  ;;  %v1570_v0 = vrot.slane %v1569_v62, 1 }
 0x498   : > { %v6016_v1 = vld [vmem:[#allocation3 + $0x4] sm:$0xff]  ;;  %v1607_v3 = vunpack.c.l.b16 %v1598_v63  ;;  %v1643_v29 = vor.u32 %v1642_v19, %v1639_v18 }
 0x499   : > { %v1571_v6 = vadd.f32 %v1570_v0, %v1569_v62  ;;  %v1692_v7 = vshll.u32 %v6016_v1, 16  ;;  %v1690_v13 = vshrl.u32 %v6016_v1, 16  ;;  %v1856_v1 = vunpack.c.l.b16 %v1848_v59 }
 0x49a   : > { %v1608_v8 = vpack.c.b16 %v1607_v3, %v1606_v56  ;;  %v1635_v10 = vpack.c.b16 %v1607_v3, %v1607_v3  ;;  %v1803_v3 = vunpack.c.l.b16 %v1766_v61 }
 0x49b   : > { %v1572_v11 = vmul.f32 %v1571_v6, %v6550_v47  ;;  %v1694_v14 = vrot.slane %v1692_v7, 1  ;;  %v1858_v6 = vpack.c.b16 %v1856_v1, %v1856_v1 }
 0x49c   : > { %5308 = vmatmul.msk.bf16.vlgmr.msrb.gmra.mxu0 %vm542_vm1, %v1608_v8  ;;  %v1645_v20 = vshrl.u32 %v1635_v10, 16  ;;  %v1648_v22 = vshll.u32 %v1635_v10, 16 }
 0x49d   : > { %1941 = vrot.lane.b32.xlu0 %v1572_v11, %s7544_s3  ;;  %v1695_v23 = vor.u32 %v1694_v14, %v1690_v13  ;;  %v1867_v14 = vshll.u32 %v1858_v6, 16 }
 0x49e   : > { %v1647_v24 = vrot.slane %v1645_v20, 3  ;;  %v1650_v26 = vrot.slane %v1648_v22, 4 }
 0x49f   : > { %v1700_v28 = vsel %vm631_vm4, %v1695_v23, %v1699_v16 }
 0x4a0   : > { %5324 = vmatmul.msk.bf16.vlgmr.msrb.gmra.mxu2 %vm542_vm1, %v1700_v28  ;;  %v1651_v30 = vor.u32 %v1650_v26, %v1647_v24 }
 0x4a2   : > { %v1652_v31 = vsel %vm518_vm3, %v1643_v29, %v1651_v30  ;;  %v1869_v30 = vrot.slane %v1867_v14, 1 }
 0x4a3   : > { %5313 = vmatmul.msk.bf16.vlgmr.msrb.gmra.mxu1 %vm542_vm1, %v1652_v31 }
 0x4a5   : > { %1065 = vrot.lane.b32.xlu0 %v6571_v12, %s7540_s30  ;;  %v6021_v12 = vld [vmem:[%s7489_s5 + $0xa0] sm:$0xff] }
 0x4a6   : > { %1887 = vmatpush.bf16.msra.mxu1 %v6021_v12 }
 0x4ad   : > { %1237 = vrot.lane.b32.xlu0 %v6606_v27, %s7541_s0 }
 0x4b5   : > { %1575 = vrot.lane.b32.xlu0 %v1561_v33, %s7543_s2 }
 0x50f   : > { %v6686_v36 = vpop.permute.xlu0 %1941 }
 0x517   : > { %v1066_v27 = vpop.permute.xlu0 %1065 }
 0x518   : > { %1072 = vst.msk [vmem:[#allocation4] sm:$0xff] %vm1071_vm7, %v1066_v27 }
 0x519   : > { %v1627_v33 = vpop.f32.mrf.mxu0 }
 0x520   : > { %v1671_v39 = vpop.f32.mrf.mxu1 }
 0x521   : > { %v1672_v40 = vadd.f32 %v1671_v39, %v1627_v33  ;;  %v1629_v46 = vpop.f32.mrf.mxu0 }
 0x523   : > { %v1719_v42 = vpop.f32.mrf.mxu2 }
 0x524   : > { %v1724_v44 = vadd.f32 %v1719_v42, %v1672_v40 }
 0x526   : > { %v6701_v45 = vadd.f32 %v6193_v41, %v1724_v44  ;;  %v727_v44 = vsel %vm542_vm1, %v6491_v15, 0.0 }
 0x528   : > { %v1760_v48 = vadd.f32 %v1755_v32, %v6701_v45  ;;  %v1673_v49 = vpop.f32.mrf.mxu1  ;;  %v1733_v56 = vsel %vm542_vm1, %v6701_v45, 0.0 }
 0x529   : > { %v1674_v50 = vadd.f32 %v1673_v49, %v1629_v46  ;;  %v726_v46 = vsel %vm542_vm1, %v6482_v9, 0.0 }
 0x52a   : > { %v1762_v51 = vpack.c.bf16 %v1760_v48, %v1760_v48  ;;  %v728_v48 = vadd.f32 %v727_v44, %v726_v46 }
 0x52b   : > { %v1721_v52 = vpop.f32.mrf.mxu2 }
 0x52c   : > { %1764 = vst.msk [vmem:[#allocation3 + $0x4] sm:$0xf] %vm493_vm0, %v1762_v51  ;;  %v1725_v53 = vadd.f32 %v1721_v52, %v1674_v50  ;;  %v729_v49 = vrot.slane %v728_v48, 4 }
 0x52e   : > { %v1732_v54 = vadd.f32 %v6193_v41, %v1725_v53  ;;  %v730_v50 = vadd.f32 %v729_v49, %v728_v48 }
 0x530   : > { %v1734_v57 = vsel %vm542_vm1, %v1732_v54, 0.0  ;;  %v1761_v58 = vadd.f32 %v1757_v55, %v1732_v54  ;;  %1747 = vrot.lane.b32.xlu0 %v1732_v54, %s7544_s3  ;;  %v731_v51 = vrot.slane %v730_v50, 2  ;;  %v1926_v54 = vpop.permute.xlu2 %1925  ;;  %v1934_v55 = vpop.permute.xlu1 %1933 }
 0x531   : > { %v1735_v60 = vadd.f32 %v1734_v57, %v1733_v56 }
 0x532   : > { %v1763_v62 = vpack.c.bf16 %v1761_v58, %v1761_v58  ;;  %v732_v52 = vadd.f32 %v731_v51, %v730_v50 }
 0x533   : > { %v1736_v63 = vrot.slane %v1735_v60, 4  ;;  %v1767_v0 = vld [vmem:[#allocation3 + $0x4] sm:$0xf] }
 0x534   : > { %1765 = vst.msk [vmem:[#allocation3 + $0x8] sm:$0xf] %vm493_vm0, %v1763_v62  ;;  %v1776_v2 = vunpack.c.l.b16 %v1767_v0  ;;  %v733_v53 = vrot.slane %v732_v52, 1  ;;  %v1238_v0 = vpop.permute.xlu0 %1237 }
 0x535   : > { %v1737_v4 = vadd.f32 %v1736_v63, %v1735_v60 }
 0x536   : > { %v1804_v7 = vpack.c.b16 %v1776_v2, %v1803_v3 }
 0x537   : > { %v1738_v5 = vrot.slane %v1737_v4, 2 }
 0x538   : > { %v1807_v18 = vshrl.u32 %v1804_v7, 16  ;;  %v1810_v19 = vshll.u32 %v1804_v7, 16  ;;  %v1938_v56 = vpop.permute.xlu2 %1937 }
 0x539   : > { %v1739_v8 = vadd.f32 %v1738_v5, %v1737_v4  ;;  %v6194_v4 = vld [vmem:[%s7490_s6 + $0x6] ss:$0 sm:$0xff] }
 0x53a   : > { %v1809_v31 = vrot.slane %v1807_v18, 3  ;;  %v1812_v32 = vrot.slane %v1810_v19, 4 }
 0x53b   : > { %v1768_v10 = vld [vmem:[#allocation3 + $0x8] sm:$0xf]  ;;  %v1740_v11 = vrot.slane %v1739_v8, 1 }
 0x53c   : > { %v6020_v13 = vld [vmem:[#allocation3 + $0x4] sm:$0xff]  ;;  %v1777_v16 = vunpack.c.l.b16 %v1768_v10  ;;  %v1813_v40 = vor.u32 %v1812_v32, %v1809_v31  ;;  %v6027_v31 = vld [vmem:[%s7491_s7 + $0x28] sm:$0xff]  ;;  %v6026_v32 = vld [vmem:[%s7491_s7 + $0x20] sm:$0xff] }
 0x53d   : > { %v1741_v20 = vadd.f32 %v1740_v11, %v1739_v8  ;;  %v1862_v22 = vshll.u32 %v6020_v13, 16  ;;  %v1860_v28 = vshrl.u32 %v6020_v13, 16 }
 0x53e   : > { %v1778_v23 = vpack.c.b16 %v1777_v16, %v1776_v2  ;;  %v1805_v24 = vpack.c.b16 %v1777_v16, %v1777_v16 }
 0x53f   : > { %v1742_v26 = vmul.f32 %v1741_v20, %v6550_v47  ;;  %v1864_v29 = vrot.slane %v1862_v22, 1 }
 0x540   : > { %5334 = vmatmul.msk.bf16.vlgmr.msrb.gmra.mxu3 %vm542_vm1, %v1778_v23  ;;  %v1815_v37 = vshrl.u32 %v1805_v24, 16  ;;  %v1818_v38 = vshll.u32 %v1805_v24, 16 }
 0x541   : > { %1945 = vrot.lane.b32.xlu1 %v1742_v26, %s7545_s26  ;;  %v1865_v12 = vor.u32 %v1864_v29, %v1860_v28  ;;  %v6029_v29 = vld [vmem:[%s7491_s7 + $0x38] sm:$0xff] }
 0x542   : > { %v1817_v27 = vrot.slane %v1815_v37, 3  ;;  %v1820_v33 = vrot.slane %v1818_v38, 4  ;;  %2031 = vmatpush.bf16.msra.mxu2 %v6029_v29  ;;  %v6025_v37 = vld [vmem:[%s7491_s7 + $0x18] sm:$0xff]  ;;  %v6024_v38 = vld [vmem:[%s7491_s7 + $0x10] sm:$0xff] }
 0x543   : > { %v1870_v39 = vsel %vm631_vm4, %v1865_v12, %v1869_v30  ;;  %v6028_v30 = vld [vmem:[%s7491_s7 + $0x30] sm:$0xff] }
 0x544   : > { %5350 = vmatmul.msk.bf16.vlgmr.msra.gmra.mxu1 %vm542_vm1, %v1870_v39  ;;  %v1821_v41 = vor.u32 %v1820_v33, %v1817_v27  ;;  %v6031_v33 = vld [vmem:[%s7493_s9 + $0x8] sm:$0xff]  ;;  %v6030_v39 = vld [vmem:[%s7493_s9] sm:$0xff] }
 0x545   : > { %2072 = vmatpush.bf16.msra.mxu3 %v6031_v33 }
 0x546   : > { %v1822_v42 = vsel %vm518_vm3, %v1813_v40, %v1821_v41  ;;  %2032 = vmatpush.bf16.msra.mxu2 %v6028_v30  ;;  %v2220_v30 = vld [vmem:[#allocation3 + $0xc] sm:$0x1] }
 0x547   : > { %5339 = vmatmul.msk.bf16.vlgmr.msra.gmra.mxu0 %vm542_vm1, %v1822_v42  ;;  %v1576_v42 = vpop.permute.xlu0 %1575 }
 0x549   : > { %1067 = vrot.lane.b32.xlu1 %v6575_v21, %s7540_s30  ;;  %v734_v21 = vadd.f32 %v733_v53, %v732_v52  ;;  %2073 = vmatpush.bf16.msra.mxu3 %v6030_v39  ;;  %v1982_v52 = vld [vmem:[%s7492_s8] sm:$0x1] }
 0x54a   : > { %2033 = vmatpush.bf16.msra.mxu2 %v6027_v31 }
 0x54e   : > { %2034 = vmatpush.bf16.msra.mxu2 %v6026_v32 }
 0x551   : > { %1405 = vrot.lane.b32.xlu1 %v6633_v25, %s7542_s1  ;;  %v742_v25 = vmul.f32 %v6550_v47, %v734_v21 }
 0x552   : > { %2035 = vmatpush.bf16.msra.mxu2 %v6025_v37  ;;  %v2228_v37 = vunpack.c.l.b16 %v2220_v30 }
 0x556   : > { %2036 = vmatpush.bf16.msra.mxu2 %v6024_v38  ;;  %v2230_v38 = vpack.c.b16 %v2228_v37, %v2228_v37 }
 0x558   : > { %v2239_v33 = vshll.u32 %v2230_v38, 16 }
 0x559   : > { %1577 = vrot.lane.b32.xlu1 %v6665_v43, %s7543_s2  ;;  %v1952_v43 = vsel %vm542_vm1, %v742_v25, %v1926_v54 }
 0x55a   : > { %v1954_v57 = vsel %vm1953_vm8, %v1952_v43, %v6684_v34  ;;  %v2050_v43 = vld [vmem:[%s7494_s10] sm:$0x1] }
 0x55b   : > { %v1956_v58 = vsel %vm1955_vm9, %v1954_v57, %v1934_v55 }
 0x55c   : > { %v1958_v59 = vsel %vm1957_vm10, %v1956_v58, %v1938_v56 }
 0x55d   : > { %v1960_v60 = vsel %vm1959_vm11, %v1958_v59, %v6686_v36  ;;  %v6195_v59 = vld [vmem:[%s7496_s12] ss:$0 sm:$0xff] }
 0x5a2   : > { %v1748_v48 = vpop.permute.xlu0 %1747 }
 0x5b3   : > { %v1946_v61 = vpop.permute.xlu1 %1945 }
 0x5b4   : > { %v1962_v62 = vsel %vm7523_vm12, %v1960_v60, %v1946_v61 }
 0x5bb   : > { %v1068_v63 = vpop.permute.xlu1 %1067 }
 0x5bc   : > { %1073 = vst.msk [vmem:[#allocation4 + $0x8] sm:$0xff] %vm1071_vm7, %v1068_v63 }
 0x5bd   : > { %1243 = vst.msk [vmem:[#allocation4 + $0x8] sm:$0xff] %vm1241_vm13, %v1238_v0 }
 0x5c1   : > { %v1889_v1 = vpop.f32.mrf.mxu1 }
 0x5c3   : > { %v1797_v34 = vpop.f32.mrf.mxu3  ;;  %v1406_v40 = vpop.permute.xlu1 %1405 }
 0x5c4   : > { %v1841_v2 = vpop.f32.mrf.mxu0 }
 0x5c5   : > { %v1842_v3 = vadd.f32 %v1841_v2, %v1797_v34 }
 0x5c7   : > { %v1894_v5 = vadd.f32 %v1889_v1, %v1842_v3 }
 0x5c9   : > { %v1901_v36 = vadd.f32 %v6194_v4, %v1894_v5  ;;  %v1891_v10 = vpop.f32.mrf.mxu1 }
 0x5cb   : > { %1915 = vrot.lane.b32.xlu1 %v1901_v36, %s7545_s26  ;;  %v1799_v6 = vpop.f32.mrf.mxu3  ;;  %v1903_v14 = vsel %vm542_vm1, %v1901_v36, 0.0  ;;  %v1578_v46 = vpop.permute.xlu1 %1577  ;;  %v2098_v36 = vld [vmem:[%s7495_s11] sm:$0x1] }
 0x5cc   : > { %v1843_v7 = vpop.f32.mrf.mxu0 }
 0x5cd   : > { %v1844_v8 = vadd.f32 %v1843_v7, %v1799_v6 }
 0x5cf   : > { %v1895_v11 = vadd.f32 %v1891_v10, %v1844_v8 }
 0x5d1   : > { %v1902_v13 = vadd.f32 %v6194_v4, %v1895_v11 }
 0x5d3   : > { %v1904_v16 = vsel %vm542_vm1, %v1902_v13, 0.0  ;;  %2119 = vrot.lane.b32.xlu1 %v6195_v59, %s7546_s16 }
 0x5d4   : > { %v1905_v18 = vadd.f32 %v1904_v16, %v1903_v14 }
 0x5d6   : > { %v1906_v19 = vrot.slane %v1905_v18, 4 }
 0x5d8   : > { %v1907_v20 = vadd.f32 %v1906_v19, %v1905_v18  ;;  %v6035_v18 = vld [vmem:[%s7489_s5 + $0xb8] sm:$0xff]  ;;  %v6033_v19 = vld [vmem:[%s7489_s5 + $0xb0] sm:$0xff] }
 0x5d9   : > { %2259 = vmatpush.bf16.msrb.mxu3 %v6035_v18  ;;  %2167 = vmatpush.bf16.msrb.mxu0 %v6033_v19 }
 0x5da   : > { %v1908_v22 = vrot.slane %v1907_v20, 2 }
 0x5dc   : > { %v1909_v23 = vadd.f32 %v1908_v22, %v1907_v20  ;;  %v6032_v20 = vld [vmem:[%s7489_s5 + $0xa8] sm:$0xff] }
 0x5dd   : > { %2211 = vmatpush.bf16.msrb.mxu1 %v6032_v20 }
 0x5de   : > { %v1910_v24 = vrot.slane %v1909_v23, 1 }
 0x5e0   : > { %v1911_v26 = vadd.f32 %v1910_v24, %v1909_v23 }
 0x5e2   : > { %v1912_v28 = vmul.f32 %v1911_v26, %v6550_v47 }
 0x5e4   : > { %1949 = vrot.lane.b32.xlu2 %v1912_v28, %s7546_s16 }
 0x5ec   : > { %1235 = vrot.lane.b32.xlu2 %v6602_v17, %s7541_s0  ;;  %v6023_v17 = vld [vmem:[%s7491_s7 + $0x8] sm:$0xff] }
 0x5ed   : > { %2037 = vmatpush.bf16.msra.mxu2 %v6023_v17  ;;  %v2138_v17 = vld [vmem:[#allocation3] sm:$0x8] }
 0x5f4   : > { %1407 = vrot.lane.b32.xlu2 %v6637_v35, %s7542_s1  ;;  %v6022_v35 = vld [vmem:[%s7491_s7] sm:$0xff] }
 0x5f5   : > { %2038 = vmatpush.bf16.msra.mxu2 %v6022_v35  ;;  %v2175_v35 = vunpack.c.l.b16 %v2138_v17 }
 0x5fc   : > { %1745 = vrot.lane.b32.xlu2 %v6701_v45, %s7544_s3 }
 0x604   : > { %1917 = vrot.lane.b32.xlu2 %v1902_v13, %s7545_s26 }
 0x63d   : > { %v1916_v50 = vpop.permute.xlu1 %1915 }
 0x63e   : > { %v1950_v12 = vpop.permute.xlu2 %1949 }
 0x63f   : > { %v6778_v27 = vsel %vm7522_vm14, %v1962_v62, %v1950_v12 }
 0x640   : > { %v1965_v45 = vpack.c.bf16 %v6778_v27, %v6778_v27 }
 0x642   : > { %2039 = vmatmul.bf16.vlgmr.msra.gmra.mxu2 %v1965_v45 }
 0x645   : > { %v2120_v23 = vpop.permute.xlu1 %2119 }
 0x646   : > { %v1236_v41 = vpop.permute.xlu2 %1235 }
 0x647   : > { %1242 = vst.msk [vmem:[#allocation4] sm:$0xff] %vm1241_vm13, %v1236_v41 }
 0x648   : > { %1412 = vst.msk [vmem:[#allocation4] sm:$0xff] %vm7521_vm15, %v1406_v40 }
 0x649   : > { %1582 = vst.msk [vmem:[#allocation4] sm:$0xff] %vm7520_vm2, %v1576_v42 }
 0x64e   : > { %v1408_v44 = vpop.permute.xlu2 %1407 }
 0x64f   : > { %1413 = vst.msk [vmem:[#allocation4 + $0x8] sm:$0xff] %vm7521_vm15, %v1408_v44 }
 0x650   : > { %1583 = vst.msk [vmem:[#allocation4 + $0x8] sm:$0xff] %vm7520_vm2, %v1578_v46 }
 0x651   : > { %1753 = vst.msk [vmem:[#allocation4 + $0x8] sm:$0xff] %vm7519_vm5, %v1748_v48  ;;  %v2241_v48 = vrot.slane %v2239_v33, 1 }
 0x656   : > { %v1746_v49 = vpop.permute.xlu2 %1745 }
 0x657   : > { %1752 = vst.msk [vmem:[#allocation4] sm:$0xff] %vm7519_vm5, %v1746_v49 }
 0x658   : > { %1922 = vst.msk [vmem:[#allocation4] sm:$0xff] %vm7518_vm6, %v1916_v50 }
 0x65e   : > { %v1918_v51 = vpop.permute.xlu2 %1917 }
 0x65f   : > { %1923 = vst.msk [vmem:[#allocation4 + $0x8] sm:$0xff] %vm7518_vm6, %v1918_v51 }
 0x6c5   : > { %v2040_v53 = vpop.f32.mrf.mxu2 }
 0x6c6   : > { %v2041_v54 = vadd.f32 %v2040_v53, %v1982_v52 }
 0x6c8   : > { %v2044_v21 = vmax.f32 %v2041_v54, 0.0 }
 0x6ca   : > { %v2045_v55 = vpack.c.bf16 %v2044_v21, %v2044_v21 }
 0x6cc   : > { %5392 = vmatmul.msk.bf16.vlgmr.msra.gmra.mxu3 %vm1953_vm8, %v2045_v55 }
 0x6cd   : > { %v2042_v25 = vpop.f32.mrf.mxu2 }
 0x74f   : > { %v2075_v56 = vpop.f32.mrf.mxu3 }
 0x750   : > { %v2076_v57 = vadd.f32 %v2075_v56, %v2050_v43 }
 0x752   : > { %v5393_v58 = vmul.f32 -1.442695, %v2076_v57 }
 0x754   : > { %6213 = vpow2.f32 %v5393_v58 }
 0x757   : > { %v2077_v60 = vpop.f32.mrf.mxu3 }
 0x75a   : > { %v6214_v61 = vpop.eup %6213 }
 0x75b   : > { %v2082_v62 = vadd.f32 1.0, %v6214_v61 }
 0x75d   : > { %6215 = vrcp.f32 %v2082_v62  ;;  %v2094_v1 = vand.u32 2147483648, %v2082_v62  ;;  %v2092_v3 = vand.u32 2147483647, %v2082_v62  ;;  %vm2088_vm5 = vweird.f32 %v2082_v62 }
 0x75f   : > { %v2095_v5 = vor.u32 1.1754944e-38, %v2094_v1  ;;  %vm2093_vm15 = vcmp.eq.f32.partialorder %v2092_v3, 8.507059e+37  ;;  %v6196_v3 = vld [vmem:[%s7490_s6 + $0x7] ss:$0 sm:$0xff] }
 0x763   : > { %v6216_v63 = vpop.eup %6215 }
 0x764   : > { %v2084_v0 = vmul.f32 %v6216_v63, %v2082_v62  ;;  %vm2089_vm6 = vweird.f32 %v6216_v63  ;;  %v6039_v62 = vld [vmem:[%s7489_s5 + $0xd0] sm:$0xff] }
 0x765   : > { %vm2090_vm2 = vmor %vm2088_vm5, %vm2089_vm6  ;;  %2422 = vmatpush.bf16.msrb.mxu2 %v6039_v62  ;;  %vm7551_vm6 = vcmask 786048  }
 0x766   : > { %v2085_v34 = vsub.f32 1.0, %v2084_v0  ;;  %v6036_v0 = vld [vmem:[%s7489_s5 + $0xc0] sm:$0xff] }
 0x767   : > { %2374 = vmatpush.bf16.msra.mxu1 %v6036_v0 }
 0x768   : > { %v2086_v2 = vmul.f32 %v6216_v63, %v2085_v34 }
 0x76a   : > { %v2087_v4 = vadd.f32 %v6216_v63, %v2086_v2 }
 0x76c   : > { %v2091_v6 = vsel %vm2090_vm2, %v6216_v63, %v2087_v4  ;;  %v6037_v63 = vld [vmem:[%s7489_s5 + $0xc8] sm:$0xff] }
 0x76d   : > { %v2096_v7 = vsel %vm2093_vm15, %v2095_v5, %v2091_v6  ;;  %2330 = vmatpush.bf16.msra.mxu0 %v6037_v63  ;;  %vm7548_vm15 = vcmask 654848  }
 0x76e   : > { %v6811_v8 = vmul.f32 %v2098_v36, %v2096_v7  ;;  %vm7550_vm5 = vmmov %vm7548_vm15 }
 0x770   : > { %v2103_v10 = vperm.slane %v6811_v8, 0 }
 0x772   : > { %2114 = vrot.lane.b32.xlu0 %v2103_v10, %s7546_s16  ;;  %v2104_v11 = vmul.f32 %v2103_v10, %v6482_v9  ;;  %v2105_v13 = vmul.f32 %v2103_v10, %v6491_v15  ;;  %v2111_v9 = vld [vmem:[#allocation4] sm:$0xff]  ;;  %v2112_v15 = vld [vmem:[#allocation4 + $0x8] sm:$0xff] }
 0x774   : > { %v6817_v14 = vadd.f32 %v6195_v59, %v2104_v11  ;;  %v6819_v16 = vadd.f32 %v6195_v59, %v2105_v13 }
 0x7e4   : > { %v2115_v22 = vpop.permute.xlu0 %2114 }
 0x7e5   : > { %v2117_v24 = vmul.f32 %v2115_v22, %v2111_v9  ;;  %v2118_v26 = vmul.f32 %v2115_v22, %v2112_v15 }
 0x7e7   : > { %v2122_v28 = vadd.f32 %v2120_v23, %v2117_v24  ;;  %v2123_v29 = vadd.f32 %v2120_v23, %v2118_v26  ;;  %v2383_v26 = vld [vmem:[#allocation3 + $0xc] sm:$0x1] }
 0x7e8   : > { %v2391_v37 = vunpack.c.l.b16 %v2383_v26 }
 0x7e9   : > { %v2134_v31 = vpack.c.bf16 %v2122_v28, %v2122_v28  ;;  %v2135_v32 = vpack.c.bf16 %v2123_v29, %v2123_v29  ;;  %2291 = vrot.lane.b32.xlu0 %v2123_v29, %s7546_s16  ;;  %2458 = vrot.lane.b32.xlu1 %v2122_v28, %s7545_s26 }
 0x7ea   : > { %2289 = vrot.lane.b32.xlu2 %v2122_v28, %s7546_s16  ;;  %v2393_v33 = vpack.c.b16 %v2391_v37, %v2391_v37  ;;  %v2470_v37 = vld [vmem:[#allocation3] sm:$0x8] }
 0x7eb   : > { %2136 = vst.msk [vmem:[#allocation3 + $0x4] sm:$0xf] %vm493_vm0, %v2134_v31 }
 0x7ec   : > { %2137 = vst.msk [vmem:[#allocation3 + $0x8] sm:$0xf] %vm493_vm0, %v2135_v32 }
 0x7f1   : > { %2627 = vrot.lane.b32.xlu0 %v2122_v28, %s7544_s3  ;;  %2629 = vrot.lane.b32.xlu1 %v2123_v29, %s7544_s3 }
 0x7f2   : > { %2460 = vrot.lane.b32.xlu2 %v2123_v29, %s7545_s26  ;;  %v2139_v12 = vld [vmem:[#allocation3 + $0x4] sm:$0xf] }
 0x7f3   : > { %v2140_v45 = vld [vmem:[#allocation3 + $0x8] sm:$0xf]  ;;  %v2148_v39 = vunpack.c.l.b16 %v2139_v12 }
 0x7f4   : > { %v6034_v40 = vld [vmem:[#allocation3 + $0x4] sm:$0xff]  ;;  %v2149_v41 = vunpack.c.l.b16 %v2140_v45 }
 0x7f5   : > { %v2234_v42 = vshll.u32 %v6034_v40, 16  ;;  %v2176_v44 = vpack.c.b16 %v2148_v39, %v2175_v35  ;;  %v2232_v50 = vshrl.u32 %v6034_v40, 16 }
 0x7f6   : > { %v2150_v46 = vpack.c.b16 %v2149_v41, %v2148_v39  ;;  %v2177_v49 = vpack.c.b16 %v2149_v41, %v2149_v41 }
 0x7f7   : > { %v2236_v51 = vrot.slane %v2234_v42, 1  ;;  %v2179_v52 = vshrl.u32 %v2176_v44, 16  ;;  %v2182_v53 = vshll.u32 %v2176_v44, 16  ;;  %v2402_v44 = vshll.u32 %v2393_v33, 16 }
 0x7f8   : > { %5402 = vmatmul.msk.bf16.vlgmr.msrb.gmra.mxu0 %vm542_vm1, %v2150_v46  ;;  %v2187_v54 = vshrl.u32 %v2177_v49, 16  ;;  %v2190_v21 = vshll.u32 %v2177_v49, 16 }
 0x7f9   : > { %2798 = vrot.lane.b32.xlu0 %v2123_v29, %s7543_s2  ;;  %2965 = vrot.lane.b32.xlu1 %v2122_v28, %s7542_s1  ;;  %v2237_v55 = vor.u32 %v2236_v51, %v2232_v50  ;;  %v2181_v25 = vrot.slane %v2179_v52, 3  ;;  %v2184_v43 = vrot.slane %v2182_v53, 4 }
 0x7fa   : > { %2796 = vrot.lane.b32.xlu2 %v2122_v28, %s7543_s2  ;;  %v2189_v56 = vrot.slane %v2187_v54, 3  ;;  %v2192_v57 = vrot.slane %v2190_v21, 4 }
 0x7fb   : > { %v2242_v58 = vsel %vm631_vm4, %v2237_v55, %v2241_v48  ;;  %v2185_v59 = vor.u32 %v2184_v43, %v2181_v25  ;;  %v2404_v25 = vrot.slane %v2402_v44, 1 }
 0x7fc   : > { %5418 = vmatmul.msk.bf16.vlgmr.msrb.gmra.mxu3 %vm542_vm1, %v2242_v58  ;;  %v2193_v60 = vor.u32 %v2192_v57, %v2189_v56 }
 0x7fe   : > { %v2194_v61 = vsel %vm518_vm3, %v2185_v59, %v2193_v60 }
 0x7ff   : > { %5407 = vmatmul.msk.bf16.vlgmr.msrb.gmra.mxu1 %vm542_vm1, %v2194_v61 }
 0x801   : > { %3134 = vrot.lane.b32.xlu0 %v2122_v28, %s7541_s0  ;;  %3136 = vrot.lane.b32.xlu1 %v2123_v29, %s7541_s0 }
 0x802   : > { %2967 = vrot.lane.b32.xlu2 %v2123_v29, %s7542_s1  ;;  %v2301_v29 = vld [vmem:[#allocation3] sm:$0x8] }
 0x803   : > { %v2338_v17 = vunpack.c.l.b16 %v2301_v29 }
 0x844   : > { %v2290_v6 = vpop.permute.xlu2 %2289 }
 0x84c   : > { %v2461_v26 = vpop.permute.xlu2 %2460 }
 0x85b   : > { %v2292_v15 = vpop.permute.xlu0 %2291 }
 0x875   : > { %v2169_v34 = vpop.f32.mrf.mxu0 }
 0x87c   : > { %v2213_v1 = vpop.f32.mrf.mxu1 }
 0x87d   : > { %v2214_v2 = vadd.f32 %v2213_v1, %v2169_v34  ;;  %v2171_v7 = vpop.f32.mrf.mxu0  ;;  %v6041_v1 = vld [vmem:[%s7489_s5 + $0xe0] sm:$0xff] }
 0x87e   : > { %2499 = vmatpush.bf16.msra.mxu3 %v6041_v1 }
 0x87f   : > { %v2261_v4 = vpop.f32.mrf.mxu3 }
 0x880   : > { %v2266_v5 = vadd.f32 %v2261_v4, %v2214_v2  ;;  %v6040_v2 = vld [vmem:[%s7489_s5 + $0xd8] sm:$0xff] }
 0x881   : > { %2543 = vmatpush.bf16.msrb.mxu0 %v6040_v2 }
 0x882   : > { %v2273_v36 = vadd.f32 %v6196_v3, %v2266_v5 }
 0x884   : > { %v2295_v10 = vadd.f32 %v2290_v6, %v2273_v36  ;;  %2285 = vst.msk [vmem:[#allocation4] sm:$0xff] %vm542_vm1, %v2273_v36  ;;  %v2215_v11 = vpop.f32.mrf.mxu1  ;;  %v2275_v22 = vsel %vm542_vm1, %v2273_v36, 0.0  ;;  %v6197_v6 = vld [vmem:[%s7490_s6 + $0x8] ss:$0 sm:$0xff] }
 0x885   : > { %v2216_v13 = vadd.f32 %v2215_v11, %v2171_v7 }
 0x886   : > { %v2297_v18 = vpack.c.bf16 %v2295_v10, %v2295_v10 }
 0x887   : > { %v2263_v19 = vpop.f32.mrf.mxu3 }
 0x888   : > { %2299 = vst.msk [vmem:[#allocation3 + $0x4] sm:$0xf] %vm493_vm0, %v2297_v18  ;;  %v2267_v20 = vadd.f32 %v2263_v19, %v2216_v13  ;;  %v2459_v13 = vpop.permute.xlu1 %2458 }
 0x88a   : > { %v2274_v9 = vadd.f32 %v6196_v3, %v2267_v20  ;;  %v6043_v3 = vld [vmem:[%s7489_s5 + $0xe8] sm:$0xff] }
 0x88b   : > { %2591 = vmatpush.bf16.msrb.mxu1 %v6043_v3 }
 0x88c   : > { %v2276_v23 = vsel %vm542_vm1, %v2274_v9, 0.0  ;;  %v2296_v24 = vadd.f32 %v2292_v15, %v2274_v9  ;;  %2286 = vst.msk [vmem:[#allocation4 + $0x8] sm:$0xff] %vm542_vm1, %v2274_v9 }
 0x88d   : > { %v2277_v28 = vadd.f32 %v2276_v23, %v2275_v22 }
 0x88e   : > { %v2298_v30 = vpack.c.bf16 %v2296_v24, %v2296_v24 }
 0x88f   : > { %v2278_v31 = vrot.slane %v2277_v28, 4  ;;  %v2302_v32 = vld [vmem:[#allocation3 + $0x4] sm:$0xf] }
 0x890   : > { %2300 = vst.msk [vmem:[#allocation3 + $0x8] sm:$0xf] %vm493_vm0, %v2298_v30  ;;  %v2311_v38 = vunpack.c.l.b16 %v2302_v32 }
 0x891   : > { %v2279_v35 = vadd.f32 %v2278_v31, %v2277_v28  ;;  %v2552_v31 = vld [vmem:[#allocation3 + $0xc] sm:$0x1] }
 0x892   : > { %v2339_v45 = vpack.c.b16 %v2311_v38, %v2338_v17 }
 0x893   : > { %v2280_v12 = vrot.slane %v2279_v35, 2 }
 0x894   : > { %v2342_v48 = vshrl.u32 %v2339_v45, 16  ;;  %v2345_v49 = vshll.u32 %v2339_v45, 16  ;;  %v2507_v45 = vunpack.c.l.b16 %v2470_v37  ;;  %v2630_v37 = vpop.permute.xlu1 %2629 }
 0x895   : > { %v2281_v39 = vadd.f32 %v2280_v12, %v2279_v35  ;;  %v2560_v12 = vunpack.c.l.b16 %v2552_v31 }
 0x896   : > { %v2344_v43 = vrot.slane %v2342_v48, 3  ;;  %v2347_v56 = vrot.slane %v2345_v49, 4 }
 0x897   : > { %v2303_v40 = vld [vmem:[#allocation3 + $0x8] sm:$0xf]  ;;  %v2282_v41 = vrot.slane %v2281_v39, 1 }
 0x898   : > { %v6038_v42 = vld [vmem:[#allocation3 + $0x4] sm:$0xff]  ;;  %v2312_v46 = vunpack.c.l.b16 %v2303_v40  ;;  %v2348_v63 = vor.u32 %v2347_v56, %v2344_v43 }
 0x899   : > { %v2283_v50 = vadd.f32 %v2282_v41, %v2281_v39  ;;  %v2397_v51 = vshll.u32 %v6038_v42, 16  ;;  %v2395_v21 = vshrl.u32 %v6038_v42, 16  ;;  %v2562_v41 = vpack.c.b16 %v2560_v12, %v2560_v12  ;;  %v2721_v12 = vld [vmem:[#allocation3 + $0xc] sm:$0x1] }
 0x89a   : > { %v2313_v52 = vpack.c.b16 %v2312_v46, %v2311_v38  ;;  %v2340_v53 = vpack.c.b16 %v2312_v46, %v2312_v46 }
 0x89b   : > { %v2284_v54 = vmul.f32 %v2283_v50, %v6550_v47  ;;  %v2399_v55 = vrot.slane %v2397_v51, 1  ;;  %v2571_v50 = vshll.u32 %v2562_v41, 16 }
 0x89c   : > { %5428 = vmatmul.msk.bf16.vlgmr.msra.gmra.mxu0 %vm542_vm1, %v2313_v52  ;;  %v2350_v57 = vshrl.u32 %v2340_v53, 16  ;;  %v2353_v58 = vshll.u32 %v2340_v53, 16 }
 0x89d   : > { %3304 = vrot.lane.b32.xlu2 %v2284_v54, %s7540_s30  ;;  %v2400_v59 = vor.u32 %v2399_v55, %v2395_v21 }
 0x89e   : > { %v2352_v60 = vrot.slane %v2350_v57, 3  ;;  %v2355_v61 = vrot.slane %v2353_v58, 4  ;;  %v2573_v58 = vrot.slane %v2571_v50, 1 }
 0x89f   : > { %v2405_v62 = vsel %vm631_vm4, %v2400_v59, %v2404_v25 }
 0x8a0   : > { %5444 = vmatmul.msk.bf16.vlgmr.msrb.gmra.mxu2 %vm542_vm1, %v2405_v62  ;;  %v2356_v0 = vor.u32 %v2355_v61, %v2352_v60 }
 0x8a2   : > { %v2357_v34 = vsel %vm518_vm3, %v2348_v63, %v2356_v0 }
 0x8a3   : > { %5433 = vmatmul.msk.bf16.vlgmr.msra.gmra.mxu1 %vm542_vm1, %v2357_v34 }
 0x919   : > { %v2332_v4 = vpop.f32.mrf.mxu0 }
 0x920   : > { %v2376_v5 = vpop.f32.mrf.mxu1 }
 0x921   : > { %v2377_v36 = vadd.f32 %v2376_v5, %v2332_v4  ;;  %v2334_v18 = vpop.f32.mrf.mxu0  ;;  %v6045_v5 = vld [vmem:[%s7489_s5 + $0xf8] sm:$0xff] }
 0x922   : > { %2668 = vmatpush.bf16.msra.mxu2 %v6045_v5 }
 0x923   : > { %v2424_v7 = vpop.f32.mrf.mxu2 }
 0x924   : > { %v2429_v10 = vadd.f32 %v2424_v7, %v2377_v36  ;;  %v6044_v36 = vld [vmem:[%s7489_s5 + $0xf0] sm:$0xff] }
 0x925   : > { %2712 = vmatpush.bf16.msrb.mxu3 %v6044_v36 }
 0x926   : > { %v6886_v11 = vadd.f32 %v6197_v6, %v2429_v10 }
 0x928   : > { %v2464_v19 = vadd.f32 %v2459_v13, %v6886_v11  ;;  %v2378_v20 = vpop.f32.mrf.mxu1  ;;  %v2438_v28 = vsel %vm542_vm1, %v6886_v11, 0.0 }
 0x929   : > { %v2379_v9 = vadd.f32 %v2378_v20, %v2334_v18 }
 0x92a   : > { %v2466_v15 = vpack.c.bf16 %v2464_v19, %v2464_v19  ;;  %v6198_v19 = vld [vmem:[%s7490_s6 + $0x9] ss:$0 sm:$0xff] }
 0x92b   : > { %v2426_v22 = vpop.f32.mrf.mxu2 }
 0x92c   : > { %2468 = vst.msk [vmem:[#allocation3 + $0x4] sm:$0xf] %vm493_vm0, %v2466_v15  ;;  %v2430_v23 = vadd.f32 %v2426_v22, %v2379_v9  ;;  %v2628_v15 = vpop.permute.xlu0 %2627 }
 0x92e   : > { %v6890_v24 = vadd.f32 %v6197_v6, %v2430_v23  ;;  %v6047_v6 = vld [vmem:[%s7489_s5 + $0x100] sm:$0xff] }
 0x92f   : > { %2760 = vmatpush.bf16.msra.mxu0 %v6047_v6 }
 0x930   : > { %v2439_v29 = vsel %vm542_vm1, %v6890_v24, 0.0  ;;  %v2465_v30 = vadd.f32 %v2461_v26, %v6890_v24 }
 0x931   : > { %v2440_v32 = vadd.f32 %v2439_v29, %v2438_v28 }
 0x932   : > { %v2467_v38 = vpack.c.bf16 %v2465_v30, %v2465_v30 }
 0x933   : > { %v2441_v17 = vrot.slane %v2440_v32, 4  ;;  %v2471_v35 = vld [vmem:[#allocation3 + $0x4] sm:$0xf] }
 0x934   : > { %2469 = vst.msk [vmem:[#allocation3 + $0x8] sm:$0xf] %vm493_vm0, %v2467_v38  ;;  %v2480_v33 = vunpack.c.l.b16 %v2471_v35 }
 0x935   : > { %v2442_v39 = vadd.f32 %v2441_v17, %v2440_v32 }
 0x936   : > { %v2508_v42 = vpack.c.b16 %v2480_v33, %v2507_v45  ;;  %v2639_v45 = vld [vmem:[#allocation3] sm:$0x8] }
 0x937   : > { %v2443_v40 = vrot.slane %v2442_v39, 2 }
 0x938   : > { %v2511_v52 = vshrl.u32 %v2508_v42, 16  ;;  %v2514_v53 = vshll.u32 %v2508_v42, 16  ;;  %v2729_v42 = vunpack.c.l.b16 %v2721_v12 }
 0x939   : > { %v2444_v44 = vadd.f32 %v2443_v40, %v2442_v39 }
 0x93a   : > { %v2513_v59 = vrot.slane %v2511_v52, 3  ;;  %v2516_v60 = vrot.slane %v2514_v53, 4  ;;  %v2731_v50 = vpack.c.b16 %v2729_v42, %v2729_v42 }
 0x93b   : > { %v2472_v46 = vld [vmem:[#allocation3 + $0x8] sm:$0xf]  ;;  %v2445_v48 = vrot.slane %v2444_v44, 1 }
 0x93c   : > { %v6042_v49 = vld [vmem:[#allocation3 + $0x4] sm:$0xff]  ;;  %v2481_v51 = vunpack.c.l.b16 %v2472_v46  ;;  %v2517_v2 = vor.u32 %v2516_v60, %v2513_v59  ;;  %v2676_v46 = vunpack.c.l.b16 %v2639_v45 }
 0x93d   : > { %v2446_v54 = vadd.f32 %v2445_v48, %v2444_v44  ;;  %v2566_v21 = vshll.u32 %v6042_v49, 16  ;;  %v2564_v56 = vshrl.u32 %v6042_v49, 16 }
 0x93e   : > { %v2482_v55 = vpack.c.b16 %v2481_v51, %v2480_v33  ;;  %v2509_v25 = vpack.c.b16 %v2481_v51, %v2481_v51 }
 0x93f   : > { %v2447_v43 = vmul.f32 %v2446_v54, %v6550_v47  ;;  %v2568_v57 = vrot.slane %v2566_v21, 1 }
 0x940   : > { %5454 = vmatmul.msk.bf16.vlgmr.msra.gmra.mxu3 %vm542_vm1, %v2482_v55  ;;  %v2519_v61 = vshrl.u32 %v2509_v25, 16  ;;  %v2522_v62 = vshll.u32 %v2509_v25, 16  ;;  %v2740_v55 = vshll.u32 %v2731_v50, 16 }
 0x941   : > { %3308 = vrot.lane.b32.xlu0 %v2447_v43, %s7541_s0  ;;  %v2569_v63 = vor.u32 %v2568_v57, %v2564_v56 }
 0x942   : > { %v2521_v0 = vrot.slane %v2519_v61, 3  ;;  %v2524_v34 = vrot.slane %v2522_v62, 4 }
 0x943   : > { %v2574_v1 = vsel %vm631_vm4, %v2569_v63, %v2573_v58 }
 0x944   : > { %5470 = vmatmul.msk.bf16.vlgmr.msrb.gmra.mxu1 %vm542_vm1, %v2574_v1  ;;  %v2525_v3 = vor.u32 %v2524_v34, %v2521_v0  ;;  %v2742_v0 = vrot.slane %v2740_v55, 1 }
 0x946   : > { %v2526_v4 = vsel %vm518_vm3, %v2517_v2, %v2525_v3 }
 0x947   : > { %5459 = vmatmul.msk.bf16.vlgmr.msrb.gmra.mxu0 %vm542_vm1, %v2526_v4 }
 0x9c1   : > { %v2593_v10 = vpop.f32.mrf.mxu1 }
 0x9c3   : > { %v2501_v7 = vpop.f32.mrf.mxu3 }
 0x9c4   : > { %v2545_v13 = vpop.f32.mrf.mxu0 }
 0x9c5   : > { %v2546_v18 = vadd.f32 %v2545_v13, %v2501_v7 }
 0x9c7   : > { %v2598_v20 = vadd.f32 %v2593_v10, %v2546_v18  ;;  %v6048_v18 = vld [vmem:[%s7489_s5 + $0x108] sm:$0xff] }
 0x9c8   : > { %2881 = vmatpush.bf16.msrb.mxu2 %v6048_v18 }
 0x9c9   : > { %v6917_v9 = vadd.f32 %v6198_v19, %v2598_v20  ;;  %v2595_v30 = vpop.f32.mrf.mxu1  ;;  %v6049_v20 = vld [vmem:[%s7489_s5 + $0x110] sm:$0xff] }
 0x9ca   : > { %2837 = vmatpush.bf16.msra.mxu1 %v6049_v20 }
 0x9cb   : > { %v2633_v22 = vadd.f32 %v2628_v15, %v6917_v9  ;;  %v2503_v23 = vpop.f32.mrf.mxu3  ;;  %v2607_v38 = vsel %vm542_vm1, %v6917_v9, 0.0 }
 0x9cc   : > { %v2547_v26 = vpop.f32.mrf.mxu0 }
 0x9cd   : > { %v2635_v28 = vpack.c.bf16 %v2633_v22, %v2633_v22  ;;  %v2548_v29 = vadd.f32 %v2547_v26, %v2503_v23 }
 0x9cf   : > { %2637 = vst.msk [vmem:[#allocation3 + $0x4] sm:$0xf] %vm493_vm0, %v2635_v28  ;;  %v2599_v31 = vadd.f32 %v2595_v30, %v2548_v29  ;;  %v6199_v28 = vld [vmem:[%s7490_s6 + $0xa] ss:$0 sm:$0xff] }
 0x9d1   : > { %v6921_v32 = vadd.f32 %v6198_v19, %v2599_v31  ;;  %v6051_v19 = vld [vmem:[%s7489_s5 + $0x118] sm:$0xff]  ;;  %v2797_v31 = vpop.permute.xlu2 %2796 }
 0x9d2   : > { %2929 = vmatpush.bf16.msra.mxu3 %v6051_v19 }
 0x9d3   : > { %v2608_v17 = vsel %vm542_vm1, %v6921_v32, 0.0  ;;  %v2634_v35 = vadd.f32 %v2630_v37, %v6921_v32 }
 0x9d4   : > { %v2609_v33 = vadd.f32 %v2608_v17, %v2607_v38 }
 0x9d5   : > { %v2636_v39 = vpack.c.bf16 %v2634_v35, %v2634_v35 }
 0x9d6   : > { %v2640_v40 = vld [vmem:[#allocation3 + $0x4] sm:$0xf]  ;;  %v2610_v41 = vrot.slane %v2609_v33, 4 }
 0x9d7   : > { %2638 = vst.msk [vmem:[#allocation3 + $0x8] sm:$0xf] %vm493_vm0, %v2636_v39  ;;  %v2649_v44 = vunpack.c.l.b16 %v2640_v40  ;;  %v2799_v40 = vpop.permute.xlu0 %2798 }
 0x9d8   : > { %v2611_v48 = vadd.f32 %v2610_v41, %v2609_v33 }
 0x9d9   : > { %v2677_v51 = vpack.c.b16 %v2649_v44, %v2676_v46  ;;  %v2890_v46 = vld [vmem:[#allocation3 + $0xc] sm:$0x1] }
 0x9da   : > { %v2612_v49 = vrot.slane %v2611_v48, 2 }
 0x9db   : > { %v2680_v43 = vshrl.u32 %v2677_v51, 16  ;;  %v2683_v56 = vshll.u32 %v2677_v51, 16 }
 0x9dc   : > { %v2613_v52 = vadd.f32 %v2612_v49, %v2611_v48  ;;  %v2808_v49 = vld [vmem:[#allocation3] sm:$0x8] }
 0x9dd   : > { %v2682_v34 = vrot.slane %v2680_v43, 3  ;;  %v2685_v1 = vrot.slane %v2683_v56, 4 }
 0x9de   : > { %v2641_v53 = vld [vmem:[#allocation3 + $0x8] sm:$0xf]  ;;  %v2614_v54 = vrot.slane %v2613_v52, 1 }
 0x9df   : > { %v6046_v21 = vld [vmem:[#allocation3 + $0x4] sm:$0xff]  ;;  %v2650_v25 = vunpack.c.l.b16 %v2641_v53  ;;  %v2686_v7 = vor.u32 %v2685_v1, %v2682_v34  ;;  %v2898_v53 = vunpack.c.l.b16 %v2890_v46 }
 0x9e0   : > { %v2615_v57 = vadd.f32 %v2614_v54, %v2613_v52  ;;  %v2735_v58 = vshll.u32 %v6046_v21, 16  ;;  %v2733_v62 = vshrl.u32 %v6046_v21, 16  ;;  %v2845_v21 = vunpack.c.l.b16 %v2808_v49 }
 0x9e1   : > { %v2651_v59 = vpack.c.b16 %v2650_v25, %v2649_v44  ;;  %v2678_v60 = vpack.c.b16 %v2650_v25, %v2650_v25  ;;  %v2900_v43 = vpack.c.b16 %v2898_v53, %v2898_v53  ;;  %v2968_v53 = vpop.permute.xlu2 %2967 }
 0x9e2   : > { %v2616_v61 = vmul.f32 %v2615_v57, %v6550_v47  ;;  %v2737_v63 = vrot.slane %v2735_v58, 1 }
 0x9e3   : > { %5480 = vmatmul.msk.bf16.vlgmr.msra.gmra.mxu2 %vm542_vm1, %v2651_v59  ;;  %v2688_v2 = vshrl.u32 %v2678_v60, 16  ;;  %v2691_v3 = vshll.u32 %v2678_v60, 16 }
 0x9e4   : > { %3312 = vrot.lane.b32.xlu1 %v2616_v61, %s7542_s1  ;;  %v2738_v4 = vor.u32 %v2737_v63, %v2733_v62  ;;  %v2909_v61 = vshll.u32 %v2900_v43, 16 }
 0x9e5   : > { %v2690_v5 = vrot.slane %v2688_v2, 3  ;;  %v2693_v36 = vrot.slane %v2691_v3, 4 }
 0x9e6   : > { %v2743_v6 = vsel %vm631_vm4, %v2738_v4, %v2742_v0 }
 0x9e7   : > { %5496 = vmatmul.msk.bf16.vlgmr.msra.gmra.mxu0 %vm542_vm1, %v2743_v6  ;;  %v2694_v10 = vor.u32 %v2693_v36, %v2690_v5  ;;  %v2911_v6 = vrot.slane %v2909_v61, 1 }
 0x9e9   : > { %v2695_v13 = vsel %vm518_vm3, %v2686_v7, %v2694_v10 }
 0x9ea   : > { %5485 = vmatmul.msk.bf16.vlgmr.msrb.gmra.mxu3 %vm542_vm1, %v2695_v13 }
 0xa64   : > { %v2762_v22 = vpop.f32.mrf.mxu0 }
 0xa66   : > { %v2670_v15 = vpop.f32.mrf.mxu2 }
 0xa6c   : > { %v2764_v33 = vpop.f32.mrf.mxu0 }
 0xa6d   : > { %v2714_v23 = vpop.f32.mrf.mxu3 }
 0xa6e   : > { %v2715_v26 = vadd.f32 %v2714_v23, %v2670_v15  ;;  %v2672_v38 = vpop.f32.mrf.mxu2 }
 0xa70   : > { %v2767_v29 = vadd.f32 %v2762_v22, %v2715_v26 }
 0xa72   : > { %v6948_v30 = vadd.f32 %v6199_v28, %v2767_v29  ;;  %v6055_v29 = vld [vmem:[%s7489_s5 + $0x130] sm:$0xff] }
 0xa73   : > { %3098 = vmatpush.bf16.msra.mxu2 %v6055_v29 }
 0xa74   : > { %v2802_v37 = vadd.f32 %v2797_v31, %v6948_v30  ;;  %v2776_v41 = vsel %vm542_vm1, %v6948_v30, 0.0  ;;  %v6053_v31 = vld [vmem:[%s7489_s5 + $0x128] sm:$0xff] }
 0xa75   : > { %v2716_v17 = vpop.f32.mrf.mxu3  ;;  %3006 = vmatpush.bf16.msrb.mxu0 %v6053_v31 }
 0xa76   : > { %v2804_v35 = vpack.c.bf16 %v2802_v37, %v2802_v37  ;;  %v2717_v12 = vadd.f32 %v2716_v17, %v2672_v38  ;;  %v6052_v37 = vld [vmem:[%s7489_s5 + $0x120] sm:$0xff] }
 0xa77   : > { %3050 = vmatpush.bf16.msrb.mxu1 %v6052_v37 }
 0xa78   : > { %2806 = vst.msk [vmem:[#allocation3 + $0x4] sm:$0xf] %vm493_vm0, %v2804_v35  ;;  %v2768_v45 = vadd.f32 %v2764_v33, %v2717_v12  ;;  %v6200_v33 = vld [vmem:[%s7490_s6 + $0xb] ss:$0 sm:$0xff] }
 0xa7a   : > { %v6952_v39 = vadd.f32 %v6199_v28, %v2768_v45 }
 0xa7c   : > { %v2777_v42 = vsel %vm542_vm1, %v6952_v39, 0.0  ;;  %v2803_v44 = vadd.f32 %v2799_v40, %v6952_v39 }
 0xa7d   : > { %v2778_v48 = vadd.f32 %v2777_v42, %v2776_v41  ;;  %v2966_v41 = vpop.permute.xlu1 %2965 }
 0xa7e   : > { %v2805_v50 = vpack.c.bf16 %v2803_v44, %v2803_v44 }
 0xa7f   : > { %v2809_v51 = vld [vmem:[#allocation3 + $0x4] sm:$0xf]  ;;  %v2779_v52 = vrot.slane %v2778_v48, 4 }
 0xa80   : > { %2807 = vst.msk [vmem:[#allocation3 + $0x8] sm:$0xf] %vm493_vm0, %v2805_v50  ;;  %v2818_v54 = vunpack.c.l.b16 %v2809_v51 }
 0xa81   : > { %v2780_v55 = vadd.f32 %v2779_v52, %v2778_v48 }
 0xa82   : > { %v2846_v56 = vpack.c.b16 %v2818_v54, %v2845_v21 }
 0xa83   : > { %v2781_v25 = vrot.slane %v2780_v55, 2 }
 0xa84   : > { %v2849_v63 = vshrl.u32 %v2846_v56, 16  ;;  %v2852_v0 = vshll.u32 %v2846_v56, 16  ;;  %v2977_v56 = vld [vmem:[#allocation3] sm:$0x8] }
 0xa85   : > { %v2782_v57 = vadd.f32 %v2781_v25, %v2780_v55  ;;  %v3059_v25 = vld [vmem:[#allocation3 + $0xc] sm:$0x1] }
 0xa86   : > { %v2851_v7 = vrot.slane %v2849_v63, 3  ;;  %v2854_v10 = vrot.slane %v2852_v0, 4 }
 0xa87   : > { %v2810_v58 = vld [vmem:[#allocation3 + $0x8] sm:$0xf]  ;;  %v2783_v59 = vrot.slane %v2782_v57, 1 }
 0xa88   : > { %v6050_v60 = vld [vmem:[#allocation3 + $0x4] sm:$0xff]  ;;  %v2819_v62 = vunpack.c.l.b16 %v2810_v58  ;;  %v2855_v23 = vor.u32 %v2854_v10, %v2851_v7 }
 0xa89   : > { %v2784_v34 = vadd.f32 %v2783_v59, %v2782_v57  ;;  %v2904_v1 = vshll.u32 %v6050_v60, 16  ;;  %v2902_v5 = vshrl.u32 %v6050_v60, 16  ;;  %v3067_v60 = vunpack.c.l.b16 %v3059_v25 }
 0xa8a   : > { %v2820_v2 = vpack.c.b16 %v2819_v62, %v2818_v54  ;;  %v2847_v3 = vpack.c.b16 %v2819_v62, %v2819_v62  ;;  %v3014_v62 = vunpack.c.l.b16 %v2977_v56 }
 0xa8b   : > { %v2785_v4 = vmul.f32 %v2784_v34, %v6550_v47  ;;  %v2906_v36 = vrot.slane %v2904_v1, 1  ;;  %v3069_v34 = vpack.c.b16 %v3067_v60, %v3067_v60 }
 0xa8c   : > { %5506 = vmatmul.msk.bf16.vlgmr.msra.gmra.mxu1 %vm542_vm1, %v2820_v2  ;;  %v2857_v13 = vshrl.u32 %v2847_v3, 16  ;;  %v2860_v18 = vshll.u32 %v2847_v3, 16 }
 0xa8d   : > { %3316 = vrot.lane.b32.xlu2 %v2785_v4, %s7543_s2  ;;  %v2907_v19 = vor.u32 %v2906_v36, %v2902_v5  ;;  %v3078_v36 = vshll.u32 %v3069_v34, 16 }
 0xa8e   : > { %v2859_v20 = vrot.slane %v2857_v13, 3  ;;  %v2862_v15 = vrot.slane %v2860_v18, 4 }
 0xa8f   : > { %v2912_v22 = vsel %vm631_vm4, %v2907_v19, %v2911_v6 }
 0xa90   : > { %5522 = vmatmul.msk.bf16.vlgmr.msra.gmra.mxu3 %vm542_vm1, %v2912_v22  ;;  %v2863_v26 = vor.u32 %v2862_v15, %v2859_v20 }
 0xa92   : > { %v2864_v28 = vsel %vm518_vm3, %v2855_v23, %v2863_v26  ;;  %v3080_v26 = vrot.slane %v3078_v36, 1 }
 0xa93   : > { %5511 = vmatmul.msk.bf16.vlgmr.msrb.gmra.mxu2 %vm542_vm1, %v2864_v28 }
 0xb09   : > { %v2839_v38 = vpop.f32.mrf.mxu1 }
 0xb11   : > { %v2841_v44 = vpop.f32.mrf.mxu1 }
 0xb13   : > { %v2931_v17 = vpop.f32.mrf.mxu3 }
 0xb16   : > { %v2883_v35 = vpop.f32.mrf.mxu2 }
 0xb17   : > { %v2884_v12 = vadd.f32 %v2883_v35, %v2839_v38 }
 0xb19   : > { %v2936_v45 = vadd.f32 %v2931_v17, %v2884_v12 }
 0xb1b   : > { %v2943_v40 = vadd.f32 %v6200_v33, %v2936_v45  ;;  %v2933_v50 = vpop.f32.mrf.mxu3 }
 0xb1d   : > { %v2971_v42 = vadd.f32 %v2966_v41, %v2943_v40  ;;  %v2945_v54 = vsel %vm542_vm1, %v2943_v40, 0.0 }
 0xb1e   : > { %v2885_v46 = vpop.f32.mrf.mxu2 }
 0xb1f   : > { %v2973_v48 = vpack.c.bf16 %v2971_v42, %v2971_v42  ;;  %v2886_v49 = vadd.f32 %v2885_v46, %v2841_v44  ;;  %v3135_v42 = vpop.permute.xlu0 %3134 }
 0xb21   : > { %2975 = vst.msk [vmem:[#allocation3 + $0x4] sm:$0xf] %vm493_vm0, %v2973_v48  ;;  %v2937_v51 = vadd.f32 %v2933_v50, %v2886_v49  ;;  %v6057_v48 = vld [vmem:[%s7489_s5 + $0x140] sm:$0xff]  ;;  %v6056_v49 = vld [vmem:[%s7489_s5 + $0x138] sm:$0xff] }
 0xb22   : > { %3175 = vmatpush.bf16.msrb.mxu3 %v6057_v48  ;;  %3219 = vmatpush.bf16.msra.mxu0 %v6056_v49 }
 0xb23   : > { %v6980_v52 = vadd.f32 %v6200_v33, %v2937_v51 }
 0xb25   : > { %v2946_v21 = vsel %vm542_vm1, %v6980_v52, 0.0  ;;  %v2972_v55 = vadd.f32 %v2968_v53, %v6980_v52  ;;  %v6201_v53 = vld [vmem:[%s7490_s6 + $0xc] ss:$0 sm:$0xff] }
 0xb26   : > { %v2947_v43 = vadd.f32 %v2946_v21, %v2945_v54 }
 0xb27   : > { %v2974_v57 = vpack.c.bf16 %v2972_v55, %v2972_v55  ;;  %v6999_v44 = vpop.permute.xlu0 %3308 }
 0xb28   : > { %v2978_v58 = vld [vmem:[#allocation3 + $0x4] sm:$0xf]  ;;  %v2948_v59 = vrot.slane %v2947_v43, 4 }
 0xb29   : > { %2976 = vst.msk [vmem:[#allocation3 + $0x8] sm:$0xf] %vm493_vm0, %v2974_v57  ;;  %v2987_v61 = vunpack.c.l.b16 %v2978_v58 }
 0xb2a   : > { %v2949_v63 = vadd.f32 %v2948_v59, %v2947_v43 }
 0xb2b   : > { %v3015_v1 = vpack.c.b16 %v2987_v61, %v3014_v62  ;;  %v3137_v62 = vpop.permute.xlu1 %3136 }
 0xb2c   : > { %v2950_v0 = vrot.slane %v2949_v63, 2 }
 0xb2d   : > { %v3018_v7 = vshrl.u32 %v3015_v1, 16  ;;  %v3021_v10 = vshll.u32 %v3015_v1, 16  ;;  %v3228_v1 = vld [vmem:[#allocation3 + $0xc] sm:$0x1] }
 0xb2e   : > { %v2951_v2 = vadd.f32 %v2950_v0, %v2949_v63 }
 0xb2f   : > { %v3020_v28 = vrot.slane %v3018_v7, 3  ;;  %v3023_v29 = vrot.slane %v3021_v10, 4 }
 0xb30   : > { %v2979_v3 = vld [vmem:[#allocation3 + $0x8] sm:$0xf]  ;;  %v2952_v4 = vrot.slane %v2951_v2, 1 }
 0xb31   : > { %v6054_v5 = vld [vmem:[#allocation3 + $0x4] sm:$0xff]  ;;  %v2988_v6 = vunpack.c.l.b16 %v2979_v3  ;;  %v3024_v33 = vor.u32 %v3023_v29, %v3020_v28  ;;  %v3146_v3 = vld [vmem:[#allocation3] sm:$0x8] }
 0xb32   : > { %v2953_v13 = vadd.f32 %v2952_v4, %v2951_v2  ;;  %v3073_v18 = vshll.u32 %v6054_v5, 16  ;;  %v3071_v22 = vshrl.u32 %v6054_v5, 16  ;;  %v3183_v10 = vunpack.c.l.b16 %v3146_v3 }
 0xb33   : > { %v2989_v19 = vpack.c.b16 %v2988_v6, %v2987_v61  ;;  %v3016_v20 = vpack.c.b16 %v2988_v6, %v2988_v6  ;;  %v3236_v6 = vunpack.c.l.b16 %v3228_v1 }
 0xb34   : > { %v2954_v15 = vmul.f32 %v2953_v13, %v6550_v47  ;;  %v3075_v23 = vrot.slane %v3073_v18, 1 }
 0xb35   : > { %5532 = vmatmul.msk.bf16.vlgmr.msrb.gmra.mxu0 %vm542_vm1, %v2989_v19  ;;  %v3026_v31 = vshrl.u32 %v3016_v20, 16  ;;  %v3029_v37 = vshll.u32 %v3016_v20, 16  ;;  %v3238_v19 = vpack.c.b16 %v3236_v6, %v3236_v6 }
 0xb36   : > { %3320 = vrot.lane.b32.xlu0 %v2954_v15, %s7544_s3  ;;  %v3076_v38 = vor.u32 %v3075_v23, %v3071_v22 }
 0xb37   : > { %v3028_v17 = vrot.slane %v3026_v31, 3  ;;  %v3031_v35 = vrot.slane %v3029_v37, 4  ;;  %v3247_v28 = vshll.u32 %v3238_v19, 16  ;;  %v6202_v19 = vld [vmem:[%s7490_s6 + $0xd] ss:$0 sm:$0xff] }
 0xb38   : > { %v3081_v12 = vsel %vm631_vm4, %v3076_v38, %v3080_v26 }
 0xb39   : > { %5548 = vmatmul.msk.bf16.vlgmr.msra.gmra.mxu2 %vm542_vm1, %v3081_v12  ;;  %v3032_v45 = vor.u32 %v3031_v35, %v3028_v17 }
 0xb3b   : > { %v3033_v41 = vsel %vm518_vm3, %v3024_v33, %v3032_v45 }
 0xb3c   : > { %5537 = vmatmul.msk.bf16.vlgmr.msrb.gmra.mxu1 %vm542_vm1, %v3033_v41 }
 0xb3e   : > { %2450 = vrot.lane.b32.xlu0 %v6886_v11, %s7540_s30  ;;  %v6059_v11 = vld [vmem:[%s7489_s5 + $0x148] sm:$0xff] }
 0xb3f   : > { %3267 = vmatpush.bf16.msra.mxu1 %v6059_v11 }
 0xb46   : > { %2621 = vrot.lane.b32.xlu0 %v6921_v32, %s7541_s0 }
 0xb4e   : > { %2957 = vrot.lane.b32.xlu0 %v2943_v40, %s7543_s2 }
 0xba8   : > { %v7001_v46 = vpop.permute.xlu0 %3320 }
 0xbb0   : > { %v2451_v32 = vpop.permute.xlu0 %2450 }
 0xbb1   : > { %2456 = vst.msk [vmem:[#allocation4] sm:$0xff] %vm1071_vm7, %v2451_v32 }
 0xbb2   : > { %v3008_v40 = vpop.f32.mrf.mxu0 }
 0xbb9   : > { %v3052_v50 = vpop.f32.mrf.mxu1 }
 0xbba   : > { %v3053_v51 = vadd.f32 %v3052_v50, %v3008_v40  ;;  %v3010_v25 = vpop.f32.mrf.mxu0 }
 0xbbc   : > { %v3100_v54 = vpop.f32.mrf.mxu2 }
 0xbbd   : > { %v3105_v21 = vadd.f32 %v3100_v54, %v3053_v51 }
 0xbbf   : > { %v7016_v55 = vadd.f32 %v6201_v53, %v3105_v21 }
 0xbc1   : > { %v3140_v43 = vadd.f32 %v3135_v42, %v7016_v55  ;;  %v3054_v56 = vpop.f32.mrf.mxu1  ;;  %v3114_v63 = vsel %vm542_vm1, %v7016_v55, 0.0  ;;  %v3249_v42 = vrot.slane %v3247_v28, 1 }
 0xbc2   : > { %v3055_v57 = vadd.f32 %v3054_v56, %v3010_v25  ;;  %v2125_v56 = vsel %vm542_vm1, %v6819_v16, 0.0 }
 0xbc3   : > { %v3142_v58 = vpack.c.bf16 %v3140_v43, %v3140_v43  ;;  %v2124_v43 = vsel %vm542_vm1, %v6817_v14, 0.0 }
 0xbc4   : > { %v3102_v59 = vpop.f32.mrf.mxu2 }
 0xbc5   : > { %3144 = vst.msk [vmem:[#allocation3 + $0x4] sm:$0xf] %vm493_vm0, %v3142_v58  ;;  %v3106_v60 = vadd.f32 %v3102_v59, %v3055_v57  ;;  %v2126_v57 = vadd.f32 %v2125_v56, %v2124_v43 }
 0xbc7   : > { %v3113_v61 = vadd.f32 %v6201_v53, %v3106_v60  ;;  %v2127_v58 = vrot.slane %v2126_v57, 4 }
 0xbc9   : > { %v3115_v0 = vsel %vm542_vm1, %v3113_v61, 0.0  ;;  %v3141_v34 = vadd.f32 %v3137_v62, %v3113_v61  ;;  %3128 = vrot.lane.b32.xlu0 %v3113_v61, %s7544_s3  ;;  %v2128_v59 = vadd.f32 %v2127_v58, %v2126_v57 }
 0xbca   : > { %v3116_v2 = vadd.f32 %v3115_v0, %v3114_v63  ;;  %v3305_v63 = vpop.permute.xlu2 %3304  ;;  %v3313_v0 = vpop.permute.xlu1 %3312 }
 0xbcb   : > { %v3143_v4 = vpack.c.bf16 %v3141_v34, %v3141_v34  ;;  %v2129_v60 = vrot.slane %v2128_v59, 2 }
 0xbcc   : > { %v3117_v5 = vrot.slane %v3116_v2, 4  ;;  %v3147_v36 = vld [vmem:[#allocation3 + $0x4] sm:$0xf] }
 0xbcd   : > { %3145 = vst.msk [vmem:[#allocation3 + $0x8] sm:$0xf] %vm493_vm0, %v3143_v4  ;;  %v3156_v7 = vunpack.c.l.b16 %v3147_v36  ;;  %v2130_v61 = vadd.f32 %v2129_v60, %v2128_v59 }
 0xbce   : > { %v3118_v13 = vadd.f32 %v3117_v5, %v3116_v2 }
 0xbcf   : > { %v3184_v20 = vpack.c.b16 %v3156_v7, %v3183_v10  ;;  %v2131_v62 = vrot.slane %v2130_v61, 1 }
 0xbd0   : > { %v3119_v18 = vrot.slane %v3118_v13, 2 }
 0xbd1   : > { %v3187_v31 = vshrl.u32 %v3184_v20, 16  ;;  %v3190_v37 = vshll.u32 %v3184_v20, 16 }
 0xbd2   : > { %v3120_v15 = vadd.f32 %v3119_v18, %v3118_v13 }
 0xbd3   : > { %v3189_v48 = vrot.slane %v3187_v31, 3  ;;  %v3192_v49 = vrot.slane %v3190_v37, 4 }
 0xbd4   : > { %v3148_v22 = vld [vmem:[#allocation3 + $0x8] sm:$0xf]  ;;  %v3121_v23 = vrot.slane %v3120_v15, 1 }
 0xbd5   : > { %v6058_v26 = vld [vmem:[#allocation3 + $0x4] sm:$0xff]  ;;  %v3157_v29 = vunpack.c.l.b16 %v3148_v22  ;;  %v3193_v54 = vor.u32 %v3192_v49, %v3189_v48 }
 0xbd6   : > { %v3122_v38 = vadd.f32 %v3121_v23, %v3120_v15  ;;  %v3242_v17 = vshll.u32 %v6058_v26, 16  ;;  %v3240_v45 = vshrl.u32 %v6058_v26, 16  ;;  %v6067_v48 = vld [vmem:[%s7491_s7 + $0x78] sm:$0xff]  ;;  %v6066_v49 = vld [vmem:[%s7491_s7 + $0x70] sm:$0xff] }
 0xbd7   : > { %v3158_v35 = vpack.c.b16 %v3157_v29, %v3156_v7  ;;  %v3185_v12 = vpack.c.b16 %v3157_v29, %v3157_v29  ;;  %v2622_v7 = vpop.permute.xlu0 %2621  ;;  %3406 = vmatpush.bf16.msrb.mxu2 %v6067_v48 }
 0xbd8   : > { %v3123_v33 = vmul.f32 %v3122_v38, %v6550_v47  ;;  %v3244_v41 = vrot.slane %v3242_v17, 1 }
 0xbd9   : > { %5558 = vmatmul.msk.bf16.vlgmr.msrb.gmra.mxu3 %vm542_vm1, %v3158_v35  ;;  %v3195_v11 = vshrl.u32 %v3185_v12, 16  ;;  %v3198_v32 = vshll.u32 %v3185_v12, 16 }
 0xbda   : > { %3324 = vrot.lane.b32.xlu1 %v3123_v33, %s7545_s26  ;;  %v3245_v40 = vor.u32 %v3244_v41, %v3240_v45 }
 0xbdb   : > { %v3197_v50 = vrot.slane %v3195_v11, 3  ;;  %v3200_v51 = vrot.slane %v3198_v32, 4  ;;  %3407 = vmatpush.bf16.msrb.mxu2 %v6066_v49  ;;  %v6065_v11 = vld [vmem:[%s7491_s7 + $0x68] sm:$0xff]  ;;  %v6064_v32 = vld [vmem:[%s7491_s7 + $0x60] sm:$0xff] }
 0xbdc   : > { %v3250_v53 = vsel %vm631_vm4, %v3245_v40, %v3249_v42  ;;  %v6063_v40 = vld [vmem:[%s7491_s7 + $0x58] sm:$0xff] }
 0xbdd   : > { %5574 = vmatmul.msk.bf16.vlgmr.msra.gmra.mxu1 %vm542_vm1, %v3250_v53  ;;  %v3201_v21 = vor.u32 %v3200_v51, %v3197_v50  ;;  %v6062_v50 = vld [vmem:[%s7491_s7 + $0x50] sm:$0xff] }
 0xbdf   : > { %v3202_v25 = vsel %vm518_vm3, %v3193_v54, %v3201_v21  ;;  %3408 = vmatpush.bf16.msrb.mxu2 %v6065_v11  ;;  %v6069_v54 = vld [vmem:[%s7493_s9 + $0x18] sm:$0xff]  ;;  %v2958_v56 = vpop.permute.xlu0 %2957 }
 0xbe0   : > { %5563 = vmatmul.msk.bf16.vlgmr.msra.gmra.mxu0 %vm542_vm1, %v3202_v25  ;;  %3449 = vmatpush.bf16.msra.mxu3 %v6069_v54 }
 0xbe2   : > { %2452 = vrot.lane.b32.xlu1 %v6890_v24, %s7540_s30  ;;  %v2132_v24 = vadd.f32 %v2131_v62, %v2130_v61 }
 0xbe3   : > { %3409 = vmatpush.bf16.msrb.mxu2 %v6064_v32 }
 0xbe7   : > { %3410 = vmatpush.bf16.msrb.mxu2 %v6063_v40 }
 0xbea   : > { %2788 = vrot.lane.b32.xlu1 %v6948_v30, %s7542_s1  ;;  %v2133_v30 = vmul.f32 %v2132_v24, %v6550_v47 }
 0xbeb   : > { %3411 = vmatpush.bf16.msrb.mxu2 %v6062_v50 }
 0xbec   : > { %v3331_v34 = vsel %vm542_vm1, %v2133_v30, %v3305_v63  ;;  %v5592_v63 = vld [vmem:[%s7492_s8 + $0x1] sm:$0x1] }
 0xbed   : > { %v3332_v1 = vsel %vm1953_vm8, %v3331_v34, %v6999_v44 }
 0xbee   : > { %v3333_v2 = vsel %vm1955_vm9, %v3332_v1, %v3313_v0  ;;  %v5629_v1 = vld [vmem:[%s7494_s10 + $0x1] sm:$0x1] }
 0xbf2   : > { %2959 = vrot.lane.b32.xlu1 %v6980_v52, %s7543_s2  ;;  %v3317_v52 = vpop.permute.xlu2 %3316 }
 0xbf3   : > { %v3334_v3 = vsel %vm1957_vm10, %v3333_v2, %v3317_v52 }
 0xbf4   : > { %v3335_v4 = vsel %vm1959_vm11, %v3334_v3, %v7001_v46 }
 0xc3b   : > { %v3129_v59 = vpop.permute.xlu0 %3128 }
 0xc4c   : > { %v3325_v5 = vpop.permute.xlu1 %3324 }
 0xc4d   : > { %v3336_v36 = vsel %vm7523_vm12, %v3335_v4, %v3325_v5  ;;  %vm7553_vm12 = vcmask 917248   ;;  %v6203_v5 = vld [vmem:[%s7496_s12 + $0x1] ss:$0 sm:$0xff] }
 0xc54   : > { %v2453_v6 = vpop.permute.xlu1 %2452 }
 0xc55   : > { %2457 = vst.msk [vmem:[#allocation4 + $0x8] sm:$0xff] %vm1071_vm7, %v2453_v6  ;;  %vm7547_vm7 = vcmask 523648  }
 0xc56   : > { %2626 = vst.msk [vmem:[#allocation4 + $0x8] sm:$0xff] %vm1241_vm13, %v2622_v7  ;;  %vm7549_vm2 = vmmov %vm7547_vm7 }
 0xc5a   : > { %v3269_v13 = vpop.f32.mrf.mxu1 }
 0xc5c   : > { %v3177_v10 = vpop.f32.mrf.mxu3  ;;  %v2789_v25 = vpop.permute.xlu1 %2788 }
 0xc5d   : > { %v3221_v18 = vpop.f32.mrf.mxu0 }
 0xc5e   : > { %v3222_v44 = vadd.f32 %v3221_v18, %v3177_v10 }
 0xc60   : > { %v3274_v20 = vadd.f32 %v3269_v13, %v3222_v44 }
 0xc62   : > { %v3281_v15 = vadd.f32 %v6202_v19, %v3274_v20  ;;  %v3271_v26 = vpop.f32.mrf.mxu1 }
 0xc64   : > { %v3179_v46 = vpop.f32.mrf.mxu3  ;;  %3295 = vrot.lane.b32.xlu1 %v3281_v15, %s7545_s26  ;;  %v3283_v31 = vsel %vm542_vm1, %v3281_v15, 0.0  ;;  %v2960_v58 = vpop.permute.xlu1 %2959 }
 0xc65   : > { %v3223_v22 = vpop.f32.mrf.mxu0 }
 0xc66   : > { %v3224_v23 = vadd.f32 %v3223_v22, %v3179_v46  ;;  %v5640_v22 = vld [vmem:[%s7495_s11 + $0x1] sm:$0x1] }
 0xc68   : > { %v3275_v28 = vadd.f32 %v3271_v26, %v3224_v23 }
 0xc6a   : > { %v3282_v29 = vadd.f32 %v6202_v19, %v3275_v28 }
 0xc6c   : > { %v3284_v37 = vsel %vm542_vm1, %v3282_v29, 0.0  ;;  %3498 = vrot.lane.b32.xlu1 %v6203_v5, %s7546_s16 }
 0xc6d   : > { %v3285_v38 = vadd.f32 %v3284_v37, %v3283_v31 }
 0xc6f   : > { %v3286_v17 = vrot.slane %v3285_v38, 4 }
 0xc71   : > { %v3287_v35 = vadd.f32 %v3286_v17, %v3285_v38 }
 0xc73   : > { %v3288_v12 = vrot.slane %v3287_v35, 2 }
 0xc75   : > { %v3289_v33 = vadd.f32 %v3288_v12, %v3287_v35 }
 0xc77   : > { %v3290_v45 = vrot.slane %v3289_v33, 1 }
 0xc79   : > { %v3291_v41 = vadd.f32 %v3290_v45, %v3289_v33  ;;  %v6073_v45 = vld [vmem:[%s7489_s5 + $0x160] sm:$0xff] }
 0xc7b   : > { %v3292_v42 = vmul.f32 %v3291_v41, %v6550_v47  ;;  %v6071_v41 = vld [vmem:[%s7489_s5 + $0x158] sm:$0xff] }
 0xc7c   : > { %3546 = vmatpush.bf16.msrb.mxu0 %v6071_v41 }
 0xc7d   : > { %3328 = vrot.lane.b32.xlu2 %v3292_v42, %s7546_s16 }
 0xc85   : > { %2619 = vrot.lane.b32.xlu2 %v6917_v9, %s7541_s0  ;;  %v6061_v9 = vld [vmem:[%s7491_s7 + $0x48] sm:$0xff] }
 0xc86   : > { %3412 = vmatpush.bf16.msrb.mxu2 %v6061_v9  ;;  %v3599_v9 = vld [vmem:[#allocation3 + $0xc] sm:$0x1] }
 0xc87   : > { %v3607_v54 = vunpack.c.l.b16 %v3599_v9  ;;  %v3678_v9 = vld [vmem:[#allocation3] sm:$0x8] }
 0xc8d   : > { %2790 = vrot.lane.b32.xlu2 %v6952_v39, %s7542_s1  ;;  %v6060_v39 = vld [vmem:[%s7491_s7 + $0x40] sm:$0xff] }
 0xc8e   : > { %3413 = vmatpush.bf16.msrb.mxu2 %v6060_v39 }
 0xc95   : > { %3126 = vrot.lane.b32.xlu2 %v7016_v55, %s7544_s3  ;;  %v6068_v55 = vld [vmem:[%s7493_s9 + $0x10] sm:$0xff] }
 0xc96   : > { %3450 = vmatpush.bf16.msra.mxu3 %v6068_v55  ;;  %v3517_v55 = vld [vmem:[#allocation3] sm:$0x8] }
 0xc9a   : > { %3638 = vmatpush.bf16.msrb.mxu3 %v6073_v45 }
 0xc9d   : > { %3297 = vrot.lane.b32.xlu2 %v3282_v29, %s7545_s26 }
 0xcd6   : > { %v3296_v61 = vpop.permute.xlu1 %3295 }
 0xcd7   : > { %v3329_v51 = vpop.permute.xlu2 %3328 }
 0xcd8   : > { %v7093_v53 = vsel %vm7522_vm14, %v3336_v36, %v3329_v51  ;;  %vm7552_vm14 = vmmov %vm7551_vm6 }
 0xcd9   : > { %v3338_v21 = vpack.c.bf16 %v7093_v53, %v7093_v53 }
 0xcdb   : > { %3414 = vmatmul.bf16.vlgmr.msrb.gmra.mxu2 %v3338_v21  ;;  %v3609_v21 = vpack.c.b16 %v3607_v54, %v3607_v54 }
 0xcde   : > { %v3499_v49 = vpop.permute.xlu1 %3498 }
 0xcdf   : > { %v2620_v43 = vpop.permute.xlu2 %2619 }
 0xce0   : > { %2625 = vst.msk [vmem:[#allocation4] sm:$0xff] %vm1241_vm13, %v2620_v43  ;;  %vm7554_vm13 = vmmov %vm7553_vm12 }
 0xce1   : > { %2794 = vst.msk [vmem:[#allocation4] sm:$0xff] %vm7547_vm7, %v2789_v25  ;;  %v3554_v25 = vunpack.c.l.b16 %v3517_v55 }
 0xce2   : > { %2963 = vst.msk [vmem:[#allocation4] sm:$0xff] %vm7548_vm15, %v2958_v56  ;;  %v3618_v56 = vshll.u32 %v3609_v21, 16 }
 0xce7   : > { %v2791_v57 = vpop.permute.xlu2 %2790 }
 0xce8   : > { %2795 = vst.msk [vmem:[#allocation4 + $0x8] sm:$0xff] %vm7549_vm2, %v2791_v57 }
 0xce9   : > { %2964 = vst.msk [vmem:[#allocation4 + $0x8] sm:$0xff] %vm7550_vm5, %v2960_v58 }
 0xcea   : > { %3133 = vst.msk [vmem:[#allocation4 + $0x8] sm:$0xff] %vm7551_vm6, %v3129_v59 }
 0xcef   : > { %v3127_v60 = vpop.permute.xlu2 %3126 }
 0xcf0   : > { %3132 = vst.msk [vmem:[#allocation4] sm:$0xff] %vm7552_vm14, %v3127_v60 }
 0xcf1   : > { %3301 = vst.msk [vmem:[#allocation4] sm:$0xff] %vm7553_vm12, %v3296_v61 }
 0xcf7   : > { %v3298_v62 = vpop.permute.xlu2 %3297 }
 0xcf8   : > { %3302 = vst.msk [vmem:[#allocation4 + $0x8] sm:$0xff] %vm7554_vm13, %v3298_v62 }
 0xcff   : > { %v3491_v42 = vld [vmem:[#allocation4 + $0x8] sm:$0xff] }
 0xd5e   : > { %v3415_v24 = vpop.f32.mrf.mxu2 }
 0xd5f   : > { %v3416_v0 = vadd.f32 %v5592_v63, %v3415_v24  ;;  %v3620_v24 = vrot.slane %v3618_v56, 1 }
 0xd61   : > { %v3419_v30 = vmax.f32 %v3416_v0, 0.0 }
 0xd63   : > { %v3420_v34 = vpack.c.bf16 %v3419_v30, %v3419_v30 }
 0xd65   : > { %5638 = vmatmul.msk.bf16.vlgmr.msra.gmra.mxu3 %vm1953_vm8, %v3420_v34 }
 0xd66   : > { %v3417_v52 = vpop.f32.mrf.mxu2 }
 0xde8   : > { %v3452_v2 = vpop.f32.mrf.mxu3 }
 0xde9   : > { %v3453_v3 = vadd.f32 %v5629_v1, %v3452_v2 }
 0xdeb   : > { %v5639_v4 = vmul.f32 -1.442695, %v3453_v3 }
 0xded   : > { %6217 = vpow2.f32 %v5639_v4 }
 0xdf0   : > { %v3454_v36 = vpop.f32.mrf.mxu3 }
 0xdf3   : > { %v6218_v6 = vpop.eup %6217 }
 0xdf4   : > { %v3459_v7 = vadd.f32 1.0, %v6218_v6 }
 0xdf6   : > { %6219 = vrcp.f32 %v3459_v7  ;;  %v3471_v44 = vand.u32 2147483648, %v3459_v7  ;;  %v3469_v20 = vand.u32 2147483647, %v3459_v7  ;;  %vm3465_vm14 = vweird.f32 %v3459_v7 }
 0xdf8   : > { %v3472_v46 = vor.u32 1.1754944e-38, %v3471_v44  ;;  %vm3470_vm15 = vcmp.eq.f32.partialorder %v3469_v20, 8.507059e+37  ;;  %v6075_v20 = vld [vmem:[%s7489_s5 + $0x170] sm:$0xff] }
 0xdf9   : > { %3707 = vmatpush.bf16.msra.mxu0 %v6075_v20 }
 0xdfc   : > { %v6220_v10 = vpop.eup %6219 }
 0xdfd   : > { %v3461_v13 = vmul.f32 %v6220_v10, %v3459_v7  ;;  %vm3466_vm12 = vweird.f32 %v6220_v10 }
 0xdfe   : > { %vm3467_vm7 = vmor %vm3465_vm14, %vm3466_vm12 }
 0xdff   : > { %v3462_v18 = vsub.f32 1.0, %v3461_v13 }
 0xe01   : > { %v3463_v19 = vmul.f32 %v6220_v10, %v3462_v18 }
 0xe03   : > { %v3464_v15 = vadd.f32 %v6220_v10, %v3463_v19  ;;  %v6077_v19 = vld [vmem:[%s7489_s5 + $0x178] sm:$0xff] }
 0xe04   : > { %3799 = vmatpush.bf16.msra.mxu2 %v6077_v19 }
 0xe05   : > { %v3468_v23 = vsel %vm3467_vm7, %v6220_v10, %v3464_v15  ;;  %v6074_v15 = vld [vmem:[%s7489_s5 + $0x168] sm:$0xff] }
 0xe06   : > { %v3473_v26 = vsel %vm3470_vm15, %v3472_v46, %v3468_v23 }
 0xe07   : > { %v7126_v28 = vmul.f32 %v5640_v22, %v3473_v26  ;;  %v6204_v26 = vld [vmem:[%s7490_s6 + $0xe] ss:$0 sm:$0xff] }
 0xe09   : > { %v3482_v29 = vperm.slane %v7126_v28, 0 }
 0xe0b   : > { %3493 = vrot.lane.b32.xlu0 %v3482_v29, %s7546_s16  ;;  %v3483_v31 = vmul.f32 %v3482_v29, %v6817_v14  ;;  %v3484_v37 = vmul.f32 %v3482_v29, %v6819_v16  ;;  %v6070_v14 = vld [vmem:[%s7489_s5 + $0x150] sm:$0xff]  ;;  %v3490_v16 = vld [vmem:[#allocation4] sm:$0xff] }
 0xe0c   : > { %3590 = vmatpush.bf16.msrb.mxu1 %v6070_v14 }
 0xe0d   : > { %v3488_v38 = vadd.f32 %v6203_v5, %v3483_v31  ;;  %v3489_v17 = vadd.f32 %v6203_v5, %v3484_v37 }
 0xe0f   : > { %v3503_v35 = vsel %vm542_vm1, %v3488_v38, 0.0  ;;  %v3504_v12 = vsel %vm542_vm1, %v3489_v17, 0.0 }
 0xe10   : > { %v7134_v33 = vadd.f32 %v3504_v12, %v3503_v35  ;;  %3751 = vmatpush.bf16.msra.mxu1 %v6074_v15 }
 0xe7d   : > { %v3494_v48 = vpop.permute.xlu0 %3493 }
 0xe7e   : > { %v3496_v11 = vmul.f32 %v3494_v48, %v3490_v16  ;;  %v3497_v32 = vmul.f32 %v3494_v48, %v3491_v42 }
 0xe80   : > { %v3501_v40 = vadd.f32 %v3499_v49, %v3496_v11  ;;  %v3502_v50 = vadd.f32 %v3499_v49, %v3497_v32 }
 0xe82   : > { %v3513_v39 = vpack.c.bf16 %v3501_v40, %v3501_v40  ;;  %v3514_v51 = vpack.c.bf16 %v3502_v50, %v3502_v50  ;;  %3668 = vrot.lane.b32.xlu0 %v3502_v50, %s7546_s16  ;;  %3825 = vrot.lane.b32.xlu1 %v3501_v40, %s7545_s26 }
 0xe83   : > { %3666 = vrot.lane.b32.xlu2 %v3501_v40, %s7546_s16 }
 0xe84   : > { %3515 = vst.msk [vmem:[#allocation3 + $0x4] sm:$0xf] %vm493_vm0, %v3513_v39 }
 0xe85   : > { %3516 = vst.msk [vmem:[#allocation3 + $0x8] sm:$0xf] %vm493_vm0, %v3514_v51 }
 0xe8a   : > { %3984 = vrot.lane.b32.xlu0 %v3501_v40, %s7544_s3  ;;  %3986 = vrot.lane.b32.xlu1 %v3502_v50, %s7544_s3 }
 0xe8b   : > { %3827 = vrot.lane.b32.xlu2 %v3502_v50, %s7545_s26  ;;  %v3518_v43 = vld [vmem:[#allocation3 + $0x4] sm:$0xf] }
 0xe8c   : > { %v3519_v57 = vld [vmem:[#allocation3 + $0x8] sm:$0xf]  ;;  %v3527_v58 = vunpack.c.l.b16 %v3518_v43 }
 0xe8d   : > { %v6072_v59 = vld [vmem:[#allocation3 + $0x4] sm:$0xff]  ;;  %v3528_v60 = vunpack.c.l.b16 %v3519_v57 }
 0xe8e   : > { %v3613_v61 = vshll.u32 %v6072_v59, 16  ;;  %v3555_v62 = vpack.c.b16 %v3527_v58, %v3554_v25  ;;  %v3611_v30 = vshrl.u32 %v6072_v59, 16  ;;  %v3715_v25 = vunpack.c.l.b16 %v3678_v9 }
 0xe8f   : > { %v3529_v63 = vpack.c.b16 %v3528_v60, %v3527_v58  ;;  %v3556_v0 = vpack.c.b16 %v3528_v60, %v3528_v60 }
 0xe90   : > { %v3615_v34 = vrot.slane %v3613_v61, 1  ;;  %v3558_v52 = vshrl.u32 %v3555_v62, 16  ;;  %v3561_v1 = vshll.u32 %v3555_v62, 16 }
 0xe91   : > { %5650 = vmatmul.msk.bf16.vlgmr.msrb.gmra.mxu0 %vm542_vm1, %v3529_v63  ;;  %v3566_v2 = vshrl.u32 %v3556_v0, 16  ;;  %v3569_v3 = vshll.u32 %v3556_v0, 16 }
 0xe92   : > { %4145 = vrot.lane.b32.xlu0 %v3502_v50, %s7543_s2  ;;  %4302 = vrot.lane.b32.xlu1 %v3501_v40, %s7542_s1  ;;  %v3616_v4 = vor.u32 %v3615_v34, %v3611_v30  ;;  %v3560_v5 = vrot.slane %v3558_v52, 3  ;;  %v3563_v36 = vrot.slane %v3561_v1, 4 }
 0xe93   : > { %4143 = vrot.lane.b32.xlu2 %v3501_v40, %s7543_s2  ;;  %v3568_v6 = vrot.slane %v3566_v2, 3  ;;  %v3571_v7 = vrot.slane %v3569_v3, 4 }
 0xe94   : > { %v3621_v10 = vsel %vm631_vm4, %v3616_v4, %v3620_v24  ;;  %v3564_v13 = vor.u32 %v3563_v36, %v3560_v5 }
 0xe95   : > { %5666 = vmatmul.msk.bf16.vlgmr.msrb.gmra.mxu3 %vm542_vm1, %v3621_v10  ;;  %v3572_v18 = vor.u32 %v3571_v7, %v3568_v6 }
 0xe97   : > { %v3573_v44 = vsel %vm518_vm3, %v3564_v13, %v3572_v18 }
 0xe98   : > { %5655 = vmatmul.msk.bf16.vlgmr.msrb.gmra.mxu1 %vm542_vm1, %v3573_v44 }
 0xe9a   : > { %4461 = vrot.lane.b32.xlu0 %v3501_v40, %s7541_s0  ;;  %4463 = vrot.lane.b32.xlu1 %v3502_v50, %s7541_s0  ;;  %v3760_v40 = vld [vmem:[#allocation3 + $0xc] sm:$0x1] }
 0xe9b   : > { %4304 = vrot.lane.b32.xlu2 %v3502_v50, %s7542_s1  ;;  %v3768_v21 = vunpack.c.l.b16 %v3760_v40 }
 0xe9d   : > { %v3770_v57 = vpack.c.b16 %v3768_v21, %v3768_v21 }
 0xe9f   : > { %v3779_v63 = vshll.u32 %v3770_v57, 16 }
 0xea1   : > { %v3781_v36 = vrot.slane %v3779_v63, 1 }
 0xedd   : > { %v3667_v38 = vpop.permute.xlu2 %3666 }
 0xef4   : > { %v3669_v48 = vpop.permute.xlu0 %3668 }
 0xf0e   : > { %v3548_v46 = vpop.f32.mrf.mxu0 }
 0xf15   : > { %v3592_v22 = vpop.f32.mrf.mxu1 }
 0xf16   : > { %v3593_v23 = vadd.f32 %v3592_v22, %v3548_v46  ;;  %v3550_v17 = vpop.f32.mrf.mxu0 }
 0xf18   : > { %v3640_v29 = vpop.f32.mrf.mxu3 }
 0xf19   : > { %v3645_v31 = vadd.f32 %v3640_v29, %v3593_v23  ;;  %v6079_v23 = vld [vmem:[%s7489_s5 + $0x188] sm:$0xff]  ;;  %v6081_v29 = vld [vmem:[%s7489_s5 + $0x190] sm:$0xff] }
 0xf1a   : > { %3866 = vmatpush.bf16.msra.mxu3 %v6079_v23  ;;  %3958 = vmatpush.bf16.msrb.mxu1 %v6081_v29 }
 0xf1b   : > { %v3652_v37 = vadd.f32 %v6204_v26, %v3645_v31 }
 0xf1d   : > { %v3672_v35 = vadd.f32 %v3667_v38, %v3652_v37  ;;  %v3594_v12 = vpop.f32.mrf.mxu1  ;;  %v3654_v49 = vsel %vm542_vm1, %v3652_v37, 0.0 }
 0xf1e   : > { %v3595_v45 = vadd.f32 %v3594_v12, %v3550_v17  ;;  %v6205_v17 = vld [vmem:[%s7490_s6 + $0xf] ss:$0 sm:$0xff] }
 0xf1f   : > { %v3674_v41 = vpack.c.bf16 %v3672_v35, %v3672_v35 }
 0xf20   : > { %v3642_v14 = vpop.f32.mrf.mxu3 }
 0xf21   : > { %3676 = vst.msk [vmem:[#allocation3 + $0x4] sm:$0xf] %vm493_vm0, %v3674_v41  ;;  %v3646_v16 = vadd.f32 %v3642_v14, %v3595_v45  ;;  %v3826_v41 = vpop.permute.xlu1 %3825 }
 0xf23   : > { %v3653_v42 = vadd.f32 %v6204_v26, %v3646_v16  ;;  %v6078_v26 = vld [vmem:[%s7489_s5 + $0x180] sm:$0xff] }
 0xf24   : > { %3910 = vmatpush.bf16.msrb.mxu0 %v6078_v26 }
 0xf25   : > { %v3655_v11 = vsel %vm542_vm1, %v3653_v42, 0.0  ;;  %v3673_v32 = vadd.f32 %v3669_v48, %v3653_v42 }
 0xf26   : > { %v3656_v50 = vadd.f32 %v3655_v11, %v3654_v49 }
 0xf27   : > { %v3675_v39 = vpack.c.bf16 %v3673_v32, %v3673_v32 }
 0xf28   : > { %v3657_v51 = vrot.slane %v3656_v50, 4  ;;  %v3679_v54 = vld [vmem:[#allocation3 + $0x4] sm:$0xf] }
 0xf29   : > { %3677 = vst.msk [vmem:[#allocation3 + $0x8] sm:$0xf] %vm493_vm0, %v3675_v39  ;;  %v3688_v55 = vunpack.c.l.b16 %v3679_v54  ;;  %v3919_v54 = vld [vmem:[#allocation3 + $0xc] sm:$0x1] }
 0xf2a   : > { %v3658_v43 = vadd.f32 %v3657_v51, %v3656_v50  ;;  %v3828_v50 = vpop.permute.xlu2 %3827  ;;  %v3927_v57 = vunpack.c.l.b16 %v3919_v54 }
 0xf2b   : > { %v3716_v58 = vpack.c.b16 %v3688_v55, %v3715_v25 }
 0xf2c   : > { %v3659_v56 = vrot.slane %v3658_v43, 2 }
 0xf2d   : > { %v3719_v0 = vshrl.u32 %v3716_v58, 16  ;;  %v3722_v30 = vshll.u32 %v3716_v58, 16 }
 0xf2e   : > { %v3660_v59 = vadd.f32 %v3659_v56, %v3658_v43 }
 0xf2f   : > { %v3721_v6 = vrot.slane %v3719_v0, 3  ;;  %v3724_v7 = vrot.slane %v3722_v30, 4 }
 0xf30   : > { %v3680_v60 = vld [vmem:[#allocation3 + $0x8] sm:$0xf]  ;;  %v3661_v61 = vrot.slane %v3660_v59, 1 }
 0xf31   : > { %v6076_v62 = vld [vmem:[#allocation3 + $0x4] sm:$0xff]  ;;  %v3689_v24 = vunpack.c.l.b16 %v3680_v60  ;;  %v3725_v15 = vor.u32 %v3724_v7, %v3721_v6 }
 0xf32   : > { %v3662_v34 = vadd.f32 %v3661_v61, %v3660_v59  ;;  %v3774_v52 = vshll.u32 %v6076_v62, 16  ;;  %v3772_v4 = vshrl.u32 %v6076_v62, 16  ;;  %v3929_v62 = vpack.c.b16 %v3927_v57, %v3927_v57 }
 0xf33   : > { %v3690_v1 = vpack.c.b16 %v3689_v24, %v3688_v55  ;;  %v3717_v2 = vpack.c.b16 %v3689_v24, %v3689_v24  ;;  %v3837_v55 = vld [vmem:[#allocation3] sm:$0x8] }
 0xf34   : > { %v3663_v3 = vmul.f32 %v3662_v34, %v6550_v47  ;;  %v3776_v5 = vrot.slane %v3774_v52, 1  ;;  %v3874_v59 = vunpack.c.l.b16 %v3837_v55  ;;  %v3938_v52 = vshll.u32 %v3929_v62, 16 }
 0xf35   : > { %5676 = vmatmul.msk.bf16.vlgmr.msra.gmra.mxu0 %vm542_vm1, %v3690_v1  ;;  %v3727_v10 = vshrl.u32 %v3717_v2, 16  ;;  %v3730_v13 = vshll.u32 %v3717_v2, 16 }
 0xf36   : > { %4621 = vrot.lane.b32.xlu2 %v3663_v3, %s7540_s30  ;;  %v3777_v18 = vor.u32 %v3776_v5, %v3772_v4 }
 0xf37   : > { %v3729_v44 = vrot.slane %v3727_v10, 3  ;;  %v3732_v19 = vrot.slane %v3730_v13, 4 }
 0xf38   : > { %v3782_v20 = vsel %vm631_vm4, %v3777_v18, %v3781_v36  ;;  %v3940_v18 = vrot.slane %v3938_v52, 1 }
 0xf39   : > { %5692 = vmatmul.msk.bf16.vlgmr.msra.gmra.mxu2 %vm542_vm1, %v3782_v20  ;;  %v3733_v46 = vor.u32 %v3732_v19, %v3729_v44 }
 0xf3b   : > { %v3734_v22 = vsel %vm518_vm3, %v3725_v15, %v3733_v46 }
 0xf3c   : > { %5681 = vmatmul.msk.bf16.vlgmr.msra.gmra.mxu1 %vm542_vm1, %v3734_v22 }
 0xfb2   : > { %v3709_v31 = vpop.f32.mrf.mxu0 }
 0xfb9   : > { %v3753_v37 = vpop.f32.mrf.mxu1 }
 0xfba   : > { %v3754_v38 = vadd.f32 %v3753_v37, %v3709_v31  ;;  %v3711_v14 = vpop.f32.mrf.mxu0 }
 0xfbc   : > { %v3801_v35 = vpop.f32.mrf.mxu2 }
 0xfbd   : > { %v3806_v12 = vadd.f32 %v3801_v35, %v3754_v38  ;;  %v6083_v38 = vld [vmem:[%s7489_s5 + $0x1a0] sm:$0xff]  ;;  %v6085_v35 = vld [vmem:[%s7489_s5 + $0x1a8] sm:$0xff] }
 0xfbe   : > { %4025 = vmatpush.bf16.msrb.mxu2 %v6083_v38  ;;  %4117 = vmatpush.bf16.msra.mxu0 %v6085_v35 }
 0xfbf   : > { %v3813_v45 = vadd.f32 %v6205_v17, %v3806_v12 }
 0xfc1   : > { %v3831_v16 = vadd.f32 %v3826_v41, %v3813_v45  ;;  %v3755_v42 = vpop.f32.mrf.mxu1  ;;  %v3815_v9 = vsel %vm542_vm1, %v3813_v45, 0.0 }
 0xfc2   : > { %v3756_v48 = vadd.f32 %v3755_v42, %v3711_v14 }
 0xfc3   : > { %v3833_v49 = vpack.c.bf16 %v3831_v16, %v3831_v16  ;;  %v6206_v16 = vld [vmem:[%s7490_s6 + $0x10] ss:$0 sm:$0xff] }
 0xfc4   : > { %v3803_v11 = vpop.f32.mrf.mxu2 }
 0xfc5   : > { %3835 = vst.msk [vmem:[#allocation3 + $0x4] sm:$0xf] %vm493_vm0, %v3833_v49  ;;  %v3807_v32 = vadd.f32 %v3803_v11, %v3756_v48  ;;  %v3985_v49 = vpop.permute.xlu0 %3984 }
 0xfc7   : > { %v3814_v40 = vadd.f32 %v6205_v17, %v3807_v32  ;;  %v6082_v17 = vld [vmem:[%s7489_s5 + $0x198] sm:$0xff] }
 0xfc8   : > { %4069 = vmatpush.bf16.msrb.mxu3 %v6082_v17 }
 0xfc9   : > { %v3816_v39 = vsel %vm542_vm1, %v3814_v40, 0.0  ;;  %v3832_v51 = vadd.f32 %v3828_v50, %v3814_v40 }
 0xfca   : > { %v3817_v21 = vadd.f32 %v3816_v39, %v3815_v9 }
 0xfcb   : > { %v3834_v25 = vpack.c.bf16 %v3832_v51, %v3832_v51 }
 0xfcc   : > { %v3818_v43 = vrot.slane %v3817_v21, 4  ;;  %v3838_v56 = vld [vmem:[#allocation3 + $0x4] sm:$0xf] }
 0xfcd   : > { %3836 = vst.msk [vmem:[#allocation3 + $0x8] sm:$0xf] %vm493_vm0, %v3834_v25  ;;  %v3847_v58 = vunpack.c.l.b16 %v3838_v56  ;;  %v4078_v56 = vld [vmem:[#allocation3 + $0xc] sm:$0x1] }
 0xfce   : > { %v3819_v60 = vadd.f32 %v3818_v43, %v3817_v21  ;;  %v3987_v21 = vpop.permute.xlu1 %3986  ;;  %v4086_v62 = vunpack.c.l.b16 %v4078_v56 }
 0xfcf   : > { %v3875_v63 = vpack.c.b16 %v3847_v58, %v3874_v59 }
 0xfd0   : > { %v3820_v61 = vrot.slane %v3819_v60, 2 }
 0xfd1   : > { %v3878_v2 = vshrl.u32 %v3875_v63, 16  ;;  %v3881_v3 = vshll.u32 %v3875_v63, 16 }
 0xfd2   : > { %v3821_v24 = vadd.f32 %v3820_v61, %v3819_v60 }
 0xfd3   : > { %v3880_v44 = vrot.slane %v3878_v2, 3  ;;  %v3883_v19 = vrot.slane %v3881_v3, 4 }
 0xfd4   : > { %v3839_v0 = vld [vmem:[#allocation3 + $0x8] sm:$0xf]  ;;  %v3822_v30 = vrot.slane %v3821_v24, 1 }
 0xfd5   : > { %v6080_v34 = vld [vmem:[#allocation3 + $0x4] sm:$0xff]  ;;  %v3848_v1 = vunpack.c.l.b16 %v3839_v0  ;;  %v3884_v29 = vor.u32 %v3883_v19, %v3880_v44 }
 0xfd6   : > { %v3823_v4 = vadd.f32 %v3822_v30, %v3821_v24  ;;  %v3933_v5 = vshll.u32 %v6080_v34, 16  ;;  %v3931_v10 = vshrl.u32 %v6080_v34, 16  ;;  %v4088_v34 = vpack.c.b16 %v4086_v62, %v4086_v62 }
 0xfd7   : > { %v3849_v36 = vpack.c.b16 %v3848_v1, %v3847_v58  ;;  %v3876_v6 = vpack.c.b16 %v3848_v1, %v3848_v1  ;;  %v3996_v58 = vld [vmem:[#allocation3] sm:$0x8] }
 0xfd8   : > { %v3824_v7 = vmul.f32 %v3823_v4, %v6550_v47  ;;  %v3935_v13 = vrot.slane %v3933_v5, 1  ;;  %v4033_v24 = vunpack.c.l.b16 %v3996_v58  ;;  %v4097_v5 = vshll.u32 %v4088_v34, 16 }
 0xfd9   : > { %5702 = vmatmul.msk.bf16.vlgmr.msra.gmra.mxu3 %vm542_vm1, %v3849_v36  ;;  %v3886_v20 = vshrl.u32 %v3876_v6, 16  ;;  %v3889_v15 = vshll.u32 %v3876_v6, 16 }
 0xfda   : > { %4625 = vrot.lane.b32.xlu0 %v3824_v7, %s7541_s0  ;;  %v3936_v46 = vor.u32 %v3935_v13, %v3931_v10  ;;  %s5091_s0 = sshll.u32 %s5087_s29, 4  ;;  %s5092_s0 = int_to_ptr.hbm [resolvable:$true] %s5091_s0 }
 0xfdb   : > { %v3888_v22 = vrot.slane %v3886_v20, 3  ;;  %v3891_v23 = vrot.slane %v3889_v15, 4  ;;  %s6246_s25 = sshra.s32 %s5092_s0, 4  ;;  %s6247_s25 = int_to_ptr.hbm [resolvable:$true] %s6246_s25 }
 0xfdc   : > { %v3941_v26 = vsel %vm631_vm4, %v3936_v46, %v3940_v18  ;;  %v4099_v46 = vrot.slane %v4097_v5, 1  ;;  %s6248_s22 = scalar_lea.hbm %s6247_s25, 1  ;;  %p6253_p0 = scmp.lt.s32.totalorder %s6247_s25, %s7499_s15 }
 0xfdd   : > { %5718 = vmatmul.msk.bf16.vlgmr.msrb.gmra.mxu1 %vm542_vm1, %v3941_v26  ;;  %v3892_v31 = vor.u32 %v3891_v23, %v3888_v22  ;;  %p6249_p11 = scmp.ne.s32.totalorder %s6247_s25, %s6248_s22 }
 0xfdf   : > { %v3893_v37 = vsel %vm518_vm3, %v3884_v29, %v3892_v31  ;;  %p6250_p12 = pnand %p6249_p11, %p6429_p5 }
 0xfe0   : > { %5707 = vmatmul.msk.bf16.vlgmr.msrb.gmra.mxu0 %vm542_vm1, %v3893_v37 }
 0xfe1   : > { %p6251_p13 = pneg %p6250_p12 }
0x105a   : > { %v3960_v45 = vpop.f32.mrf.mxu1 }
0x105c   : > { %v3868_v12 = vpop.f32.mrf.mxu3 }
0x105d   : > { %v3912_v41 = vpop.f32.mrf.mxu0 }
0x105e   : > { %v3913_v14 = vadd.f32 %v3912_v41, %v3868_v12  ;;  %v6086_v41 = vld [vmem:[%s7489_s5 + $0x1b0] sm:$0xff] }
0x105f   : > { %4228 = vmatpush.bf16.msra.mxu2 %v6086_v41 }
0x1060   : > { %v3965_v42 = vadd.f32 %v3960_v45, %v3913_v14  ;;  %v6089_v14 = vld [vmem:[%s7489_s5 + $0x1c0] sm:$0xff] }
0x1061   : > { %4276 = vmatpush.bf16.msra.mxu3 %v6089_v14 }
0x1062   : > { %v3972_v48 = vadd.f32 %v6206_v16, %v3965_v42  ;;  %v3962_v39 = vpop.f32.mrf.mxu1 }
0x1064   : > { %v3990_v11 = vadd.f32 %v3985_v49, %v3972_v48  ;;  %v3870_v32 = vpop.f32.mrf.mxu3  ;;  %v3974_v55 = vsel %vm542_vm1, %v3972_v48, 0.0 }
0x1065   : > { %v3914_v40 = vpop.f32.mrf.mxu0 }
0x1066   : > { %v3992_v50 = vpack.c.bf16 %v3990_v11, %v3990_v11  ;;  %v3915_v9 = vadd.f32 %v3914_v40, %v3870_v32  ;;  %v6207_v32 = vld [vmem:[%s7490_s6 + $0x11] ss:$0 sm:$0xff] }
0x1068   : > { %3994 = vst.msk [vmem:[#allocation3 + $0x4] sm:$0xf] %vm493_vm0, %v3992_v50  ;;  %v3966_v51 = vadd.f32 %v3962_v39, %v3915_v9  ;;  %v4144_v9 = vpop.permute.xlu2 %4143 }
0x106a   : > { %v3973_v54 = vadd.f32 %v6206_v16, %v3966_v51  ;;  %v6087_v16 = vld [vmem:[%s7489_s5 + $0x1b8] sm:$0xff] }
0x106b   : > { %4184 = vmatpush.bf16.msra.mxu1 %v6087_v16 }
0x106c   : > { %v3975_v25 = vsel %vm542_vm1, %v3973_v54, 0.0  ;;  %v3991_v43 = vadd.f32 %v3987_v21, %v3973_v54 }
0x106d   : > { %v3976_v57 = vadd.f32 %v3975_v25, %v3974_v55 }
0x106e   : > { %v3993_v59 = vpack.c.bf16 %v3991_v43, %v3991_v43 }
0x106f   : > { %v3977_v60 = vrot.slane %v3976_v57, 4  ;;  %v3997_v61 = vld [vmem:[#allocation3 + $0x4] sm:$0xf] }
0x1070   : > { %3995 = vst.msk [vmem:[#allocation3 + $0x8] sm:$0xf] %vm493_vm0, %v3993_v59  ;;  %v4006_v63 = vunpack.c.l.b16 %v3997_v61  ;;  %v4237_v61 = vld [vmem:[#allocation3 + $0xc] sm:$0x1] }
0x1071   : > { %v3978_v0 = vadd.f32 %v3977_v60, %v3976_v57  ;;  %v4146_v57 = vpop.permute.xlu0 %4145  ;;  %v4245_v34 = vunpack.c.l.b16 %v4237_v61 }
0x1072   : > { %v4034_v52 = vpack.c.b16 %v4006_v63, %v4033_v24 }
0x1073   : > { %v3979_v30 = vrot.slane %v3978_v0, 2 }
0x1074   : > { %v4037_v6 = vshrl.u32 %v4034_v52, 16  ;;  %v4040_v7 = vshll.u32 %v4034_v52, 16 }
0x1075   : > { %v3980_v1 = vadd.f32 %v3979_v30, %v3978_v0 }
0x1076   : > { %v4039_v22 = vrot.slane %v4037_v6, 3  ;;  %v4042_v23 = vrot.slane %v4040_v7, 4 }
0x1077   : > { %v3998_v2 = vld [vmem:[#allocation3 + $0x8] sm:$0xf]  ;;  %v3981_v3 = vrot.slane %v3980_v1, 1 }
0x1078   : > { %v6084_v4 = vld [vmem:[#allocation3 + $0x4] sm:$0xff]  ;;  %v4007_v36 = vunpack.c.l.b16 %v3998_v2  ;;  %v4043_v35 = vor.u32 %v4042_v23, %v4039_v22 }
0x1079   : > { %v3982_v10 = vadd.f32 %v3981_v3, %v3980_v1  ;;  %v4092_v13 = vshll.u32 %v6084_v4, 16  ;;  %v4090_v20 = vshrl.u32 %v6084_v4, 16  ;;  %v4247_v4 = vpack.c.b16 %v4245_v34, %v4245_v34 }
0x107a   : > { %v4008_v18 = vpack.c.b16 %v4007_v36, %v4006_v63  ;;  %v4035_v44 = vpack.c.b16 %v4007_v36, %v4007_v36  ;;  %v4155_v63 = vld [vmem:[#allocation3] sm:$0x8] }
0x107b   : > { %v3983_v19 = vmul.f32 %v3982_v10, %v6550_v47  ;;  %v4094_v15 = vrot.slane %v4092_v13, 1  ;;  %v4192_v1 = vunpack.c.l.b16 %v4155_v63  ;;  %v4256_v13 = vshll.u32 %v4247_v4, 16 }
0x107c   : > { %5728 = vmatmul.msk.bf16.vlgmr.msrb.gmra.mxu2 %vm542_vm1, %v4008_v18  ;;  %v4045_v26 = vshrl.u32 %v4035_v44, 16  ;;  %v4048_v29 = vshll.u32 %v4035_v44, 16 }
0x107d   : > { %4629 = vrot.lane.b32.xlu1 %v3983_v19, %s7542_s1  ;;  %v4095_v31 = vor.u32 %v4094_v15, %v4090_v20 }
0x107e   : > { %v4047_v37 = vrot.slane %v4045_v26, 3  ;;  %v4050_v38 = vrot.slane %v4048_v29, 4 }
0x107f   : > { %v4100_v17 = vsel %vm631_vm4, %v4095_v31, %v4099_v46  ;;  %v4258_v31 = vrot.slane %v4256_v13, 1 }
0x1080   : > { %5744 = vmatmul.msk.bf16.vlgmr.msra.gmra.mxu0 %vm542_vm1, %v4100_v17  ;;  %v4051_v12 = vor.u32 %v4050_v38, %v4047_v37 }
0x1082   : > { %v4052_v45 = vsel %vm518_vm3, %v4043_v35, %v4051_v12 }
0x1083   : > { %5733 = vmatmul.msk.bf16.vlgmr.msrb.gmra.mxu3 %vm542_vm1, %v4052_v45 }
0x10fd   : > { %v4119_v48 = vpop.f32.mrf.mxu0 }
0x10ff   : > { %v4027_v42 = vpop.f32.mrf.mxu2 }
0x1105   : > { %v4121_v25 = vpop.f32.mrf.mxu0 }
0x1106   : > { %v4071_v49 = vpop.f32.mrf.mxu3 }
0x1107   : > { %v4072_v11 = vadd.f32 %v4071_v49, %v4027_v42  ;;  %v4029_v51 = vpop.f32.mrf.mxu2  ;;  %v6093_v49 = vld [vmem:[%s7489_s5 + $0x1d8] sm:$0xff] }
0x1108   : > { %4435 = vmatpush.bf16.msrb.mxu2 %v6093_v49 }
0x1109   : > { %v4124_v40 = vadd.f32 %v4119_v48, %v4072_v11  ;;  %v6091_v11 = vld [vmem:[%s7489_s5 + $0x1d0] sm:$0xff] }
0x110a   : > { %4343 = vmatpush.bf16.msrb.mxu0 %v6091_v11 }
0x110b   : > { %v4131_v50 = vadd.f32 %v6207_v32, %v4124_v40 }
0x110d   : > { %v4149_v39 = vadd.f32 %v4144_v9, %v4131_v50  ;;  %v4133_v58 = vsel %vm542_vm1, %v4131_v50, 0.0 }
0x110e   : > { %v4073_v54 = vpop.f32.mrf.mxu3 }
0x110f   : > { %v4151_v21 = vpack.c.bf16 %v4149_v39, %v4149_v39  ;;  %v4074_v55 = vadd.f32 %v4073_v54, %v4029_v51  ;;  %v6208_v51 = vld [vmem:[%s7490_s6 + $0x12] ss:$0 sm:$0xff] }
0x1111   : > { %4153 = vst.msk [vmem:[#allocation3 + $0x4] sm:$0xf] %vm493_vm0, %v4151_v21  ;;  %v4125_v43 = vadd.f32 %v4121_v25, %v4074_v55  ;;  %v4303_v55 = vpop.permute.xlu1 %4302 }
0x1113   : > { %v4132_v56 = vadd.f32 %v6207_v32, %v4125_v43  ;;  %v6090_v32 = vld [vmem:[%s7489_s5 + $0x1c8] sm:$0xff] }
0x1114   : > { %4387 = vmatpush.bf16.msrb.mxu1 %v6090_v32 }
0x1115   : > { %v4134_v59 = vsel %vm542_vm1, %v4132_v56, 0.0  ;;  %v4150_v60 = vadd.f32 %v4146_v57, %v4132_v56 }
0x1116   : > { %v4135_v62 = vadd.f32 %v4134_v59, %v4133_v58 }
0x1117   : > { %v4152_v24 = vpack.c.bf16 %v4150_v60, %v4150_v60 }
0x1118   : > { %v4136_v0 = vrot.slane %v4135_v62, 4  ;;  %v4156_v30 = vld [vmem:[#allocation3 + $0x4] sm:$0xf] }
0x1119   : > { %4154 = vst.msk [vmem:[#allocation3 + $0x8] sm:$0xf] %vm493_vm0, %v4152_v24  ;;  %v4165_v52 = vunpack.c.l.b16 %v4156_v30  ;;  %v4396_v30 = vld [vmem:[#allocation3 + $0xc] sm:$0x1] }
0x111a   : > { %v4137_v2 = vadd.f32 %v4136_v0, %v4135_v62  ;;  %v4305_v62 = vpop.permute.xlu2 %4304  ;;  %v4404_v4 = vunpack.c.l.b16 %v4396_v30 }
0x111b   : > { %v4193_v5 = vpack.c.b16 %v4165_v52, %v4192_v1 }
0x111c   : > { %v4138_v3 = vrot.slane %v4137_v2, 2 }
0x111d   : > { %v4196_v44 = vshrl.u32 %v4193_v5, 16  ;;  %v4199_v19 = vshll.u32 %v4193_v5, 16 }
0x111e   : > { %v4139_v36 = vadd.f32 %v4138_v3, %v4137_v2 }
0x111f   : > { %v4198_v37 = vrot.slane %v4196_v44, 3  ;;  %v4201_v38 = vrot.slane %v4199_v19, 4 }
0x1120   : > { %v4157_v6 = vld [vmem:[#allocation3 + $0x8] sm:$0xf]  ;;  %v4140_v7 = vrot.slane %v4139_v36, 1 }
0x1121   : > { %v6088_v10 = vld [vmem:[#allocation3 + $0x4] sm:$0xff]  ;;  %v4166_v18 = vunpack.c.l.b16 %v4157_v6  ;;  %v4202_v16 = vor.u32 %v4201_v38, %v4198_v37 }
0x1122   : > { %v4141_v20 = vadd.f32 %v4140_v7, %v4139_v36  ;;  %v4251_v15 = vshll.u32 %v6088_v10, 16  ;;  %v4249_v26 = vshrl.u32 %v6088_v10, 16  ;;  %v4406_v10 = vpack.c.b16 %v4404_v4, %v4404_v4 }
0x1123   : > { %v4167_v46 = vpack.c.b16 %v4166_v18, %v4165_v52  ;;  %v4194_v22 = vpack.c.b16 %v4166_v18, %v4166_v18  ;;  %v4314_v52 = vld [vmem:[#allocation3] sm:$0x8] }
0x1124   : > { %v4142_v23 = vmul.f32 %v4141_v20, %v6550_v47  ;;  %v4253_v29 = vrot.slane %v4251_v15, 1  ;;  %v4351_v36 = vunpack.c.l.b16 %v4314_v52  ;;  %v4415_v15 = vshll.u32 %v4406_v10, 16  ;;  %v4462_v52 = vpop.permute.xlu0 %4461 }
0x1125   : > { %5754 = vmatmul.msk.bf16.vlgmr.msra.gmra.mxu1 %vm542_vm1, %v4167_v46  ;;  %v4204_v17 = vshrl.u32 %v4194_v22, 16  ;;  %v4207_v35 = vshll.u32 %v4194_v22, 16 }
0x1126   : > { %4633 = vrot.lane.b32.xlu2 %v4142_v23, %s7543_s2  ;;  %v4254_v12 = vor.u32 %v4253_v29, %v4249_v26 }
0x1127   : > { %v4206_v45 = vrot.slane %v4204_v17, 3  ;;  %v4209_v41 = vrot.slane %v4207_v35, 4 }
0x1128   : > { %v4259_v14 = vsel %vm631_vm4, %v4254_v12, %v4258_v31  ;;  %v4417_v12 = vrot.slane %v4415_v15, 1 }
0x1129   : > { %5770 = vmatmul.msk.bf16.vlgmr.msra.gmra.mxu3 %vm542_vm1, %v4259_v14  ;;  %v4210_v42 = vor.u32 %v4209_v41, %v4206_v45 }
0x112b   : > { %v4211_v48 = vsel %vm518_vm3, %v4202_v16, %v4210_v42 }
0x112c   : > { %5759 = vmatmul.msk.bf16.vlgmr.msra.gmra.mxu2 %vm542_vm1, %v4211_v48 }
0x11a2   : > { %v4186_v40 = vpop.f32.mrf.mxu1 }
0x11aa   : > { %v4188_v43 = vpop.f32.mrf.mxu1 }
0x11ac   : > { %v4278_v50 = vpop.f32.mrf.mxu3 }
0x11af   : > { %v4230_v9 = vpop.f32.mrf.mxu2 }
0x11b0   : > { %v4231_v39 = vadd.f32 %v4230_v9, %v4186_v40  ;;  %v6097_v9 = vld [vmem:[%s7489_s5 + $0x1f0] sm:$0xff] }
0x11b1   : > { %4594 = vmatpush.bf16.msra.mxu1 %v6097_v9 }
0x11b2   : > { %v4283_v54 = vadd.f32 %v4278_v50, %v4231_v39  ;;  %v6123_v39 = vld [vmem:[%s7497_s13 + $0x78] sm:$0xff] }
0x11b4   : > { %v4290_v21 = vadd.f32 %v6208_v51, %v4283_v54  ;;  %v4280_v59 = vpop.f32.mrf.mxu3  ;;  %v6115_v54 = vld [vmem:[%s7497_s13 + $0x38] sm:$0xff] }
0x11b6   : > { %v4308_v25 = vadd.f32 %v4303_v55, %v4290_v21  ;;  %v4292_v63 = vsel %vm542_vm1, %v4290_v21, 0.0  ;;  %v6095_v21 = vld [vmem:[%s7489_s5 + $0x1e8] sm:$0xff]  ;;  %v6122_v55 = vld [vmem:[%s7497_s13 + $0x70] sm:$0xff] }
0x11b7   : > { %v4232_v56 = vpop.f32.mrf.mxu2  ;;  %4502 = vmatpush.bf16.msrb.mxu3 %v6095_v21 }
0x11b8   : > { %v4310_v57 = vpack.c.bf16 %v4308_v25, %v4308_v25  ;;  %v4233_v58 = vadd.f32 %v4232_v56, %v4188_v43  ;;  %v6114_v25 = vld [vmem:[%s7497_s13 + $0x30] sm:$0xff]  ;;  %v6121_v43 = vld [vmem:[%s7497_s13 + $0x68] sm:$0xff] }
0x11ba   : > { %4312 = vst.msk [vmem:[#allocation3 + $0x4] sm:$0xf] %vm493_vm0, %v4310_v57  ;;  %v4284_v60 = vadd.f32 %v4280_v59, %v4233_v58  ;;  %v6113_v57 = vld [vmem:[%s7497_s13 + $0x28] sm:$0xff]  ;;  %v6120_v58 = vld [vmem:[%s7497_s13 + $0x60] sm:$0xff] }
0x11bc   : > { %v4291_v61 = vadd.f32 %v6208_v51, %v4284_v60  ;;  %v6094_v51 = vld [vmem:[%s7489_s5 + $0x1e0] sm:$0xff] }
0x11bd   : > { %4546 = vmatpush.bf16.msra.mxu0 %v6094_v51 }
0x11be   : > { %v4293_v24 = vsel %vm542_vm1, %v4291_v61, 0.0  ;;  %v4309_v0 = vadd.f32 %v4305_v62, %v4291_v61  ;;  %v6112_v61 = vld [vmem:[%s7497_s13 + $0x20] sm:$0xff]  ;;  %v6209_v62 = vld [vmem:[%s7490_s6 + $0x13] ss:$0 sm:$0xff] }
0x11bf   : > { %v4294_v34 = vadd.f32 %v4293_v24, %v4292_v63  ;;  %v6119_v24 = vld [vmem:[%s7497_s13 + $0x58] sm:$0xff] }
0x11c0   : > { %v4311_v1 = vpack.c.bf16 %v4309_v0, %v4309_v0 }
0x11c1   : > { %v4295_v2 = vrot.slane %v4294_v34, 4  ;;  %v4315_v3 = vld [vmem:[#allocation3 + $0x4] sm:$0xf] }
0x11c2   : > { %4313 = vst.msk [vmem:[#allocation3 + $0x8] sm:$0xf] %vm493_vm0, %v4311_v1  ;;  %v4324_v5 = vunpack.c.l.b16 %v4315_v3  ;;  %v6118_v1 = vld [vmem:[%s7497_s13 + $0x50] sm:$0xff] }
0x11c3   : > { %v4296_v6 = vadd.f32 %v4295_v2, %v4294_v34  ;;  %v6111_v34 = vld [vmem:[%s7497_s13 + $0x18] sm:$0xff] }
0x11c4   : > { %v4352_v13 = vpack.c.b16 %v4324_v5, %v4351_v36 }
0x11c5   : > { %v4297_v7 = vrot.slane %v4296_v6, 2 }
0x11c6   : > { %v4355_v22 = vshrl.u32 %v4352_v13, 16  ;;  %v4358_v23 = vshll.u32 %v4352_v13, 16 }
0x11c7   : > { %v4298_v18 = vadd.f32 %v4297_v7, %v4296_v6  ;;  %v6117_v6 = vld [vmem:[%s7497_s13 + $0x48] sm:$0xff] }
0x11c8   : > { %v4357_v45 = vrot.slane %v4355_v22, 3  ;;  %v4360_v41 = vrot.slane %v4358_v23, 4  ;;  %v4555_v23 = vld [vmem:[#allocation3 + $0xc] sm:$0x1] }
0x11c9   : > { %v4316_v44 = vld [vmem:[#allocation3 + $0x8] sm:$0xf]  ;;  %v4299_v19 = vrot.slane %v4298_v18, 1 }
0x11ca   : > { %v6092_v20 = vld [vmem:[#allocation3 + $0x4] sm:$0xff]  ;;  %v4325_v46 = vunpack.c.l.b16 %v4316_v44  ;;  %v4361_v32 = vor.u32 %v4360_v41, %v4357_v45  ;;  %v6116_v44 = vld [vmem:[%s7497_s13 + $0x40] sm:$0xff] }
0x11cb   : > { %v4300_v26 = vadd.f32 %v4299_v19, %v4298_v18  ;;  %v4410_v29 = vshll.u32 %v6092_v20, 16  ;;  %v4408_v17 = vshrl.u32 %v6092_v20, 16  ;;  %v6109_v18 = vld [vmem:[%s7497_s13 + $0x8] sm:$0xff]  ;;  %v4464_v20 = vpop.permute.xlu1 %4463 }
0x11cc   : > { %v4326_v31 = vpack.c.b16 %v4325_v46, %v4324_v5  ;;  %v4353_v37 = vpack.c.b16 %v4325_v46, %v4325_v46  ;;  %v6110_v5 = vld [vmem:[%s7497_s13 + $0x10] sm:$0xff] }
0x11cd   : > { %v4301_v38 = vmul.f32 %v4300_v26, %v6550_v47  ;;  %v4412_v35 = vrot.slane %v4410_v29, 1  ;;  %v6108_v26 = vld [vmem:[%s7497_s13] sm:$0xff] }
0x11ce   : > { %5780 = vmatmul.msk.bf16.vlgmr.msrb.gmra.mxu0 %vm542_vm1, %v4326_v31  ;;  %v4363_v14 = vshrl.u32 %v4353_v37, 16  ;;  %v4366_v16 = vshll.u32 %v4353_v37, 16  ;;  %v4473_v31 = vld [vmem:[#allocation3] sm:$0x8] }
0x11cf   : > { %4637 = vrot.lane.b32.xlu0 %v4301_v38, %s7544_s3  ;;  %v4413_v42 = vor.u32 %v4412_v35, %v4408_v17  ;;  %4995 = vmatpush.bf16.msrb.mxu0 %v6115_v54  ;;  %v4563_v35 = vunpack.c.l.b16 %v4555_v23  ;;  %v4510_v45 = vunpack.c.l.b16 %v4473_v31  ;;  %v6102_v23 = vld [vmem:[%s7491_s7 + $0xa0] sm:$0xff]  ;;  %s5079_s3 = scalar_lea.sflag [#allocation6], %s485_s24 }
0x11d0   : > { %v4365_v48 = vrot.slane %v4363_v14, 3  ;;  %v4368_v49 = vrot.slane %v4366_v16, 4 }
0x11d1   : > { %v4418_v11 = vsel %vm631_vm4, %v4413_v42, %v4417_v12  ;;  %v4565_v16 = vpack.c.b16 %v4563_v35, %v4563_v35 }
0x11d2   : > { %5796 = vmatmul.msk.bf16.vlgmr.msrb.gmra.mxu2 %vm542_vm1, %v4418_v11  ;;  %v4369_v40 = vor.u32 %v4368_v49, %v4365_v48 }
0x11d3   : > { %4996 = vmatpush.bf16.msrb.mxu0 %v6114_v25 }
0x11d4   : > { %v4370_v50 = vsel %vm518_vm3, %v4361_v32, %v4369_v40  ;;  %v4574_v40 = vshll.u32 %v4565_v16, 16 }
0x11d5   : > { %5785 = vmatmul.msk.bf16.vlgmr.msrb.gmra.mxu1 %vm542_vm1, %v4370_v50 }
0x11d6   : > { %5008 = vmatpush.bf16.msrb.mxu1 %v6123_v39 }
0x11d7   : > { %4997 = vmatpush.bf16.msrb.mxu0 %v6113_v57  ;;  %v4576_v57 = vrot.slane %v4574_v40, 1  ;;  %v6099_v40 = vld [vmem:[%s7491_s7 + $0x88] sm:$0xff] }
0x11da   : > { %5009 = vmatpush.bf16.msrb.mxu1 %v6122_v55 }
0x11db   : > { %4998 = vmatpush.bf16.msrb.mxu0 %v6112_v61 }
0x11de   : > { %5010 = vmatpush.bf16.msrb.mxu1 %v6121_v43 }
0x11df   : > { %4999 = vmatpush.bf16.msrb.mxu0 %v6111_v34 }
0x11e2   : > { %5011 = vmatpush.bf16.msrb.mxu1 %v6120_v58 }
0x11e3   : > { %5000 = vmatpush.bf16.msrb.mxu0 %v6110_v5 }
0x11e6   : > { %5012 = vmatpush.bf16.msrb.mxu1 %v6119_v24 }
0x11e7   : > { %5001 = vmatpush.bf16.msrb.mxu0 %v6109_v18 }
0x11ea   : > { %5013 = vmatpush.bf16.msrb.mxu1 %v6118_v1  ;;  %v3480_v1 = vmul.f32 %v7126_v28, %v7093_v53  ;;  %v6105_v28 = vld [vmem:[%s7491_s7 + $0xb8] sm:$0xff] }
0x11eb   : > { %5002 = vmatpush.bf16.msrb.mxu0 %v6108_v26  ;;  %4723 = vmatpush.bf16.msra.mxu2 %v6105_v28 }
0x11ee   : > { %5014 = vmatpush.bf16.msrb.mxu1 %v6117_v6 }
0x11f2   : > { %5015 = vmatpush.bf16.msrb.mxu1 %v6116_v44  ;;  %v6103_v44 = vld [vmem:[%s7491_s7 + $0xa8] sm:$0xff] }
0x124b   : > { %v4345_v56 = vpop.f32.mrf.mxu0 }
0x1252   : > { %v4389_v59 = vpop.f32.mrf.mxu1 }
0x1253   : > { %v4390_v60 = vadd.f32 %v4389_v59, %v4345_v56  ;;  %v4347_v2 = vpop.f32.mrf.mxu0 }
0x1255   : > { %v4437_v63 = vpop.f32.mrf.mxu2 }
0x1256   : > { %v4442_v0 = vadd.f32 %v4437_v63, %v4390_v60 }
0x1258   : > { %v4449_v30 = vadd.f32 %v6209_v62, %v4442_v0 }
0x125a   : > { %v4467_v3 = vadd.f32 %v4462_v52, %v4449_v30  ;;  %v4391_v4 = vpop.f32.mrf.mxu1  ;;  %v4451_v15 = vsel %vm542_vm1, %v4449_v30, 0.0 }
0x125b   : > { %v4392_v36 = vadd.f32 %v4391_v4, %v4347_v2  ;;  %v5641_v2 = vld [vmem:[%s7496_s12 + $0x1] sm:$0x1]  ;;  %v2100_v4 = vld [vmem:[%s7496_s12] sm:$0x1] }
0x125c   : > { %v4469_v7 = vpack.c.bf16 %v4467_v3, %v4467_v3  ;;  %v2101_v3 = vmul.f32 %v6811_v8, %v6778_v27  ;;  %v3481_v5 = vadd.f32 %v5641_v2, %v3480_v1  ;;  %v6104_v27 = vld [vmem:[%s7491_s7 + $0xb0] sm:$0xff] }
0x125d   : > { %v4439_v10 = vpop.f32.mrf.mxu2  ;;  %4724 = vmatpush.bf16.msra.mxu2 %v6104_v27  ;;  %v6131_v27 = vld [vmem:[%s7497_s13 + $0xb8] sm:$0xff] }
0x125e   : > { %4471 = vst.msk [vmem:[#allocation3 + $0x4] sm:$0xf] %vm493_vm0, %v4469_v7  ;;  %v4443_v13 = vadd.f32 %v4439_v10, %v4392_v36  ;;  %v2102_v36 = vadd.f32 %v2101_v3, %v2100_v4  ;;  %v4800_v6 = vpack.c.bf16 %v3481_v5, %v3481_v5 }
0x1260   : > { %v4450_v19 = vadd.f32 %v6209_v62, %v4443_v13  ;;  %v4799_v7 = vpack.c.bf16 %v2102_v36, %v2102_v36 }
0x1261   : > { %4725 = vmatpush.bf16.msra.mxu2 %v6103_v44  ;;  %v6128_v44 = vld [vmem:[%s7497_s13 + $0xa0] sm:$0xff] }
0x1262   : > { %v4452_v46 = vsel %vm542_vm1, %v4450_v19, 0.0  ;;  %v4468_v22 = vadd.f32 %v4464_v20, %v4450_v19  ;;  %v6210_v20 = vld [vmem:[%s7490_s6 + $0x14] ss:$0 sm:$0xff] }
0x1263   : > { %v4453_v29 = vadd.f32 %v4452_v46, %v4451_v15 }
0x1264   : > { %v4470_v37 = vpack.c.bf16 %v4468_v22, %v4468_v22 }
0x1265   : > { %v4454_v38 = vrot.slane %v4453_v29, 4  ;;  %v4474_v17 = vld [vmem:[#allocation3 + $0x4] sm:$0xf]  ;;  %4726 = vmatpush.bf16.msra.mxu2 %v6102_v23  ;;  %v6124_v23 = vld [vmem:[%s7497_s13 + $0x80] sm:$0xff] }
0x1266   : > { %4472 = vst.msk [vmem:[#allocation3 + $0x8] sm:$0xf] %vm493_vm0, %v4470_v37  ;;  %v4483_v12 = vunpack.c.l.b16 %v4474_v17  ;;  %v6101_v17 = vld [vmem:[%s7491_s7 + $0x98] sm:$0xff]  ;;  %vm7555_vm0 = vcmask 785408  }
0x1267   : > { %v4455_v41 = vadd.f32 %v4454_v38, %v4453_v29  ;;  %v4850_v38 = vld [vmem:[%s7498_s14] sm:$0x1] }
0x1268   : > { %v4511_v42 = vpack.c.b16 %v4483_v12, %v4510_v45 }
0x1269   : > { %v4456_v14 = vrot.slane %v4455_v41, 2  ;;  %4727 = vmatpush.bf16.msra.mxu2 %v6101_v17 }
0x126a   : > { %v4514_v9 = vshrl.u32 %v4511_v42, 16  ;;  %v4517_v39 = vshll.u32 %v4511_v42, 16  ;;  %v6100_v42 = vld [vmem:[%s7491_s7 + $0x90] sm:$0xff] }
0x126b   : > { %v4457_v48 = vadd.f32 %v4456_v14, %v4455_v41 }
0x126c   : > { %v4516_v58 = vrot.slane %v4514_v9, 3  ;;  %v4519_v59 = vrot.slane %v4517_v39, 4 }
0x126d   : > { %v4475_v49 = vld [vmem:[#allocation3 + $0x8] sm:$0xf]  ;;  %v4458_v11 = vrot.slane %v4457_v48, 1  ;;  %4728 = vmatpush.bf16.msra.mxu2 %v6100_v42 }
0x126e   : > { %v6096_v32 = vld [vmem:[#allocation3 + $0x4] sm:$0xff]  ;;  %v4484_v50 = vunpack.c.l.b16 %v4475_v49  ;;  %v4520_v30 = vor.u32 %v4519_v59, %v4516_v58  ;;  %v4622_v59 = vpop.permute.xlu2 %4621 }
0x126f   : > { %v4459_v51 = vadd.f32 %v4458_v11, %v4457_v48  ;;  %v4569_v54 = vshll.u32 %v6096_v32, 16  ;;  %v4567_v43 = vshrl.u32 %v6096_v32, 16 }
0x1270   : > { %v4485_v21 = vpack.c.b16 %v4484_v50, %v4483_v12  ;;  %v4512_v55 = vpack.c.b16 %v4484_v50, %v4484_v50 }
0x1271   : > { %v4460_v25 = vmul.f32 %v4459_v51, %v6550_v47  ;;  %v4571_v56 = vrot.slane %v4569_v54, 1  ;;  %4729 = vmatpush.bf16.msra.mxu2 %v6099_v40 }
0x1272   : > { %5806 = vmatmul.msk.bf16.vlgmr.msrb.gmra.mxu3 %vm542_vm1, %v4485_v21  ;;  %v4522_v60 = vshrl.u32 %v4512_v55, 16  ;;  %v4525_v61 = vshll.u32 %v4512_v55, 16  ;;  %v6098_v21 = vld [vmem:[%s7491_s7 + $0x80] sm:$0xff]  ;;  %v3506_v55 = vrot.slane %v7134_v33, 4 }
0x1273   : > { %4641 = vrot.lane.b32.xlu1 %v4460_v25, %s7545_s26  ;;  %v4572_v62 = vor.u32 %v4571_v56, %v4567_v43  ;;  %v6107_v25 = vld [vmem:[%s7493_s9 + $0x28] sm:$0xff]  ;;  %v6106_v56 = vld [vmem:[%s7493_s9 + $0x20] sm:$0xff]  ;;  %s5089_s26 = sshll.u32 %s486_s17, 4  ;;  %s5090_s26 = int_to_ptr.vmem [resolvable:$true] %s5089_s26 }
0x1274   : > { %v4524_v63 = vrot.slane %v4522_v60, 3  ;;  %v4527_v24 = vrot.slane %v4525_v61, 4  ;;  %v3507_v43 = vadd.f32 %v3506_v55, %v7134_v33  ;;  %4766 = vmatpush.bf16.msra.mxu3 %v6107_v25  ;;  %v4626_v61 = vpop.permute.xlu0 %4625 }
0x1275   : > { %v4577_v0 = vsel %vm631_vm4, %v4572_v62, %v4576_v57  ;;  %4730 = vmatpush.bf16.msra.mxu2 %v6098_v21 }
0x1276   : > { %5822 = vmatmul.msk.bf16.vlgmr.msra.gmra.mxu1 %vm542_vm1, %v4577_v0  ;;  %v4528_v34 = vor.u32 %v4527_v24, %v4524_v63  ;;  %v3508_v57 = vrot.slane %v3507_v43, 2  ;;  %v4630_v63 = vpop.permute.xlu1 %4629  ;;  %v4634_v24 = vpop.permute.xlu2 %4633 }
0x1278   : > { %v4529_v52 = vsel %vm518_vm3, %v4520_v30, %v4528_v34  ;;  %4767 = vmatpush.bf16.msra.mxu3 %v6106_v56  ;;  %v3509_v58 = vadd.f32 %v3508_v57, %v3507_v43  ;;  %vm7556_vm3 = vcmask 916480  }
0x1279   : > { %5811 = vmatmul.msk.bf16.vlgmr.msra.gmra.mxu0 %vm542_vm1, %v4529_v52 }
0x127a   : > { %v3510_v60 = vrot.slane %v3509_v58, 1 }
0x127c   : > { %v3511_v62 = vadd.f32 %v3510_v60, %v3509_v58  ;;  %v4638_v34 = vpop.permute.xlu0 %4637  ;;  %5021 = vmatpush.bf16.msrb.mxu3 %v6131_v27 }
0x127e   : > { %v3512_v0 = vmul.f32 %v3511_v62, %v6550_v47 }
0x1280   : > { %v4648_v30 = vsel %vm542_vm1, %v3512_v0, %v4622_v59 }
0x1281   : > { %v4649_v33 = vsel %vm1953_vm8, %v4648_v30, %v4626_v61 }
0x1282   : > { %v4650_v52 = vsel %vm1955_vm9, %v4649_v33, %v4630_v63 }
0x1283   : > { %v4651_v2 = vsel %vm1957_vm10, %v4650_v52, %v4634_v24  ;;  %vm5035_vm10 = vcmask 253952  }
0x1284   : > { %v4652_v3 = vsel %vm1959_vm11, %v4651_v2, %v4638_v34 }
0x1286   : > { %5016 = vmatmul.bf16.vlgmr.msrb.gmra.mxu1 %v4800_v6 }
0x1289   : > { %5003 = vmatmul.bf16.vlgmr.msrb.gmra.mxu0 %v4799_v7 }
0x12e5   : > { %v4642_v1 = vpop.permute.xlu1 %4641 }
0x12e6   : > { %v4653_v4 = vsel %vm7555_vm0, %v4652_v3, %v4642_v1 }
0x12f3   : > { %v4596_v10 = vpop.f32.mrf.mxu1 }
0x12f5   : > { %v4504_v13 = vpop.f32.mrf.mxu3 }
0x12f6   : > { %v4548_v53 = vpop.f32.mrf.mxu0 }
0x12f7   : > { %v4549_v8 = vadd.f32 %v4548_v53, %v4504_v13 }
0x12f9   : > { %v4601_v19 = vadd.f32 %v4596_v10, %v4549_v8  ;;  %v6130_v8 = vld [vmem:[%s7497_s13 + $0xb0] sm:$0xff] }
0x12fa   : > { %5022 = vmatpush.bf16.msrb.mxu3 %v6130_v8 }
0x12fb   : > { %v4598_v18 = vpop.f32.mrf.mxu1  ;;  %v4608_v26 = vadd.f32 %v6210_v20, %v4601_v19  ;;  %v6127_v19 = vld [vmem:[%s7497_s13 + $0x98] sm:$0xff] }
0x12fd   : > { %v4506_v15 = vpop.f32.mrf.mxu3  ;;  %v4610_v35 = vsel %vm542_vm1, %v4608_v26, 0.0 }
0x12fe   : > { %v4550_v46 = vpop.f32.mrf.mxu0 }
0x12ff   : > { %v4551_v22 = vadd.f32 %v4550_v46, %v4506_v15  ;;  %v6125_v15 = vld [vmem:[%s7497_s13 + $0x88] sm:$0xff]  ;;  %v5877_v46 = vld [vmem:[%s7494_s10 + $0x2] sm:$0x1] }
0x1301   : > { %v4602_v29 = vadd.f32 %v4598_v18, %v4551_v22  ;;  %v6129_v18 = vld [vmem:[%s7497_s13 + $0xa8] sm:$0xff] }
0x1302   : > { %5023 = vmatpush.bf16.msrb.mxu3 %v6129_v18 }
0x1303   : > { %v4609_v31 = vadd.f32 %v6210_v20, %v4602_v29  ;;  %v5017_v37 = vpop.f32.mrf.mxu1  ;;  %v6126_v20 = vld [vmem:[%s7497_s13 + $0x90] sm:$0xff] }
0x1305   : > { %v4611_v12 = vsel %vm542_vm1, %v4609_v31, 0.0 }
0x1306   : > { %v4612_v45 = vadd.f32 %v4611_v12, %v4610_v35  ;;  %v5004_v41 = vpop.f32.mrf.mxu0  ;;  %5024 = vmatpush.bf16.msrb.mxu3 %v6128_v44 }
0x1307   : > { %v5005_v14 = vadd.f32 %v5004_v41, %v4850_v38 }
0x1308   : > { %v4613_v16 = vrot.slane %v4612_v45, 4 }
0x1309   : > { %v7386_v48 = vadd.f32 %v5017_v37, %v5005_v14 }
0x130a   : > { %v4614_v49 = vadd.f32 %v4613_v16, %v4612_v45  ;;  %5025 = vmatpush.bf16.msrb.mxu3 %v6127_v19 }
0x130b   : > { %v5019_v11 = vpop.f32.mrf.mxu1 }
0x130c   : > { %v4615_v32 = vrot.slane %v4614_v49, 2 }
0x130e   : > { %v5006_v50 = vpop.f32.mrf.mxu0  ;;  %v4616_v9 = vadd.f32 %v4615_v32, %v4614_v49  ;;  %5026 = vmatpush.bf16.msrb.mxu3 %v6126_v20  ;;  %v5888_v49 = vld [vmem:[%s7495_s11 + $0x2] sm:$0x1] }
0x130f   : > { %v5889_v50 = vld [vmem:[%s7496_s12 + $0x2] sm:$0x1] }
0x1310   : > { %v4617_v39 = vrot.slane %v4616_v9, 1 }
0x1312   : > { %v4618_v51 = vadd.f32 %v4617_v39, %v4616_v9  ;;  %5027 = vmatpush.bf16.msrb.mxu3 %v6125_v15 }
0x1314   : > { %v4619_v54 = vmul.f32 %v4618_v51, %v6550_v47  ;;  %v5840_v47 = vld [vmem:[%s7492_s8 + $0x2] sm:$0x1] }
0x1316   : > { %4645 = vrot.lane.b32.xlu2 %v4619_v54, %s7546_s16  ;;  %5028 = vmatpush.bf16.msrb.mxu3 %v6124_v23 }
0x1370   : > { %v4646_v5 = vpop.permute.xlu2 %4645 }
0x1371   : > { %v4654_v36 = vsel %vm7556_vm3, %v4653_v4, %v4646_v5 }
0x1372   : > { %v4655_v6 = vpack.c.bf16 %v4654_v36, %v4654_v36 }
0x1374   : > { %4731 = vmatmul.bf16.vlgmr.msra.gmra.mxu2 %v4655_v6 }
0x13f7   : > { %v4732_v7 = vpop.f32.mrf.mxu2 }
0x13f8   : > { %v4733_v10 = vadd.f32 %v5840_v47, %v4732_v7 }
0x13fa   : > { %v4736_v13 = vmax.f32 %v4733_v10, 0.0 }
0x13fc   : > { %v4737_v53 = vpack.c.bf16 %v4736_v13, %v4736_v13 }
0x13fe   : > { %5886 = vmatmul.msk.bf16.vlgmr.msra.gmra.mxu3 %vm1953_vm8, %v4737_v53 }
0x13ff   : > { %v4734_v28 = vpop.f32.mrf.mxu2 }
0x1481   : > { %v4769_v22 = vpop.f32.mrf.mxu3 }
0x1482   : > { %v4770_v26 = vadd.f32 %v5877_v46, %v4769_v22 }
0x1484   : > { %v5887_v29 = vmul.f32 -1.442695, %v4770_v26 }
0x1486   : > { %6221 = vpow2.f32 %v5887_v29 }
0x1489   : > { %v4771_v31 = vpop.f32.mrf.mxu3 }
0x148c   : > { %v6222_v37 = vpop.eup %6221 }
0x148d   : > { %v4776_v38 = vadd.f32 1.0, %v6222_v37 }
0x148f   : > { %6223 = vrcp.f32 %v4776_v38  ;;  %v4788_v45 = vand.u32 2147483648, %v4776_v38  ;;  %v4786_v14 = vand.u32 2147483647, %v4776_v38  ;;  %vm4782_vm4 = vweird.f32 %v4776_v38 }
0x1491   : > { %v4789_v42 = vor.u32 1.1754944e-38, %v4788_v45  ;;  %vm4787_vm9 = vcmp.eq.f32.partialorder %v4786_v14, 8.507059e+37 }
0x1495   : > { %v6224_v17 = vpop.eup %6223 }
0x1496   : > { %v4778_v35 = vmul.f32 %v6224_v17, %v4776_v38  ;;  %vm4783_vm1 = vweird.f32 %v6224_v17 }
0x1497   : > { %vm4784_vm8 = vmor %vm4782_vm4, %vm4783_vm1 }
0x1498   : > { %v4779_v12 = vsub.f32 1.0, %v4778_v35 }
0x149a   : > { %v4780_v41 = vmul.f32 %v6224_v17, %v4779_v12 }
0x149c   : > { %v4781_v16 = vadd.f32 %v6224_v17, %v4780_v41 }
0x149e   : > { %v4785_v11 = vsel %vm4784_vm8, %v6224_v17, %v4781_v16 }
0x149f   : > { %v4790_v32 = vsel %vm4787_vm9, %v4789_v42, %v4785_v11 }
0x14a0   : > { %v4794_v40 = vmul.f32 %v5888_v49, %v4790_v32 }
0x14a2   : > { %v4797_v9 = vmul.f32 %v4794_v40, %v4654_v36 }
0x14a4   : > { %v4798_v39 = vadd.f32 %v5889_v50, %v4797_v9 }
0x14a6   : > { %v4801_v51 = vpack.c.bf16 %v4798_v39, %v4798_v39 }
0x14a8   : > { %5029 = vmatmul.bf16.vlgmr.msrb.gmra.mxu3 %v4801_v51 }
0x152b   : > { %v5030_v54 = vpop.f32.mrf.mxu3 }
0x152c   : > { %v5031_v21 = vadd.f32 %v5030_v54, %v7386_v48 }
0x152e   : > { %v5034_v55 = vmul.f32 %v5031_v21, %v5031_v21 }
0x1530   : > { %v5036_v25 = vsel %vm5035_vm10, %v5034_v55, 0.0 }
0x1531   : > { %5037 = vadd.xlane.f32.xlu0 %v5036_v25 }
0x1533   : > { %v5032_v43 = vpop.f32.mrf.mxu3 }
0x15a4   : > { %v5038_v56 = vpop.xlane.xlu0 %5037 }
0x15a5   : > { %v5039_v57 = vrot.slane %v5038_v56, 4 }
0x15a7   : > { %v5040_v58 = vadd.f32 %v5039_v57, %v5038_v56 }
0x15a9   : > { %v5041_v59 = vrot.slane %v5040_v58, 2 }
0x15ab   : > { %v5042_v60 = vadd.f32 %v5041_v59, %v5040_v58 }
0x15ad   : > { %v5043_v61 = vrot.slane %v5042_v60, 1 }
0x15af   : > { %v5044_v62 = vadd.f32 %v5043_v61, %v5042_v60 }
0x15b1   : > { %6132 = vpush %v5044_v62 }
0x15e2   : > { %s6133_s4 = spop %6132 }
0x15e3   : > { %v5046_v63 = vstv %s6133_s4  ;;  %s6252_s4 = scalar_lea.hbm %s7499_s15, 2 }
0x15e4   : > { %6225 = vrsqrt.f32 %v5046_v63  ;;  %vm5054_vm11 = vcmp.eq.f32.partialorder %v5046_v63, inf  ;;  %v5057_v1 = vand.u32 2147483648, %v5046_v63  ;;  %vm5056_vm2 = vcmp.eq.f32.partialorder %v5046_v63, 0.0  ;;  %p6254_p1 = scmp.lt.s32.totalorder %s6252_s4, %s6248_s22 }
0x15e6   : > { %p6255_p2 = por %p6254_p1, %p6253_p0 }
0x15e8   : > { %p6256_p3 = pnand %p6255_p2, %p6251_p13 }
0x15ea   : > { %v6226_v24 = vpop.eup %6225 }
0x15eb   : > { %v5048_v0 = vmul.f32 %v6226_v24, %v5046_v63 }
0x15ed   : > { %v5049_v48 = vmul.f32 %v6226_v24, %v5048_v0 }
0x15ef   : > { %v5050_v30 = vmul.f32 0.5, %v5049_v48 }
0x15f1   : > { %v5051_v33 = vsub.f32 1.5, %v5050_v30 }
0x15f3   : > { %v5052_v34 = vmul.f32 %v6226_v24, %v5051_v33 }
0x15f5   : > { %v5053_v52 = vmul.f32 %v5052_v34, %v5046_v63 }
0x15f7   : > { %v5055_v2 = vsel %vm5054_vm11, %v5046_v63, %v5053_v52 }
0x15f8   : > { %v5058_v3 = vsel %vm5056_vm2, %v5057_v1, %v5055_v2 }
0x15f9   : > { %6134 = vpush %v5058_v3 }
0x162a   : > { %s6135_s2 = spop %6134 }
0x162b   : > { %s5060_s27 = smax.f32 %s6310_s20, %s6135_s2 }
0x162c   : > { %v5061_v4 = vstv %s5060_s27 }
0x162d   : > { %6227 = vrcp.f32 %v5061_v4  ;;  %v5073_v47 = vand.u32 2147483648, %v5061_v4  ;;  %v5071_v10 = vand.u32 2147483647, %v5061_v4  ;;  %vm5067_vm6 = vweird.f32 %v5061_v4 }
0x162f   : > { %v5074_v53 = vor.u32 1.1754944e-38, %v5073_v47  ;;  %vm5072_vm12 = vcmp.eq.f32.partialorder %v5071_v10, 8.507059e+37 }
0x1633   : > { %v6228_v5 = vpop.eup %6227 }
0x1634   : > { %v5063_v36 = vmul.f32 %v6228_v5, %v5061_v4  ;;  %vm5068_vm5 = vweird.f32 %v6228_v5 }
0x1635   : > { %vm5069_vm13 = vmor %vm5067_vm6, %vm5068_vm5 }
0x1636   : > { %v5064_v6 = vsub.f32 1.0, %v5063_v36 }
0x1638   : > { %v5065_v7 = vmul.f32 %v6228_v5, %v5064_v6 }
0x163a   : > { %v5066_v13 = vadd.f32 %v6228_v5, %v5065_v7 }
0x163c   : > { %v5070_v28 = vsel %vm5069_vm13, %v6228_v5, %v5066_v13 }
0x163d   : > { %v5075_v27 = vsel %vm5072_vm12, %v5074_v53, %v5070_v28 }
0x163e   : > { %v5076_v8 = vmul.f32 %v5075_v27, %v5031_v21 }
0x1640   : > { %5077 = vst.msk [vmem:[%s486_s17] sm:$0x1] %vm5035_vm10, %v5076_v8 }
0x1641   : > { %6259 = shalt.err (!%p6256_p3)
}
0x1642   : > { %6136 = dma.vmem_to_hbm [thread:$0]  (%p6429_p5), %s5090_s26, 16, %s5092_s0, %s5079_s3  }
0x1643 PF: > { %p6142_p4 = scmp.ge.s32.totalorder %s6299_s21, 2  ;;  %s5103_s24 = sand.u32 1, %s6287_s18  }
0x1644   : > { %s5104_s1 = scalar_lea.sflag [#allocation6], %s5103_s24 }
0x1645   : > { %p6139_p7 = pnand %p6142_p4, %p6433_p6 }
0x1647   : > { %p6140_p8 = pneg %p6139_p7 }
0x1649   : > { %6277 = dma.done.wait (%p6140_p8), %s5104_s1, 16  }
0x164a   : > { %6279 = vsyncadd (%p6140_p8), %s5104_s1, 4294967280  ;;  %s7558_s21 = sld [smem:[#allocation9_spill]]  ;;  %s7561_s18 = smov %s6291_s19 }
0x164b   : > { %s7559_s16 = sld [smem:[#allocation8_spill]] }
0x164c   : > { %s7560_s20 = sld [smem:[#allocation10_spill]] }
0x1650   : > { %p25_p9 = scmp.ge.s32.totalorder %s7558_s21, 4  }
0x1651   : > { %s7562_s19 = smov %s7559_s16 }
0x1652   :  { %27 = sbr.rel (!%p25_p9) target bundleno = 9 (0x9), region = 167 }
0x1657   :  { %5109 = vsyncpa [#allocation6], 1 }
0x1658   :  { %5111 = vsyncpa [#allocation6 + $0x1], 1 }

</bundles_post_ra>
